<compile_context>
chip_gen: v5e
topology: v5e:2x2
jax: 0.10.0
libtpu: 0.0.40
codegen_flags: <defaults>
</compile_context>

<pallas_src>
import functools
import math

import jax
import jax.numpy as jnp
from jax import lax
from jax.experimental import pallas as pl
from jax.experimental.pallas import tpu as pltpu

# ---------------- model config (small, consistent with the forward) ---------
B = 2         # batch per siamese branch
S = 8         # sequence length
V = 64        # vocab size
VPAD = 128    # LM-head lane padding (full-width vst instead of masked stores)
D = 32        # d_model
H = 2         # attention heads
DH = D // H   # head dim
FF = 64       # feed-forward dim
EPS = 1e-5
M1 = B * S    # rows per siamese branch (flattened batch*seq)

# Ordered list of weight tensors passed to the fused kernel.
PARAM_ORDER = (
    "emb", "pos_t",
    "enc_self_wqkv", "enc_self_bqkv", "enc_self_wo", "enc_self_bo",
    "enc_ln1_g", "enc_ln1_b",
    "enc_ffn_w1", "enc_ffn_b1", "enc_ffn_w2", "enc_ffn_b2",
    "enc_ln2_g", "enc_ln2_b",
    "dec_self_wqkv", "dec_self_bqkv", "dec_self_wo", "dec_self_bo",
    "dec_ln1_g", "dec_ln1_b",
    "dec_cross_wq", "dec_cross_bq", "dec_cross_wkv", "dec_cross_bkv",
    "dec_cross_wo", "dec_cross_bo",
    "dec_ln2_g", "dec_ln2_b",
    "dec_ffn_w1", "dec_ffn_b1", "dec_ffn_w2", "dec_ffn_b2",
    "dec_ln3_g", "dec_ln3_b",
    "lm_w", "lm_b",
)


# ---------------- single fused encoder-decoder kernel ------------------------
def _fused_encdec_kernel(ids_ref, *refs):
    out_ref = refs[-1]
    p = dict(zip(PARAM_ORDER, refs[:-1]))
    scale = 1.0 / math.sqrt(DH)

    # ---- embedding lookup as a one-hot matmul (MXU-friendly gather) ----
    ids = ids_ref[0]                                           # (M1, 1) int32
    vocab_iota = lax.broadcasted_iota(jnp.int32, (M1, V), 1)
    onehot = (vocab_iota == ids).astype(jnp.float32)           # (M1, V)
    x = jnp.dot(onehot, p["emb"][...], preferred_element_type=jnp.float32)
    x = x + p["pos_t"][...]                                    # (M1, D)

    def layer_norm(y, g_name, b_name):
        mu = jnp.mean(y, axis=-1, keepdims=True)
        var = jnp.mean((y - mu) * (y - mu), axis=-1, keepdims=True)
        yn = (y - mu) * lax.rsqrt(var + EPS)
        return yn * p[g_name][...] + p[b_name][...]

    def mha(q_all, k_all, v_all, wo_name, bo_name, causal):
        # q_all/k_all/v_all: (M1, D) values; heads split on the lane axis.
        rows = []
        for b in range(B):
            r0 = b * S
            heads = []
            for h in range(H):
                c0 = h * DH
                qh = q_all[r0:r0 + S, c0:c0 + DH]              # (S, DH)
                kh = k_all[r0:r0 + S, c0:c0 + DH]
                vh = v_all[r0:r0 + S, c0:c0 + DH]
                # contract head dims directly (no explicit k.T transpose)
                s = lax.dot_general(
                    qh, kh, (((1,), (1,)), ((), ())),
                    preferred_element_type=jnp.float32) * scale  # (S, S)
                if causal:
                    ri = lax.broadcasted_iota(jnp.int32, (S, S), 0)
                    ci = lax.broadcasted_iota(jnp.int32, (S, S), 1)
                    s = jnp.where(ci <= ri, s, jnp.float32(-1e30))
                m = jnp.max(s, axis=-1, keepdims=True)
                e = jnp.exp(s - m)
                denom = jnp.sum(e, axis=-1, keepdims=True)
                pa = e * pl.reciprocal(denom, approx=True)       # EUP slot
                heads.append(jnp.dot(pa, vh,
                                     preferred_element_type=jnp.float32))
            rows.append(jnp.concatenate(heads, axis=1))          # (S, D)
        o = jnp.concatenate(rows, axis=0)                        # (M1, D)
        return (jnp.dot(o, p[wo_name][...],
                        preferred_element_type=jnp.float32) + p[bo_name][...])

    def self_attn(y, pre, causal):
        qkv = (jnp.dot(y, p[pre + "_wqkv"][...],
                       preferred_element_type=jnp.float32)
               + p[pre + "_bqkv"][...])                          # (M1, 3D)
        return mha(qkv[:, 0:D], qkv[:, D:2 * D], qkv[:, 2 * D:3 * D],
                   pre + "_wo", pre + "_bo", causal)

    def cross_attn(yq, ykv, pre):
        q = (jnp.dot(yq, p[pre + "_wq"][...],
                     preferred_element_type=jnp.float32) + p[pre + "_bq"][...])
        kv = (jnp.dot(ykv, p[pre + "_wkv"][...],
                      preferred_element_type=jnp.float32) + p[pre + "_bkv"][...])
        return mha(q, kv[:, 0:D], kv[:, D:2 * D],
                   pre + "_wo", pre + "_bo", False)

    def ffn(y, pre):
        hid = (jnp.dot(y, p[pre + "_w1"][...],
                       preferred_element_type=jnp.float32) + p[pre + "_b1"][...])
        hid = jnp.maximum(hid, 0.0)
        return (jnp.dot(hid, p[pre + "_w2"][...],
                        preferred_element_type=jnp.float32) + p[pre + "_b2"][...])

    # ---- encoder (1 layer) ----
    h = x
    h = layer_norm(h + self_attn(h, "enc_self", False), "enc_ln1_g", "enc_ln1_b")
    h = layer_norm(h + ffn(h, "enc_ffn"), "enc_ln2_g", "enc_ln2_b")
    enc_out = h

    # ---- decoder (1 layer) ----
    # TODO(synk): HF EncoderDecoderModel needs decoder_input_ids; we reuse
    # input_ids as decoder inputs (shared embedding), matching a synthetic run.
    d = x
    d = layer_norm(d + self_attn(d, "dec_self", True), "dec_ln1_g", "dec_ln1_b")
    d = layer_norm(d + cross_attn(d, enc_out, "dec_cross"),
                   "dec_ln2_g", "dec_ln2_b")
    d = layer_norm(d + ffn(d, "dec_ffn"), "dec_ln3_g", "dec_ln3_b")

    # ---- LM head (lane-dense: V padded to 128) ----
    logits = (jnp.dot(d, p["lm_w"][...],
                      preferred_element_type=jnp.float32) + p["lm_b"][...])
    out_ref[0] = logits.astype(out_ref.dtype)


def _replicated_map(*args, nd):
    # Weights: same (full) block for every grid step.
    return (0,) * nd


def siamese_autoencoder_forward(params, input_ids1, input_ids2):
    # Shared weights ("Siamese"): both branches run in ONE pallas_call,
    # grid axis = siamese branch (parallel -> one branch per TC on v7x).
    ids = jnp.stack(
        [input_ids1.reshape(-1), input_ids2.reshape(-1)], axis=0
    ).astype(jnp.int32)[..., None]                               # (2, M1, 1)

    weights = [params[name] for name in PARAM_ORDER]

    in_specs = [pl.BlockSpec((1, M1, 1), lambda i: (i, 0, 0))]
    for wgt in weights:
        in_specs.append(
            pl.BlockSpec(wgt.shape,
                         functools.partial(_replicated_map, nd=wgt.ndim)))

    out = pl.pallas_call(
        _fused_encdec_kernel,
        grid=(2,),
        in_specs=in_specs,
        out_specs=pl.BlockSpec((1, M1, VPAD), lambda i: (i, 0, 0)),
        out_shape=jax.ShapeDtypeStruct((2, M1, VPAD), jnp.float32),
        compiler_params=pltpu.CompilerParams(
            dimension_semantics=("parallel",)),
    )(ids, *weights)

    logits = out[:, :, :V].reshape(2, B, S, V)
    return logits[0], logits[1]


# ---------------- deterministic parameter init -------------------------------
def init_params(key):
    p = {}
    keys = iter(jax.random.split(key, 64))

    def w(shape, scale=0.02):
        return (scale * jax.random.normal(next(keys), shape)).astype(jnp.float32)

    p["emb"] = w((V, D))
    pos = w((S, D))
    p["pos_t"] = jnp.tile(pos, (B, 1))            # pre-tiled (B*S, D)

    for pre in ("enc_self", "dec_self"):          # fused QKV
        p[f"{pre}_wqkv"] = w((D, 3 * D))
        p[f"{pre}_bqkv"] = jnp.zeros((1, 3 * D), jnp.float32)
        p[f"{pre}_wo"] = w((D, D))
        p[f"{pre}_bo"] = jnp.zeros((1, D), jnp.float32)

    p["dec_cross_wq"] = w((D, D))
    p["dec_cross_bq"] = jnp.zeros((1, D), jnp.float32)
    p["dec_cross_wkv"] = w((D, 2 * D))            # fused KV for cross-attn
    p["dec_cross_bkv"] = jnp.zeros((1, 2 * D), jnp.float32)
    p["dec_cross_wo"] = w((D, D))
    p["dec_cross_bo"] = jnp.zeros((1, D), jnp.float32)

    for pre in ("enc_ffn", "dec_ffn"):
        p[f"{pre}_w1"] = w((D, FF))
        p[f"{pre}_b1"] = jnp.zeros((1, FF), jnp.float32)
        p[f"{pre}_w2"] = w((FF, D))
        p[f"{pre}_b2"] = jnp.zeros((1, D), jnp.float32)

    for nm in ("enc_ln1", "enc_ln2", "dec_ln1", "dec_ln2", "dec_ln3"):
        p[f"{nm}_g"] = jnp.ones((1, D), jnp.float32)
        p[f"{nm}_b"] = jnp.zeros((1, D), jnp.float32)

    lm_w = w((D, V))
    p["lm_w"] = jnp.pad(lm_w, ((0, 0), (0, VPAD - V)))   # lane-dense LM head
    p["lm_b"] = jnp.zeros((1, VPAD), jnp.float32)
    return p


# ---------------- main --------------------------------------------------------
if __name__ == "__main__":
    key = jax.random.PRNGKey(0)
    k_par, k_id1, k_id2 = jax.random.split(key, 3)

    params = init_params(k_par)
    input_ids1 = jax.random.randint(k_id1, (B, S), 0, V, dtype=jnp.int32)
    input_ids2 = jax.random.randint(k_id2, (B, S), 0, V, dtype=jnp.int32)

    fwd = jax.jit(siamese_autoencoder_forward)
    out1, out2 = fwd(params, input_ids1, input_ids2)
    jax.block_until_ready((out1, out2))

    assert out1.shape == (B, S, V) and out2.shape == (B, S, V)
    assert jnp.all(jnp.isfinite(out1)) and jnp.all(jnp.isfinite(out2))
    print("KERNEL_OK")
</pallas_src>

<mosaic_0001>
module attributes {stable_mosaic.version = 11 : i64} {
  func.func @_fused_encdec_kernel(%arg0: i32, %arg1: memref<1x16x1xi32, #tpu.memory_space<vmem>>, %arg2: memref<64x32xf32, #tpu.memory_space<vmem>>, %arg3: memref<16x32xf32, #tpu.memory_space<vmem>>, %arg4: memref<32x96xf32, #tpu.memory_space<vmem>>, %arg5: memref<1x96xf32, #tpu.memory_space<vmem>>, %arg6: memref<32x32xf32, #tpu.memory_space<vmem>>, %arg7: memref<1x32xf32, #tpu.memory_space<vmem>>, %arg8: memref<1x32xf32, #tpu.memory_space<vmem>>, %arg9: memref<1x32xf32, #tpu.memory_space<vmem>>, %arg10: memref<32x64xf32, #tpu.memory_space<vmem>>, %arg11: memref<1x64xf32, #tpu.memory_space<vmem>>, %arg12: memref<64x32xf32, #tpu.memory_space<vmem>>, %arg13: memref<1x32xf32, #tpu.memory_space<vmem>>, %arg14: memref<1x32xf32, #tpu.memory_space<vmem>>, %arg15: memref<1x32xf32, #tpu.memory_space<vmem>>, %arg16: memref<32x96xf32, #tpu.memory_space<vmem>>, %arg17: memref<1x96xf32, #tpu.memory_space<vmem>>, %arg18: memref<32x32xf32, #tpu.memory_space<vmem>>, %arg19: memref<1x32xf32, #tpu.memory_space<vmem>>, %arg20: memref<1x32xf32, #tpu.memory_space<vmem>>, %arg21: memref<1x32xf32, #tpu.memory_space<vmem>>, %arg22: memref<32x32xf32, #tpu.memory_space<vmem>>, %arg23: memref<1x32xf32, #tpu.memory_space<vmem>>, %arg24: memref<32x64xf32, #tpu.memory_space<vmem>>, %arg25: memref<1x64xf32, #tpu.memory_space<vmem>>, %arg26: memref<32x32xf32, #tpu.memory_space<vmem>>, %arg27: memref<1x32xf32, #tpu.memory_space<vmem>>, %arg28: memref<1x32xf32, #tpu.memory_space<vmem>>, %arg29: memref<1x32xf32, #tpu.memory_space<vmem>>, %arg30: memref<32x64xf32, #tpu.memory_space<vmem>>, %arg31: memref<1x64xf32, #tpu.memory_space<vmem>>, %arg32: memref<64x32xf32, #tpu.memory_space<vmem>>, %arg33: memref<1x32xf32, #tpu.memory_space<vmem>>, %arg34: memref<1x32xf32, #tpu.memory_space<vmem>>, %arg35: memref<1x32xf32, #tpu.memory_space<vmem>>, %arg36: memref<32x128xf32, #tpu.memory_space<vmem>>, %arg37: memref<1x128xf32, #tpu.memory_space<vmem>>, %arg38: memref<1x16x128xf32, #tpu.memory_space<vmem>>) attributes {dimension_semantics = [#tpu.dimension_semantics<parallel>], iteration_bounds = array<i64: 2>, scalar_prefetch = 0 : i64, scratch_operands = 0 : i64, tpu.core_type = #tpu.core_type<tc>, window_params = [{transform_indices = @transform_0, window_bounds = array<i64: 1, 16, 1>}, {pipeline_mode = #tpu.pipeline_mode<synchronous>, transform_indices = @transform_1, window_bounds = array<i64: 64, 32>}, {pipeline_mode = #tpu.pipeline_mode<synchronous>, transform_indices = @transform_2, window_bounds = array<i64: 16, 32>}, {pipeline_mode = #tpu.pipeline_mode<synchronous>, transform_indices = @transform_3, window_bounds = array<i64: 32, 96>}, {pipeline_mode = #tpu.pipeline_mode<synchronous>, transform_indices = @transform_4, window_bounds = array<i64: 1, 96>}, {pipeline_mode = #tpu.pipeline_mode<synchronous>, transform_indices = @transform_5, window_bounds = array<i64: 32, 32>}, {pipeline_mode = #tpu.pipeline_mode<synchronous>, transform_indices = @transform_6, window_bounds = array<i64: 1, 32>}, {pipeline_mode = #tpu.pipeline_mode<synchronous>, transform_indices = @transform_7, window_bounds = array<i64: 1, 32>}, {pipeline_mode = #tpu.pipeline_mode<synchronous>, transform_indices = @transform_8, window_bounds = array<i64: 1, 32>}, {pipeline_mode = #tpu.pipeline_mode<synchronous>, transform_indices = @transform_9, window_bounds = array<i64: 32, 64>}, {pipeline_mode = #tpu.pipeline_mode<synchronous>, transform_indices = @transform_10, window_bounds = array<i64: 1, 64>}, {pipeline_mode = #tpu.pipeline_mode<synchronous>, transform_indices = @transform_11, window_bounds = array<i64: 64, 32>}, {pipeline_mode = #tpu.pipeline_mode<synchronous>, transform_indices = @transform_12, window_bounds = array<i64: 1, 32>}, {pipeline_mode = #tpu.pipeline_mode<synchronous>, transform_indices = @transform_13, window_bounds = array<i64: 1, 32>}, {pipeline_mode = #tpu.pipeline_mode<synchronous>, transform_indices = @transform_14, window_bounds = array<i64: 1, 32>}, {pipeline_mode = #tpu.pipeline_mode<synchronous>, transform_indices = @transform_15, window_bounds = array<i64: 32, 96>}, {pipeline_mode = #tpu.pipeline_mode<synchronous>, transform_indices = @transform_16, window_bounds = array<i64: 1, 96>}, {pipeline_mode = #tpu.pipeline_mode<synchronous>, transform_indices = @transform_17, window_bounds = array<i64: 32, 32>}, {pipeline_mode = #tpu.pipeline_mode<synchronous>, transform_indices = @transform_18, window_bounds = array<i64: 1, 32>}, {pipeline_mode = #tpu.pipeline_mode<synchronous>, transform_indices = @transform_19, window_bounds = array<i64: 1, 32>}, {pipeline_mode = #tpu.pipeline_mode<synchronous>, transform_indices = @transform_20, window_bounds = array<i64: 1, 32>}, {pipeline_mode = #tpu.pipeline_mode<synchronous>, transform_indices = @transform_21, window_bounds = array<i64: 32, 32>}, {pipeline_mode = #tpu.pipeline_mode<synchronous>, transform_indices = @transform_22, window_bounds = array<i64: 1, 32>}, {pipeline_mode = #tpu.pipeline_mode<synchronous>, transform_indices = @transform_23, window_bounds = array<i64: 32, 64>}, {pipeline_mode = #tpu.pipeline_mode<synchronous>, transform_indices = @transform_24, window_bounds = array<i64: 1, 64>}, {pipeline_mode = #tpu.pipeline_mode<synchronous>, transform_indices = @transform_25, window_bounds = array<i64: 32, 32>}, {pipeline_mode = #tpu.pipeline_mode<synchronous>, transform_indices = @transform_26, window_bounds = array<i64: 1, 32>}, {pipeline_mode = #tpu.pipeline_mode<synchronous>, transform_indices = @transform_27, window_bounds = array<i64: 1, 32>}, {pipeline_mode = #tpu.pipeline_mode<synchronous>, transform_indices = @transform_28, window_bounds = array<i64: 1, 32>}, {pipeline_mode = #tpu.pipeline_mode<synchronous>, transform_indices = @transform_29, window_bounds = array<i64: 32, 64>}, {pipeline_mode = #tpu.pipeline_mode<synchronous>, transform_indices = @transform_30, window_bounds = array<i64: 1, 64>}, {pipeline_mode = #tpu.pipeline_mode<synchronous>, transform_indices = @transform_31, window_bounds = array<i64: 64, 32>}, {pipeline_mode = #tpu.pipeline_mode<synchronous>, transform_indices = @transform_32, window_bounds = array<i64: 1, 32>}, {pipeline_mode = #tpu.pipeline_mode<synchronous>, transform_indices = @transform_33, window_bounds = array<i64: 1, 32>}, {pipeline_mode = #tpu.pipeline_mode<synchronous>, transform_indices = @transform_34, window_bounds = array<i64: 1, 32>}, {pipeline_mode = #tpu.pipeline_mode<synchronous>, transform_indices = @transform_35, window_bounds = array<i64: 32, 128>}, {pipeline_mode = #tpu.pipeline_mode<synchronous>, transform_indices = @transform_36, window_bounds = array<i64: 1, 128>}, {transform_indices = @transform_37, window_bounds = array<i64: 1, 16, 128>}]} {
    %c0 = arith.constant 0 : index
    %c0_0 = arith.constant 0 : index
    %c0_1 = arith.constant 0 : index
    %0 = vector.load %arg1[%c0, %c0_0, %c0_1] : memref<1x16x1xi32, #tpu.memory_space<vmem>>, vector<1x16x1xi32>
    %1 = vector.shape_cast %0 : vector<1x16x1xi32> to vector<16x1xi32>
    %2 = tpu.iota {dimensions = array<i32: 1>} : vector<16x64xi32>
    %3 = vector.broadcast %1 : vector<16x1xi32> to vector<16x64xi32>
    %4 = arith.cmpi eq, %2, %3 : vector<16x64xi32>
    %5 = arith.extui %4 : vector<16x64xi1> to vector<16x64xi32>
    %6 = arith.sitofp %5 : vector<16x64xi32> to vector<16x64xf32>
    %c0_2 = arith.constant 0 : index
    %c0_3 = arith.constant 0 : index
    %7 = vector.load %arg2[%c0_2, %c0_3] : memref<64x32xf32, #tpu.memory_space<vmem>>, vector<64x32xf32>
    %cst = arith.constant dense<0.000000e+00> : vector<16x32xf32>
    %8 = tpu.matmul %6, %7, %cst {dimension_numbers = #tpu.dot_dimension_numbers<[1], [0], [0], [1], [0, 0, 1, 1], [], []>} : vector<16x64xf32>, vector<64x32xf32>, vector<16x32xf32> -> vector<16x32xf32>
    %c0_4 = arith.constant 0 : index
    %c0_5 = arith.constant 0 : index
    %9 = vector.load %arg3[%c0_4, %c0_5] : memref<16x32xf32, #tpu.memory_space<vmem>>, vector<16x32xf32>
    %10 = arith.addf %8, %9 : vector<16x32xf32>
    %c0_6 = arith.constant 0 : index
    %c0_7 = arith.constant 0 : index
    %11 = vector.load %arg4[%c0_6, %c0_7] : memref<32x96xf32, #tpu.memory_space<vmem>>, vector<32x96xf32>
    %cst_8 = arith.constant dense<0.000000e+00> : vector<16x96xf32>
    %12 = tpu.matmul %10, %11, %cst_8 {dimension_numbers = #tpu.dot_dimension_numbers<[1], [0], [0], [1], [0, 0, 1, 1], [], []>} : vector<16x32xf32>, vector<32x96xf32>, vector<16x96xf32> -> vector<16x96xf32>
    %c0_9 = arith.constant 0 : index
    %c0_10 = arith.constant 0 : index
    %13 = vector.load %arg5[%c0_9, %c0_10] : memref<1x96xf32, #tpu.memory_space<vmem>>, vector<1x96xf32>
    %14 = vector.broadcast %13 : vector<1x96xf32> to vector<16x96xf32>
    %15 = arith.addf %12, %14 : vector<16x96xf32>
    %16 = vector.extract_strided_slice %15 {offsets = [0, 0], sizes = [16, 32], strides = [1, 1]} : vector<16x96xf32> to vector<16x32xf32>
    %17 = vector.extract_strided_slice %15 {offsets = [0, 32], sizes = [16, 32], strides = [1, 1]} : vector<16x96xf32> to vector<16x32xf32>
    %18 = vector.extract_strided_slice %15 {offsets = [0, 64], sizes = [16, 32], strides = [1, 1]} : vector<16x96xf32> to vector<16x32xf32>
    %19 = vector.extract_strided_slice %16 {offsets = [0, 0], sizes = [8, 16], strides = [1, 1]} : vector<16x32xf32> to vector<8x16xf32>
    %20 = vector.extract_strided_slice %17 {offsets = [0, 0], sizes = [8, 16], strides = [1, 1]} : vector<16x32xf32> to vector<8x16xf32>
    %21 = vector.extract_strided_slice %18 {offsets = [0, 0], sizes = [8, 16], strides = [1, 1]} : vector<16x32xf32> to vector<8x16xf32>
    %cst_11 = arith.constant dense<0.000000e+00> : vector<8x8xf32>
    %22 = tpu.matmul %19, %20, %cst_11 {dimension_numbers = #tpu.dot_dimension_numbers<[1], [1], [0], [0], [0, 0, 1, 0], [], []>} : vector<8x16xf32>, vector<8x16xf32>, vector<8x8xf32> -> vector<8x8xf32>
    %cst_12 = arith.constant 2.500000e-01 : f32
    %23 = vector.broadcast %cst_12 : f32 to vector<8x8xf32>
    %24 = arith.mulf %22, %23 : vector<8x8xf32>
    %cst_13 = arith.constant dense<0xFF800000> : vector<8xf32>
    %25 = vector.multi_reduction <maximumf>, %24, %cst_13 [1] : vector<8x8xf32> to vector<8xf32>
    %26 = vector.shape_cast %25 : vector<8xf32> to vector<8x1xf32>
    %27 = vector.broadcast %26 : vector<8x1xf32> to vector<8x8xf32>
    %28 = arith.subf %24, %27 : vector<8x8xf32>
    %29 = math.exp %28 : vector<8x8xf32>
    %cst_14 = arith.constant dense<0.000000e+00> : vector<8xf32>
    %30 = vector.multi_reduction <add>, %29, %cst_14 [1] : vector<8x8xf32> to vector<8xf32>
    %31 = vector.shape_cast %30 : vector<8xf32> to vector<8x1xf32>
    %32 = tpu.reciprocal %31 {approx = true} : vector<8x1xf32> -> vector<8x1xf32>
    %33 = vector.broadcast %32 : vector<8x1xf32> to vector<8x8xf32>
    %34 = arith.mulf %29, %33 : vector<8x8xf32>
    %cst_15 = arith.constant dense<0.000000e+00> : vector<8x16xf32>
    %35 = tpu.matmul %34, %21, %cst_15 {dimension_numbers = #tpu.dot_dimension_numbers<[1], [0], [0], [1], [0, 0, 1, 1], [], []>} : vector<8x8xf32>, vector<8x16xf32>, vector<8x16xf32> -> vector<8x16xf32>
    %36 = vector.extract_strided_slice %16 {offsets = [0, 16], sizes = [8, 16], strides = [1, 1]} : vector<16x32xf32> to vector<8x16xf32>
    %37 = vector.extract_strided_slice %17 {offsets = [0, 16], sizes = [8, 16], strides = [1, 1]} : vector<16x32xf32> to vector<8x16xf32>
    %38 = vector.extract_strided_slice %18 {offsets = [0, 16], sizes = [8, 16], strides = [1, 1]} : vector<16x32xf32> to vector<8x16xf32>
    %cst_16 = arith.constant dense<0.000000e+00> : vector<8x8xf32>
    %39 = tpu.matmul %36, %37, %cst_16 {dimension_numbers = #tpu.dot_dimension_numbers<[1], [1], [0], [0], [0, 0, 1, 0], [], []>} : vector<8x16xf32>, vector<8x16xf32>, vector<8x8xf32> -> vector<8x8xf32>
    %cst_17 = arith.constant 2.500000e-01 : f32
    %40 = vector.broadcast %cst_17 : f32 to vector<8x8xf32>
    %41 = arith.mulf %39, %40 : vector<8x8xf32>
    %cst_18 = arith.constant dense<0xFF800000> : vector<8xf32>
    %42 = vector.multi_reduction <maximumf>, %41, %cst_18 [1] : vector<8x8xf32> to vector<8xf32>
    %43 = vector.shape_cast %42 : vector<8xf32> to vector<8x1xf32>
    %44 = vector.broadcast %43 : vector<8x1xf32> to vector<8x8xf32>
    %45 = arith.subf %41, %44 : vector<8x8xf32>
    %46 = math.exp %45 : vector<8x8xf32>
    %cst_19 = arith.constant dense<0.000000e+00> : vector<8xf32>
    %47 = vector.multi_reduction <add>, %46, %cst_19 [1] : vector<8x8xf32> to vector<8xf32>
    %48 = vector.shape_cast %47 : vector<8xf32> to vector<8x1xf32>
    %49 = tpu.reciprocal %48 {approx = true} : vector<8x1xf32> -> vector<8x1xf32>
    %50 = vector.broadcast %49 : vector<8x1xf32> to vector<8x8xf32>
    %51 = arith.mulf %46, %50 : vector<8x8xf32>
    %cst_20 = arith.constant dense<0.000000e+00> : vector<8x16xf32>
    %52 = tpu.matmul %51, %38, %cst_20 {dimension_numbers = #tpu.dot_dimension_numbers<[1], [0], [0], [1], [0, 0, 1, 1], [], []>} : vector<8x8xf32>, vector<8x16xf32>, vector<8x16xf32> -> vector<8x16xf32>
    %53 = tpu.concatenate %35, %52 in 1 : vector<8x16xf32>, vector<8x16xf32> -> vector<8x32xf32>
    %54 = vector.extract_strided_slice %16 {offsets = [8, 0], sizes = [8, 16], strides = [1, 1]} : vector<16x32xf32> to vector<8x16xf32>
    %55 = vector.extract_strided_slice %17 {offsets = [8, 0], sizes = [8, 16], strides = [1, 1]} : vector<16x32xf32> to vector<8x16xf32>
    %56 = vector.extract_strided_slice %18 {offsets = [8, 0], sizes = [8, 16], strides = [1, 1]} : vector<16x32xf32> to vector<8x16xf32>
    %cst_21 = arith.constant dense<0.000000e+00> : vector<8x8xf32>
    %57 = tpu.matmul %54, %55, %cst_21 {dimension_numbers = #tpu.dot_dimension_numbers<[1], [1], [0], [0], [0, 0, 1, 0], [], []>} : vector<8x16xf32>, vector<8x16xf32>, vector<8x8xf32> -> vector<8x8xf32>
    %cst_22 = arith.constant 2.500000e-01 : f32
    %58 = vector.broadcast %cst_22 : f32 to vector<8x8xf32>
    %59 = arith.mulf %57, %58 : vector<8x8xf32>
    %cst_23 = arith.constant dense<0xFF800000> : vector<8xf32>
    %60 = vector.multi_reduction <maximumf>, %59, %cst_23 [1] : vector<8x8xf32> to vector<8xf32>
    %61 = vector.shape_cast %60 : vector<8xf32> to vector<8x1xf32>
    %62 = vector.broadcast %61 : vector<8x1xf32> to vector<8x8xf32>
    %63 = arith.subf %59, %62 : vector<8x8xf32>
    %64 = math.exp %63 : vector<8x8xf32>
    %cst_24 = arith.constant dense<0.000000e+00> : vector<8xf32>
    %65 = vector.multi_reduction <add>, %64, %cst_24 [1] : vector<8x8xf32> to vector<8xf32>
    %66 = vector.shape_cast %65 : vector<8xf32> to vector<8x1xf32>
    %67 = tpu.reciprocal %66 {approx = true} : vector<8x1xf32> -> vector<8x1xf32>
    %68 = vector.broadcast %67 : vector<8x1xf32> to vector<8x8xf32>
    %69 = arith.mulf %64, %68 : vector<8x8xf32>
    %cst_25 = arith.constant dense<0.000000e+00> : vector<8x16xf32>
    %70 = tpu.matmul %69, %56, %cst_25 {dimension_numbers = #tpu.dot_dimension_numbers<[1], [0], [0], [1], [0, 0, 1, 1], [], []>} : vector<8x8xf32>, vector<8x16xf32>, vector<8x16xf32> -> vector<8x16xf32>
    %71 = vector.extract_strided_slice %16 {offsets = [8, 16], sizes = [8, 16], strides = [1, 1]} : vector<16x32xf32> to vector<8x16xf32>
    %72 = vector.extract_strided_slice %17 {offsets = [8, 16], sizes = [8, 16], strides = [1, 1]} : vector<16x32xf32> to vector<8x16xf32>
    %73 = vector.extract_strided_slice %18 {offsets = [8, 16], sizes = [8, 16], strides = [1, 1]} : vector<16x32xf32> to vector<8x16xf32>
    %cst_26 = arith.constant dense<0.000000e+00> : vector<8x8xf32>
    %74 = tpu.matmul %71, %72, %cst_26 {dimension_numbers = #tpu.dot_dimension_numbers<[1], [1], [0], [0], [0, 0, 1, 0], [], []>} : vector<8x16xf32>, vector<8x16xf32>, vector<8x8xf32> -> vector<8x8xf32>
    %cst_27 = arith.constant 2.500000e-01 : f32
    %75 = vector.broadcast %cst_27 : f32 to vector<8x8xf32>
    %76 = arith.mulf %74, %75 : vector<8x8xf32>
    %cst_28 = arith.constant dense<0xFF800000> : vector<8xf32>
    %77 = vector.multi_reduction <maximumf>, %76, %cst_28 [1] : vector<8x8xf32> to vector<8xf32>
    %78 = vector.shape_cast %77 : vector<8xf32> to vector<8x1xf32>
    %79 = vector.broadcast %78 : vector<8x1xf32> to vector<8x8xf32>
    %80 = arith.subf %76, %79 : vector<8x8xf32>
    %81 = math.exp %80 : vector<8x8xf32>
    %cst_29 = arith.constant dense<0.000000e+00> : vector<8xf32>
    %82 = vector.multi_reduction <add>, %81, %cst_29 [1] : vector<8x8xf32> to vector<8xf32>
    %83 = vector.shape_cast %82 : vector<8xf32> to vector<8x1xf32>
    %84 = tpu.reciprocal %83 {approx = true} : vector<8x1xf32> -> vector<8x1xf32>
    %85 = vector.broadcast %84 : vector<8x1xf32> to vector<8x8xf32>
    %86 = arith.mulf %81, %85 : vector<8x8xf32>
    %cst_30 = arith.constant dense<0.000000e+00> : vector<8x16xf32>
    %87 = tpu.matmul %86, %73, %cst_30 {dimension_numbers = #tpu.dot_dimension_numbers<[1], [0], [0], [1], [0, 0, 1, 1], [], []>} : vector<8x8xf32>, vector<8x16xf32>, vector<8x16xf32> -> vector<8x16xf32>
    %88 = tpu.concatenate %70, %87 in 1 : vector<8x16xf32>, vector<8x16xf32> -> vector<8x32xf32>
    %89 = tpu.concatenate %53, %88 in 0 : vector<8x32xf32>, vector<8x32xf32> -> vector<16x32xf32>
    %c0_31 = arith.constant 0 : index
    %c0_32 = arith.constant 0 : index
    %90 = vector.load %arg6[%c0_31, %c0_32] : memref<32x32xf32, #tpu.memory_space<vmem>>, vector<32x32xf32>
    %cst_33 = arith.constant dense<0.000000e+00> : vector<16x32xf32>
    %91 = tpu.matmul %89, %90, %cst_33 {dimension_numbers = #tpu.dot_dimension_numbers<[1], [0], [0], [1], [0, 0, 1, 1], [], []>} : vector<16x32xf32>, vector<32x32xf32>, vector<16x32xf32> -> vector<16x32xf32>
    %c0_34 = arith.constant 0 : index
    %c0_35 = arith.constant 0 : index
    %92 = vector.load %arg7[%c0_34, %c0_35] : memref<1x32xf32, #tpu.memory_space<vmem>>, vector<1x32xf32>
    %93 = vector.broadcast %92 : vector<1x32xf32> to vector<16x32xf32>
    %94 = arith.addf %91, %93 : vector<16x32xf32>
    %95 = arith.addf %10, %94 : vector<16x32xf32>
    %cst_36 = arith.constant dense<0.000000e+00> : vector<16xf32>
    %96 = vector.multi_reduction <add>, %95, %cst_36 [1] : vector<16x32xf32> to vector<16xf32>
    %97 = vector.shape_cast %96 : vector<16xf32> to vector<16x1xf32>
    %cst_37 = arith.constant 3.200000e+01 : f32
    %98 = vector.broadcast %cst_37 : f32 to vector<16x1xf32>
    %99 = arith.divf %97, %98 : vector<16x1xf32>
    %100 = vector.broadcast %99 : vector<16x1xf32> to vector<16x32xf32>
    %101 = arith.subf %95, %100 : vector<16x32xf32>
    %102 = vector.broadcast %99 : vector<16x1xf32> to vector<16x32xf32>
    %103 = arith.subf %95, %102 : vector<16x32xf32>
    %104 = arith.mulf %101, %103 : vector<16x32xf32>
    %cst_38 = arith.constant dense<0.000000e+00> : vector<16xf32>
    %105 = vector.multi_reduction <add>, %104, %cst_38 [1] : vector<16x32xf32> to vector<16xf32>
    %106 = vector.shape_cast %105 : vector<16xf32> to vector<16x1xf32>
    %cst_39 = arith.constant 3.200000e+01 : f32
    %107 = vector.broadcast %cst_39 : f32 to vector<16x1xf32>
    %108 = arith.divf %106, %107 : vector<16x1xf32>
    %109 = vector.broadcast %99 : vector<16x1xf32> to vector<16x32xf32>
    %110 = arith.subf %95, %109 : vector<16x32xf32>
    %cst_40 = arith.constant 9.99999974E-6 : f32
    %111 = vector.broadcast %cst_40 : f32 to vector<16x1xf32>
    %112 = arith.addf %108, %111 : vector<16x1xf32>
    %113 = math.rsqrt %112 : vector<16x1xf32>
    %114 = vector.broadcast %113 : vector<16x1xf32> to vector<16x32xf32>
    %115 = arith.mulf %110, %114 : vector<16x32xf32>
    %c0_41 = arith.constant 0 : index
    %c0_42 = arith.constant 0 : index
    %116 = vector.load %arg8[%c0_41, %c0_42] : memref<1x32xf32, #tpu.memory_space<vmem>>, vector<1x32xf32>
    %117 = vector.broadcast %116 : vector<1x32xf32> to vector<16x32xf32>
    %118 = arith.mulf %115, %117 : vector<16x32xf32>
    %c0_43 = arith.constant 0 : index
    %c0_44 = arith.constant 0 : index
    %119 = vector.load %arg9[%c0_43, %c0_44] : memref<1x32xf32, #tpu.memory_space<vmem>>, vector<1x32xf32>
    %120 = vector.broadcast %119 : vector<1x32xf32> to vector<16x32xf32>
    %121 = arith.addf %118, %120 : vector<16x32xf32>
    %c0_45 = arith.constant 0 : index
    %c0_46 = arith.constant 0 : index
    %122 = vector.load %arg10[%c0_45, %c0_46] : memref<32x64xf32, #tpu.memory_space<vmem>>, vector<32x64xf32>
    %cst_47 = arith.constant dense<0.000000e+00> : vector<16x64xf32>
    %123 = tpu.matmul %121, %122, %cst_47 {dimension_numbers = #tpu.dot_dimension_numbers<[1], [0], [0], [1], [0, 0, 1, 1], [], []>} : vector<16x32xf32>, vector<32x64xf32>, vector<16x64xf32> -> vector<16x64xf32>
    %c0_48 = arith.constant 0 : index
    %c0_49 = arith.constant 0 : index
    %124 = vector.load %arg11[%c0_48, %c0_49] : memref<1x64xf32, #tpu.memory_space<vmem>>, vector<1x64xf32>
    %125 = vector.broadcast %124 : vector<1x64xf32> to vector<16x64xf32>
    %126 = arith.addf %123, %125 : vector<16x64xf32>
    %cst_50 = arith.constant 0.000000e+00 : f32
    %127 = vector.broadcast %cst_50 : f32 to vector<16x64xf32>
    %128 = arith.maximumf %126, %127 : vector<16x64xf32>
    %c0_51 = arith.constant 0 : index
    %c0_52 = arith.constant 0 : index
    %129 = vector.load %arg12[%c0_51, %c0_52] : memref<64x32xf32, #tpu.memory_space<vmem>>, vector<64x32xf32>
    %cst_53 = arith.constant dense<0.000000e+00> : vector<16x32xf32>
    %130 = tpu.matmul %128, %129, %cst_53 {dimension_numbers = #tpu.dot_dimension_numbers<[1], [0], [0], [1], [0, 0, 1, 1], [], []>} : vector<16x64xf32>, vector<64x32xf32>, vector<16x32xf32> -> vector<16x32xf32>
    %c0_54 = arith.constant 0 : index
    %c0_55 = arith.constant 0 : index
    %131 = vector.load %arg13[%c0_54, %c0_55] : memref<1x32xf32, #tpu.memory_space<vmem>>, vector<1x32xf32>
    %132 = vector.broadcast %131 : vector<1x32xf32> to vector<16x32xf32>
    %133 = arith.addf %130, %132 : vector<16x32xf32>
    %134 = arith.addf %121, %133 : vector<16x32xf32>
    %cst_56 = arith.constant dense<0.000000e+00> : vector<16xf32>
    %135 = vector.multi_reduction <add>, %134, %cst_56 [1] : vector<16x32xf32> to vector<16xf32>
    %136 = vector.shape_cast %135 : vector<16xf32> to vector<16x1xf32>
    %cst_57 = arith.constant 3.200000e+01 : f32
    %137 = vector.broadcast %cst_57 : f32 to vector<16x1xf32>
    %138 = arith.divf %136, %137 : vector<16x1xf32>
    %139 = vector.broadcast %138 : vector<16x1xf32> to vector<16x32xf32>
    %140 = arith.subf %134, %139 : vector<16x32xf32>
    %141 = vector.broadcast %138 : vector<16x1xf32> to vector<16x32xf32>
    %142 = arith.subf %134, %141 : vector<16x32xf32>
    %143 = arith.mulf %140, %142 : vector<16x32xf32>
    %cst_58 = arith.constant dense<0.000000e+00> : vector<16xf32>
    %144 = vector.multi_reduction <add>, %143, %cst_58 [1] : vector<16x32xf32> to vector<16xf32>
    %145 = vector.shape_cast %144 : vector<16xf32> to vector<16x1xf32>
    %cst_59 = arith.constant 3.200000e+01 : f32
    %146 = vector.broadcast %cst_59 : f32 to vector<16x1xf32>
    %147 = arith.divf %145, %146 : vector<16x1xf32>
    %148 = vector.broadcast %138 : vector<16x1xf32> to vector<16x32xf32>
    %149 = arith.subf %134, %148 : vector<16x32xf32>
    %cst_60 = arith.constant 9.99999974E-6 : f32
    %150 = vector.broadcast %cst_60 : f32 to vector<16x1xf32>
    %151 = arith.addf %147, %150 : vector<16x1xf32>
    %152 = math.rsqrt %151 : vector<16x1xf32>
    %153 = vector.broadcast %152 : vector<16x1xf32> to vector<16x32xf32>
    %154 = arith.mulf %149, %153 : vector<16x32xf32>
    %c0_61 = arith.constant 0 : index
    %c0_62 = arith.constant 0 : index
    %155 = vector.load %arg14[%c0_61, %c0_62] : memref<1x32xf32, #tpu.memory_space<vmem>>, vector<1x32xf32>
    %156 = vector.broadcast %155 : vector<1x32xf32> to vector<16x32xf32>
    %157 = arith.mulf %154, %156 : vector<16x32xf32>
    %c0_63 = arith.constant 0 : index
    %c0_64 = arith.constant 0 : index
    %158 = vector.load %arg15[%c0_63, %c0_64] : memref<1x32xf32, #tpu.memory_space<vmem>>, vector<1x32xf32>
    %159 = vector.broadcast %158 : vector<1x32xf32> to vector<16x32xf32>
    %160 = arith.addf %157, %159 : vector<16x32xf32>
    %c0_65 = arith.constant 0 : index
    %c0_66 = arith.constant 0 : index
    %161 = vector.load %arg16[%c0_65, %c0_66] : memref<32x96xf32, #tpu.memory_space<vmem>>, vector<32x96xf32>
    %cst_67 = arith.constant dense<0.000000e+00> : vector<16x96xf32>
    %162 = tpu.matmul %10, %161, %cst_67 {dimension_numbers = #tpu.dot_dimension_numbers<[1], [0], [0], [1], [0, 0, 1, 1], [], []>} : vector<16x32xf32>, vector<32x96xf32>, vector<16x96xf32> -> vector<16x96xf32>
    %c0_68 = arith.constant 0 : index
    %c0_69 = arith.constant 0 : index
    %163 = vector.load %arg17[%c0_68, %c0_69] : memref<1x96xf32, #tpu.memory_space<vmem>>, vector<1x96xf32>
    %164 = vector.broadcast %163 : vector<1x96xf32> to vector<16x96xf32>
    %165 = arith.addf %162, %164 : vector<16x96xf32>
    %166 = vector.extract_strided_slice %165 {offsets = [0, 0], sizes = [16, 32], strides = [1, 1]} : vector<16x96xf32> to vector<16x32xf32>
    %167 = vector.extract_strided_slice %165 {offsets = [0, 32], sizes = [16, 32], strides = [1, 1]} : vector<16x96xf32> to vector<16x32xf32>
    %168 = vector.extract_strided_slice %165 {offsets = [0, 64], sizes = [16, 32], strides = [1, 1]} : vector<16x96xf32> to vector<16x32xf32>
    %169 = vector.extract_strided_slice %166 {offsets = [0, 0], sizes = [8, 16], strides = [1, 1]} : vector<16x32xf32> to vector<8x16xf32>
    %170 = vector.extract_strided_slice %167 {offsets = [0, 0], sizes = [8, 16], strides = [1, 1]} : vector<16x32xf32> to vector<8x16xf32>
    %171 = vector.extract_strided_slice %168 {offsets = [0, 0], sizes = [8, 16], strides = [1, 1]} : vector<16x32xf32> to vector<8x16xf32>
    %cst_70 = arith.constant dense<0.000000e+00> : vector<8x8xf32>
    %172 = tpu.matmul %169, %170, %cst_70 {dimension_numbers = #tpu.dot_dimension_numbers<[1], [1], [0], [0], [0, 0, 1, 0], [], []>} : vector<8x16xf32>, vector<8x16xf32>, vector<8x8xf32> -> vector<8x8xf32>
    %cst_71 = arith.constant 2.500000e-01 : f32
    %173 = vector.broadcast %cst_71 : f32 to vector<8x8xf32>
    %174 = arith.mulf %172, %173 : vector<8x8xf32>
    %175 = tpu.iota {dimensions = array<i32: 0>} : vector<8x8xi32>
    %176 = tpu.iota {dimensions = array<i32: 1>} : vector<8x8xi32>
    %177 = arith.cmpi sle, %176, %175 : vector<8x8xi32>
    %cst_72 = arith.constant -1.000000e+30 : f32
    %178 = vector.broadcast %cst_72 : f32 to vector<8x8xf32>
    %179 = arith.select %177, %174, %178 : vector<8x8xi1>, vector<8x8xf32>
    %cst_73 = arith.constant dense<0xFF800000> : vector<8xf32>
    %180 = vector.multi_reduction <maximumf>, %179, %cst_73 [1] : vector<8x8xf32> to vector<8xf32>
    %181 = vector.shape_cast %180 : vector<8xf32> to vector<8x1xf32>
    %182 = vector.broadcast %181 : vector<8x1xf32> to vector<8x8xf32>
    %183 = arith.subf %179, %182 : vector<8x8xf32>
    %184 = math.exp %183 : vector<8x8xf32>
    %cst_74 = arith.constant dense<0.000000e+00> : vector<8xf32>
    %185 = vector.multi_reduction <add>, %184, %cst_74 [1] : vector<8x8xf32> to vector<8xf32>
    %186 = vector.shape_cast %185 : vector<8xf32> to vector<8x1xf32>
    %187 = tpu.reciprocal %186 {approx = true} : vector<8x1xf32> -> vector<8x1xf32>
    %188 = vector.broadcast %187 : vector<8x1xf32> to vector<8x8xf32>
    %189 = arith.mulf %184, %188 : vector<8x8xf32>
    %cst_75 = arith.constant dense<0.000000e+00> : vector<8x16xf32>
    %190 = tpu.matmul %189, %171, %cst_75 {dimension_numbers = #tpu.dot_dimension_numbers<[1], [0], [0], [1], [0, 0, 1, 1], [], []>} : vector<8x8xf32>, vector<8x16xf32>, vector<8x16xf32> -> vector<8x16xf32>
    %191 = vector.extract_strided_slice %166 {offsets = [0, 16], sizes = [8, 16], strides = [1, 1]} : vector<16x32xf32> to vector<8x16xf32>
    %192 = vector.extract_strided_slice %167 {offsets = [0, 16], sizes = [8, 16], strides = [1, 1]} : vector<16x32xf32> to vector<8x16xf32>
    %193 = vector.extract_strided_slice %168 {offsets = [0, 16], sizes = [8, 16], strides = [1, 1]} : vector<16x32xf32> to vector<8x16xf32>
    %cst_76 = arith.constant dense<0.000000e+00> : vector<8x8xf32>
    %194 = tpu.matmul %191, %192, %cst_76 {dimension_numbers = #tpu.dot_dimension_numbers<[1], [1], [0], [0], [0, 0, 1, 0], [], []>} : vector<8x16xf32>, vector<8x16xf32>, vector<8x8xf32> -> vector<8x8xf32>
    %cst_77 = arith.constant 2.500000e-01 : f32
    %195 = vector.broadcast %cst_77 : f32 to vector<8x8xf32>
    %196 = arith.mulf %194, %195 : vector<8x8xf32>
    %197 = tpu.iota {dimensions = array<i32: 0>} : vector<8x8xi32>
    %198 = tpu.iota {dimensions = array<i32: 1>} : vector<8x8xi32>
    %199 = arith.cmpi sle, %198, %197 : vector<8x8xi32>
    %cst_78 = arith.constant -1.000000e+30 : f32
    %200 = vector.broadcast %cst_78 : f32 to vector<8x8xf32>
    %201 = arith.select %199, %196, %200 : vector<8x8xi1>, vector<8x8xf32>
    %cst_79 = arith.constant dense<0xFF800000> : vector<8xf32>
    %202 = vector.multi_reduction <maximumf>, %201, %cst_79 [1] : vector<8x8xf32> to vector<8xf32>
    %203 = vector.shape_cast %202 : vector<8xf32> to vector<8x1xf32>
    %204 = vector.broadcast %203 : vector<8x1xf32> to vector<8x8xf32>
    %205 = arith.subf %201, %204 : vector<8x8xf32>
    %206 = math.exp %205 : vector<8x8xf32>
    %cst_80 = arith.constant dense<0.000000e+00> : vector<8xf32>
    %207 = vector.multi_reduction <add>, %206, %cst_80 [1] : vector<8x8xf32> to vector<8xf32>
    %208 = vector.shape_cast %207 : vector<8xf32> to vector<8x1xf32>
    %209 = tpu.reciprocal %208 {approx = true} : vector<8x1xf32> -> vector<8x1xf32>
    %210 = vector.broadcast %209 : vector<8x1xf32> to vector<8x8xf32>
    %211 = arith.mulf %206, %210 : vector<8x8xf32>
    %cst_81 = arith.constant dense<0.000000e+00> : vector<8x16xf32>
    %212 = tpu.matmul %211, %193, %cst_81 {dimension_numbers = #tpu.dot_dimension_numbers<[1], [0], [0], [1], [0, 0, 1, 1], [], []>} : vector<8x8xf32>, vector<8x16xf32>, vector<8x16xf32> -> vector<8x16xf32>
    %213 = tpu.concatenate %190, %212 in 1 : vector<8x16xf32>, vector<8x16xf32> -> vector<8x32xf32>
    %214 = vector.extract_strided_slice %166 {offsets = [8, 0], sizes = [8, 16], strides = [1, 1]} : vector<16x32xf32> to vector<8x16xf32>
    %215 = vector.extract_strided_slice %167 {offsets = [8, 0], sizes = [8, 16], strides = [1, 1]} : vector<16x32xf32> to vector<8x16xf32>
    %216 = vector.extract_strided_slice %168 {offsets = [8, 0], sizes = [8, 16], strides = [1, 1]} : vector<16x32xf32> to vector<8x16xf32>
    %cst_82 = arith.constant dense<0.000000e+00> : vector<8x8xf32>
    %217 = tpu.matmul %214, %215, %cst_82 {dimension_numbers = #tpu.dot_dimension_numbers<[1], [1], [0], [0], [0, 0, 1, 0], [], []>} : vector<8x16xf32>, vector<8x16xf32>, vector<8x8xf32> -> vector<8x8xf32>
    %cst_83 = arith.constant 2.500000e-01 : f32
    %218 = vector.broadcast %cst_83 : f32 to vector<8x8xf32>
    %219 = arith.mulf %217, %218 : vector<8x8xf32>
    %220 = tpu.iota {dimensions = array<i32: 0>} : vector<8x8xi32>
    %221 = tpu.iota {dimensions = array<i32: 1>} : vector<8x8xi32>
    %222 = arith.cmpi sle, %221, %220 : vector<8x8xi32>
    %cst_84 = arith.constant -1.000000e+30 : f32
    %223 = vector.broadcast %cst_84 : f32 to vector<8x8xf32>
    %224 = arith.select %222, %219, %223 : vector<8x8xi1>, vector<8x8xf32>
    %cst_85 = arith.constant dense<0xFF800000> : vector<8xf32>
    %225 = vector.multi_reduction <maximumf>, %224, %cst_85 [1] : vector<8x8xf32> to vector<8xf32>
    %226 = vector.shape_cast %225 : vector<8xf32> to vector<8x1xf32>
    %227 = vector.broadcast %226 : vector<8x1xf32> to vector<8x8xf32>
    %228 = arith.subf %224, %227 : vector<8x8xf32>
    %229 = math.exp %228 : vector<8x8xf32>
    %cst_86 = arith.constant dense<0.000000e+00> : vector<8xf32>
    %230 = vector.multi_reduction <add>, %229, %cst_86 [1] : vector<8x8xf32> to vector<8xf32>
    %231 = vector.shape_cast %230 : vector<8xf32> to vector<8x1xf32>
    %232 = tpu.reciprocal %231 {approx = true} : vector<8x1xf32> -> vector<8x1xf32>
    %233 = vector.broadcast %232 : vector<8x1xf32> to vector<8x8xf32>
    %234 = arith.mulf %229, %233 : vector<8x8xf32>
    %cst_87 = arith.constant dense<0.000000e+00> : vector<8x16xf32>
    %235 = tpu.matmul %234, %216, %cst_87 {dimension_numbers = #tpu.dot_dimension_numbers<[1], [0], [0], [1], [0, 0, 1, 1], [], []>} : vector<8x8xf32>, vector<8x16xf32>, vector<8x16xf32> -> vector<8x16xf32>
    %236 = vector.extract_strided_slice %166 {offsets = [8, 16], sizes = [8, 16], strides = [1, 1]} : vector<16x32xf32> to vector<8x16xf32>
    %237 = vector.extract_strided_slice %167 {offsets = [8, 16], sizes = [8, 16], strides = [1, 1]} : vector<16x32xf32> to vector<8x16xf32>
    %238 = vector.extract_strided_slice %168 {offsets = [8, 16], sizes = [8, 16], strides = [1, 1]} : vector<16x32xf32> to vector<8x16xf32>
    %cst_88 = arith.constant dense<0.000000e+00> : vector<8x8xf32>
    %239 = tpu.matmul %236, %237, %cst_88 {dimension_numbers = #tpu.dot_dimension_numbers<[1], [1], [0], [0], [0, 0, 1, 0], [], []>} : vector<8x16xf32>, vector<8x16xf32>, vector<8x8xf32> -> vector<8x8xf32>
    %cst_89 = arith.constant 2.500000e-01 : f32
    %240 = vector.broadcast %cst_89 : f32 to vector<8x8xf32>
    %241 = arith.mulf %239, %240 : vector<8x8xf32>
    %242 = tpu.iota {dimensions = array<i32: 0>} : vector<8x8xi32>
    %243 = tpu.iota {dimensions = array<i32: 1>} : vector<8x8xi32>
    %244 = arith.cmpi sle, %243, %242 : vector<8x8xi32>
    %cst_90 = arith.constant -1.000000e+30 : f32
    %245 = vector.broadcast %cst_90 : f32 to vector<8x8xf32>
    %246 = arith.select %244, %241, %245 : vector<8x8xi1>, vector<8x8xf32>
    %cst_91 = arith.constant dense<0xFF800000> : vector<8xf32>
    %247 = vector.multi_reduction <maximumf>, %246, %cst_91 [1] : vector<8x8xf32> to vector<8xf32>
    %248 = vector.shape_cast %247 : vector<8xf32> to vector<8x1xf32>
    %249 = vector.broadcast %248 : vector<8x1xf32> to vector<8x8xf32>
    %250 = arith.subf %246, %249 : vector<8x8xf32>
    %251 = math.exp %250 : vector<8x8xf32>
    %cst_92 = arith.constant dense<0.000000e+00> : vector<8xf32>
    %252 = vector.multi_reduction <add>, %251, %cst_92 [1] : vector<8x8xf32> to vector<8xf32>
    %253 = vector.shape_cast %252 : vector<8xf32> to vector<8x1xf32>
    %254 = tpu.reciprocal %253 {approx = true} : vector<8x1xf32> -> vector<8x1xf32>
    %255 = vector.broadcast %254 : vector<8x1xf32> to vector<8x8xf32>
    %256 = arith.mulf %251, %255 : vector<8x8xf32>
    %cst_93 = arith.constant dense<0.000000e+00> : vector<8x16xf32>
    %257 = tpu.matmul %256, %238, %cst_93 {dimension_numbers = #tpu.dot_dimension_numbers<[1], [0], [0], [1], [0, 0, 1, 1], [], []>} : vector<8x8xf32>, vector<8x16xf32>, vector<8x16xf32> -> vector<8x16xf32>
    %258 = tpu.concatenate %235, %257 in 1 : vector<8x16xf32>, vector<8x16xf32> -> vector<8x32xf32>
    %259 = tpu.concatenate %213, %258 in 0 : vector<8x32xf32>, vector<8x32xf32> -> vector<16x32xf32>
    %c0_94 = arith.constant 0 : index
    %c0_95 = arith.constant 0 : index
    %260 = vector.load %arg18[%c0_94, %c0_95] : memref<32x32xf32, #tpu.memory_space<vmem>>, vector<32x32xf32>
    %cst_96 = arith.constant dense<0.000000e+00> : vector<16x32xf32>
    %261 = tpu.matmul %259, %260, %cst_96 {dimension_numbers = #tpu.dot_dimension_numbers<[1], [0], [0], [1], [0, 0, 1, 1], [], []>} : vector<16x32xf32>, vector<32x32xf32>, vector<16x32xf32> -> vector<16x32xf32>
    %c0_97 = arith.constant 0 : index
    %c0_98 = arith.constant 0 : index
    %262 = vector.load %arg19[%c0_97, %c0_98] : memref<1x32xf32, #tpu.memory_space<vmem>>, vector<1x32xf32>
    %263 = vector.broadcast %262 : vector<1x32xf32> to vector<16x32xf32>
    %264 = arith.addf %261, %263 : vector<16x32xf32>
    %265 = arith.addf %10, %264 : vector<16x32xf32>
    %cst_99 = arith.constant dense<0.000000e+00> : vector<16xf32>
    %266 = vector.multi_reduction <add>, %265, %cst_99 [1] : vector<16x32xf32> to vector<16xf32>
    %267 = vector.shape_cast %266 : vector<16xf32> to vector<16x1xf32>
    %cst_100 = arith.constant 3.200000e+01 : f32
    %268 = vector.broadcast %cst_100 : f32 to vector<16x1xf32>
    %269 = arith.divf %267, %268 : vector<16x1xf32>
    %270 = vector.broadcast %269 : vector<16x1xf32> to vector<16x32xf32>
    %271 = arith.subf %265, %270 : vector<16x32xf32>
    %272 = vector.broadcast %269 : vector<16x1xf32> to vector<16x32xf32>
    %273 = arith.subf %265, %272 : vector<16x32xf32>
    %274 = arith.mulf %271, %273 : vector<16x32xf32>
    %cst_101 = arith.constant dense<0.000000e+00> : vector<16xf32>
    %275 = vector.multi_reduction <add>, %274, %cst_101 [1] : vector<16x32xf32> to vector<16xf32>
    %276 = vector.shape_cast %275 : vector<16xf32> to vector<16x1xf32>
    %cst_102 = arith.constant 3.200000e+01 : f32
    %277 = vector.broadcast %cst_102 : f32 to vector<16x1xf32>
    %278 = arith.divf %276, %277 : vector<16x1xf32>
    %279 = vector.broadcast %269 : vector<16x1xf32> to vector<16x32xf32>
    %280 = arith.subf %265, %279 : vector<16x32xf32>
    %cst_103 = arith.constant 9.99999974E-6 : f32
    %281 = vector.broadcast %cst_103 : f32 to vector<16x1xf32>
    %282 = arith.addf %278, %281 : vector<16x1xf32>
    %283 = math.rsqrt %282 : vector<16x1xf32>
    %284 = vector.broadcast %283 : vector<16x1xf32> to vector<16x32xf32>
    %285 = arith.mulf %280, %284 : vector<16x32xf32>
    %c0_104 = arith.constant 0 : index
    %c0_105 = arith.constant 0 : index
    %286 = vector.load %arg20[%c0_104, %c0_105] : memref<1x32xf32, #tpu.memory_space<vmem>>, vector<1x32xf32>
    %287 = vector.broadcast %286 : vector<1x32xf32> to vector<16x32xf32>
    %288 = arith.mulf %285, %287 : vector<16x32xf32>
    %c0_106 = arith.constant 0 : index
    %c0_107 = arith.constant 0 : index
    %289 = vector.load %arg21[%c0_106, %c0_107] : memref<1x32xf32, #tpu.memory_space<vmem>>, vector<1x32xf32>
    %290 = vector.broadcast %289 : vector<1x32xf32> to vector<16x32xf32>
    %291 = arith.addf %288, %290 : vector<16x32xf32>
    %c0_108 = arith.constant 0 : index
    %c0_109 = arith.constant 0 : index
    %292 = vector.load %arg22[%c0_108, %c0_109] : memref<32x32xf32, #tpu.memory_space<vmem>>, vector<32x32xf32>
    %cst_110 = arith.constant dense<0.000000e+00> : vector<16x32xf32>
    %293 = tpu.matmul %291, %292, %cst_110 {dimension_numbers = #tpu.dot_dimension_numbers<[1], [0], [0], [1], [0, 0, 1, 1], [], []>} : vector<16x32xf32>, vector<32x32xf32>, vector<16x32xf32> -> vector<16x32xf32>
    %c0_111 = arith.constant 0 : index
    %c0_112 = arith.constant 0 : index
    %294 = vector.load %arg23[%c0_111, %c0_112] : memref<1x32xf32, #tpu.memory_space<vmem>>, vector<1x32xf32>
    %295 = vector.broadcast %294 : vector<1x32xf32> to vector<16x32xf32>
    %296 = arith.addf %293, %295 : vector<16x32xf32>
    %c0_113 = arith.constant 0 : index
    %c0_114 = arith.constant 0 : index
    %297 = vector.load %arg24[%c0_113, %c0_114] : memref<32x64xf32, #tpu.memory_space<vmem>>, vector<32x64xf32>
    %cst_115 = arith.constant dense<0.000000e+00> : vector<16x64xf32>
    %298 = tpu.matmul %160, %297, %cst_115 {dimension_numbers = #tpu.dot_dimension_numbers<[1], [0], [0], [1], [0, 0, 1, 1], [], []>} : vector<16x32xf32>, vector<32x64xf32>, vector<16x64xf32> -> vector<16x64xf32>
    %c0_116 = arith.constant 0 : index
    %c0_117 = arith.constant 0 : index
    %299 = vector.load %arg25[%c0_116, %c0_117] : memref<1x64xf32, #tpu.memory_space<vmem>>, vector<1x64xf32>
    %300 = vector.broadcast %299 : vector<1x64xf32> to vector<16x64xf32>
    %301 = arith.addf %298, %300 : vector<16x64xf32>
    %302 = vector.extract_strided_slice %301 {offsets = [0, 0], sizes = [16, 32], strides = [1, 1]} : vector<16x64xf32> to vector<16x32xf32>
    %303 = vector.extract_strided_slice %301 {offsets = [0, 32], sizes = [16, 32], strides = [1, 1]} : vector<16x64xf32> to vector<16x32xf32>
    %304 = vector.extract_strided_slice %296 {offsets = [0, 0], sizes = [8, 16], strides = [1, 1]} : vector<16x32xf32> to vector<8x16xf32>
    %305 = vector.extract_strided_slice %302 {offsets = [0, 0], sizes = [8, 16], strides = [1, 1]} : vector<16x32xf32> to vector<8x16xf32>
    %306 = vector.extract_strided_slice %303 {offsets = [0, 0], sizes = [8, 16], strides = [1, 1]} : vector<16x32xf32> to vector<8x16xf32>
    %cst_118 = arith.constant dense<0.000000e+00> : vector<8x8xf32>
    %307 = tpu.matmul %304, %305, %cst_118 {dimension_numbers = #tpu.dot_dimension_numbers<[1], [1], [0], [0], [0, 0, 1, 0], [], []>} : vector<8x16xf32>, vector<8x16xf32>, vector<8x8xf32> -> vector<8x8xf32>
    %cst_119 = arith.constant 2.500000e-01 : f32
    %308 = vector.broadcast %cst_119 : f32 to vector<8x8xf32>
    %309 = arith.mulf %307, %308 : vector<8x8xf32>
    %cst_120 = arith.constant dense<0xFF800000> : vector<8xf32>
    %310 = vector.multi_reduction <maximumf>, %309, %cst_120 [1] : vector<8x8xf32> to vector<8xf32>
    %311 = vector.shape_cast %310 : vector<8xf32> to vector<8x1xf32>
    %312 = vector.broadcast %311 : vector<8x1xf32> to vector<8x8xf32>
    %313 = arith.subf %309, %312 : vector<8x8xf32>
    %314 = math.exp %313 : vector<8x8xf32>
    %cst_121 = arith.constant dense<0.000000e+00> : vector<8xf32>
    %315 = vector.multi_reduction <add>, %314, %cst_121 [1] : vector<8x8xf32> to vector<8xf32>
    %316 = vector.shape_cast %315 : vector<8xf32> to vector<8x1xf32>
    %317 = tpu.reciprocal %316 {approx = true} : vector<8x1xf32> -> vector<8x1xf32>
    %318 = vector.broadcast %317 : vector<8x1xf32> to vector<8x8xf32>
    %319 = arith.mulf %314, %318 : vector<8x8xf32>
    %cst_122 = arith.constant dense<0.000000e+00> : vector<8x16xf32>
    %320 = tpu.matmul %319, %306, %cst_122 {dimension_numbers = #tpu.dot_dimension_numbers<[1], [0], [0], [1], [0, 0, 1, 1], [], []>} : vector<8x8xf32>, vector<8x16xf32>, vector<8x16xf32> -> vector<8x16xf32>
    %321 = vector.extract_strided_slice %296 {offsets = [0, 16], sizes = [8, 16], strides = [1, 1]} : vector<16x32xf32> to vector<8x16xf32>
    %322 = vector.extract_strided_slice %302 {offsets = [0, 16], sizes = [8, 16], strides = [1, 1]} : vector<16x32xf32> to vector<8x16xf32>
    %323 = vector.extract_strided_slice %303 {offsets = [0, 16], sizes = [8, 16], strides = [1, 1]} : vector<16x32xf32> to vector<8x16xf32>
    %cst_123 = arith.constant dense<0.000000e+00> : vector<8x8xf32>
    %324 = tpu.matmul %321, %322, %cst_123 {dimension_numbers = #tpu.dot_dimension_numbers<[1], [1], [0], [0], [0, 0, 1, 0], [], []>} : vector<8x16xf32>, vector<8x16xf32>, vector<8x8xf32> -> vector<8x8xf32>
    %cst_124 = arith.constant 2.500000e-01 : f32
    %325 = vector.broadcast %cst_124 : f32 to vector<8x8xf32>
    %326 = arith.mulf %324, %325 : vector<8x8xf32>
    %cst_125 = arith.constant dense<0xFF800000> : vector<8xf32>
    %327 = vector.multi_reduction <maximumf>, %326, %cst_125 [1] : vector<8x8xf32> to vector<8xf32>
    %328 = vector.shape_cast %327 : vector<8xf32> to vector<8x1xf32>
    %329 = vector.broadcast %328 : vector<8x1xf32> to vector<8x8xf32>
    %330 = arith.subf %326, %329 : vector<8x8xf32>
    %331 = math.exp %330 : vector<8x8xf32>
    %cst_126 = arith.constant dense<0.000000e+00> : vector<8xf32>
    %332 = vector.multi_reduction <add>, %331, %cst_126 [1] : vector<8x8xf32> to vector<8xf32>
    %333 = vector.shape_cast %332 : vector<8xf32> to vector<8x1xf32>
    %334 = tpu.reciprocal %333 {approx = true} : vector<8x1xf32> -> vector<8x1xf32>
    %335 = vector.broadcast %334 : vector<8x1xf32> to vector<8x8xf32>
    %336 = arith.mulf %331, %335 : vector<8x8xf32>
    %cst_127 = arith.constant dense<0.000000e+00> : vector<8x16xf32>
    %337 = tpu.matmul %336, %323, %cst_127 {dimension_numbers = #tpu.dot_dimension_numbers<[1], [0], [0], [1], [0, 0, 1, 1], [], []>} : vector<8x8xf32>, vector<8x16xf32>, vector<8x16xf32> -> vector<8x16xf32>
    %338 = tpu.concatenate %320, %337 in 1 : vector<8x16xf32>, vector<8x16xf32> -> vector<8x32xf32>
    %339 = vector.extract_strided_slice %296 {offsets = [8, 0], sizes = [8, 16], strides = [1, 1]} : vector<16x32xf32> to vector<8x16xf32>
    %340 = vector.extract_strided_slice %302 {offsets = [8, 0], sizes = [8, 16], strides = [1, 1]} : vector<16x32xf32> to vector<8x16xf32>
    %341 = vector.extract_strided_slice %303 {offsets = [8, 0], sizes = [8, 16], strides = [1, 1]} : vector<16x32xf32> to vector<8x16xf32>
    %cst_128 = arith.constant dense<0.000000e+00> : vector<8x8xf32>
    %342 = tpu.matmul %339, %340, %cst_128 {dimension_numbers = #tpu.dot_dimension_numbers<[1], [1], [0], [0], [0, 0, 1, 0], [], []>} : vector<8x16xf32>, vector<8x16xf32>, vector<8x8xf32> -> vector<8x8xf32>
    %cst_129 = arith.constant 2.500000e-01 : f32
    %343 = vector.broadcast %cst_129 : f32 to vector<8x8xf32>
    %344 = arith.mulf %342, %343 : vector<8x8xf32>
    %cst_130 = arith.constant dense<0xFF800000> : vector<8xf32>
    %345 = vector.multi_reduction <maximumf>, %344, %cst_130 [1] : vector<8x8xf32> to vector<8xf32>
    %346 = vector.shape_cast %345 : vector<8xf32> to vector<8x1xf32>
    %347 = vector.broadcast %346 : vector<8x1xf32> to vector<8x8xf32>
    %348 = arith.subf %344, %347 : vector<8x8xf32>
    %349 = math.exp %348 : vector<8x8xf32>
    %cst_131 = arith.constant dense<0.000000e+00> : vector<8xf32>
    %350 = vector.multi_reduction <add>, %349, %cst_131 [1] : vector<8x8xf32> to vector<8xf32>
    %351 = vector.shape_cast %350 : vector<8xf32> to vector<8x1xf32>
    %352 = tpu.reciprocal %351 {approx = true} : vector<8x1xf32> -> vector<8x1xf32>
    %353 = vector.broadcast %352 : vector<8x1xf32> to vector<8x8xf32>
    %354 = arith.mulf %349, %353 : vector<8x8xf32>
    %cst_132 = arith.constant dense<0.000000e+00> : vector<8x16xf32>
    %355 = tpu.matmul %354, %341, %cst_132 {dimension_numbers = #tpu.dot_dimension_numbers<[1], [0], [0], [1], [0, 0, 1, 1], [], []>} : vector<8x8xf32>, vector<8x16xf32>, vector<8x16xf32> -> vector<8x16xf32>
    %356 = vector.extract_strided_slice %296 {offsets = [8, 16], sizes = [8, 16], strides = [1, 1]} : vector<16x32xf32> to vector<8x16xf32>
    %357 = vector.extract_strided_slice %302 {offsets = [8, 16], sizes = [8, 16], strides = [1, 1]} : vector<16x32xf32> to vector<8x16xf32>
    %358 = vector.extract_strided_slice %303 {offsets = [8, 16], sizes = [8, 16], strides = [1, 1]} : vector<16x32xf32> to vector<8x16xf32>
    %cst_133 = arith.constant dense<0.000000e+00> : vector<8x8xf32>
    %359 = tpu.matmul %356, %357, %cst_133 {dimension_numbers = #tpu.dot_dimension_numbers<[1], [1], [0], [0], [0, 0, 1, 0], [], []>} : vector<8x16xf32>, vector<8x16xf32>, vector<8x8xf32> -> vector<8x8xf32>
    %cst_134 = arith.constant 2.500000e-01 : f32
    %360 = vector.broadcast %cst_134 : f32 to vector<8x8xf32>
    %361 = arith.mulf %359, %360 : vector<8x8xf32>
    %cst_135 = arith.constant dense<0xFF800000> : vector<8xf32>
    %362 = vector.multi_reduction <maximumf>, %361, %cst_135 [1] : vector<8x8xf32> to vector<8xf32>
    %363 = vector.shape_cast %362 : vector<8xf32> to vector<8x1xf32>
    %364 = vector.broadcast %363 : vector<8x1xf32> to vector<8x8xf32>
    %365 = arith.subf %361, %364 : vector<8x8xf32>
    %366 = math.exp %365 : vector<8x8xf32>
    %cst_136 = arith.constant dense<0.000000e+00> : vector<8xf32>
    %367 = vector.multi_reduction <add>, %366, %cst_136 [1] : vector<8x8xf32> to vector<8xf32>
    %368 = vector.shape_cast %367 : vector<8xf32> to vector<8x1xf32>
    %369 = tpu.reciprocal %368 {approx = true} : vector<8x1xf32> -> vector<8x1xf32>
    %370 = vector.broadcast %369 : vector<8x1xf32> to vector<8x8xf32>
    %371 = arith.mulf %366, %370 : vector<8x8xf32>
    %cst_137 = arith.constant dense<0.000000e+00> : vector<8x16xf32>
    %372 = tpu.matmul %371, %358, %cst_137 {dimension_numbers = #tpu.dot_dimension_numbers<[1], [0], [0], [1], [0, 0, 1, 1], [], []>} : vector<8x8xf32>, vector<8x16xf32>, vector<8x16xf32> -> vector<8x16xf32>
    %373 = tpu.concatenate %355, %372 in 1 : vector<8x16xf32>, vector<8x16xf32> -> vector<8x32xf32>
    %374 = tpu.concatenate %338, %373 in 0 : vector<8x32xf32>, vector<8x32xf32> -> vector<16x32xf32>
    %c0_138 = arith.constant 0 : index
    %c0_139 = arith.constant 0 : index
    %375 = vector.load %arg26[%c0_138, %c0_139] : memref<32x32xf32, #tpu.memory_space<vmem>>, vector<32x32xf32>
    %cst_140 = arith.constant dense<0.000000e+00> : vector<16x32xf32>
    %376 = tpu.matmul %374, %375, %cst_140 {dimension_numbers = #tpu.dot_dimension_numbers<[1], [0], [0], [1], [0, 0, 1, 1], [], []>} : vector<16x32xf32>, vector<32x32xf32>, vector<16x32xf32> -> vector<16x32xf32>
    %c0_141 = arith.constant 0 : index
    %c0_142 = arith.constant 0 : index
    %377 = vector.load %arg27[%c0_141, %c0_142] : memref<1x32xf32, #tpu.memory_space<vmem>>, vector<1x32xf32>
    %378 = vector.broadcast %377 : vector<1x32xf32> to vector<16x32xf32>
    %379 = arith.addf %376, %378 : vector<16x32xf32>
    %380 = arith.addf %291, %379 : vector<16x32xf32>
    %cst_143 = arith.constant dense<0.000000e+00> : vector<16xf32>
    %381 = vector.multi_reduction <add>, %380, %cst_143 [1] : vector<16x32xf32> to vector<16xf32>
    %382 = vector.shape_cast %381 : vector<16xf32> to vector<16x1xf32>
    %cst_144 = arith.constant 3.200000e+01 : f32
    %383 = vector.broadcast %cst_144 : f32 to vector<16x1xf32>
    %384 = arith.divf %382, %383 : vector<16x1xf32>
    %385 = vector.broadcast %384 : vector<16x1xf32> to vector<16x32xf32>
    %386 = arith.subf %380, %385 : vector<16x32xf32>
    %387 = vector.broadcast %384 : vector<16x1xf32> to vector<16x32xf32>
    %388 = arith.subf %380, %387 : vector<16x32xf32>
    %389 = arith.mulf %386, %388 : vector<16x32xf32>
    %cst_145 = arith.constant dense<0.000000e+00> : vector<16xf32>
    %390 = vector.multi_reduction <add>, %389, %cst_145 [1] : vector<16x32xf32> to vector<16xf32>
    %391 = vector.shape_cast %390 : vector<16xf32> to vector<16x1xf32>
    %cst_146 = arith.constant 3.200000e+01 : f32
    %392 = vector.broadcast %cst_146 : f32 to vector<16x1xf32>
    %393 = arith.divf %391, %392 : vector<16x1xf32>
    %394 = vector.broadcast %384 : vector<16x1xf32> to vector<16x32xf32>
    %395 = arith.subf %380, %394 : vector<16x32xf32>
    %cst_147 = arith.constant 9.99999974E-6 : f32
    %396 = vector.broadcast %cst_147 : f32 to vector<16x1xf32>
    %397 = arith.addf %393, %396 : vector<16x1xf32>
    %398 = math.rsqrt %397 : vector<16x1xf32>
    %399 = vector.broadcast %398 : vector<16x1xf32> to vector<16x32xf32>
    %400 = arith.mulf %395, %399 : vector<16x32xf32>
    %c0_148 = arith.constant 0 : index
    %c0_149 = arith.constant 0 : index
    %401 = vector.load %arg28[%c0_148, %c0_149] : memref<1x32xf32, #tpu.memory_space<vmem>>, vector<1x32xf32>
    %402 = vector.broadcast %401 : vector<1x32xf32> to vector<16x32xf32>
    %403 = arith.mulf %400, %402 : vector<16x32xf32>
    %c0_150 = arith.constant 0 : index
    %c0_151 = arith.constant 0 : index
    %404 = vector.load %arg29[%c0_150, %c0_151] : memref<1x32xf32, #tpu.memory_space<vmem>>, vector<1x32xf32>
    %405 = vector.broadcast %404 : vector<1x32xf32> to vector<16x32xf32>
    %406 = arith.addf %403, %405 : vector<16x32xf32>
    %c0_152 = arith.constant 0 : index
    %c0_153 = arith.constant 0 : index
    %407 = vector.load %arg30[%c0_152, %c0_153] : memref<32x64xf32, #tpu.memory_space<vmem>>, vector<32x64xf32>
    %cst_154 = arith.constant dense<0.000000e+00> : vector<16x64xf32>
    %408 = tpu.matmul %406, %407, %cst_154 {dimension_numbers = #tpu.dot_dimension_numbers<[1], [0], [0], [1], [0, 0, 1, 1], [], []>} : vector<16x32xf32>, vector<32x64xf32>, vector<16x64xf32> -> vector<16x64xf32>
    %c0_155 = arith.constant 0 : index
    %c0_156 = arith.constant 0 : index
    %409 = vector.load %arg31[%c0_155, %c0_156] : memref<1x64xf32, #tpu.memory_space<vmem>>, vector<1x64xf32>
    %410 = vector.broadcast %409 : vector<1x64xf32> to vector<16x64xf32>
    %411 = arith.addf %408, %410 : vector<16x64xf32>
    %cst_157 = arith.constant 0.000000e+00 : f32
    %412 = vector.broadcast %cst_157 : f32 to vector<16x64xf32>
    %413 = arith.maximumf %411, %412 : vector<16x64xf32>
    %c0_158 = arith.constant 0 : index
    %c0_159 = arith.constant 0 : index
    %414 = vector.load %arg32[%c0_158, %c0_159] : memref<64x32xf32, #tpu.memory_space<vmem>>, vector<64x32xf32>
    %cst_160 = arith.constant dense<0.000000e+00> : vector<16x32xf32>
    %415 = tpu.matmul %413, %414, %cst_160 {dimension_numbers = #tpu.dot_dimension_numbers<[1], [0], [0], [1], [0, 0, 1, 1], [], []>} : vector<16x64xf32>, vector<64x32xf32>, vector<16x32xf32> -> vector<16x32xf32>
    %c0_161 = arith.constant 0 : index
    %c0_162 = arith.constant 0 : index
    %416 = vector.load %arg33[%c0_161, %c0_162] : memref<1x32xf32, #tpu.memory_space<vmem>>, vector<1x32xf32>
    %417 = vector.broadcast %416 : vector<1x32xf32> to vector<16x32xf32>
    %418 = arith.addf %415, %417 : vector<16x32xf32>
    %419 = arith.addf %406, %418 : vector<16x32xf32>
    %cst_163 = arith.constant dense<0.000000e+00> : vector<16xf32>
    %420 = vector.multi_reduction <add>, %419, %cst_163 [1] : vector<16x32xf32> to vector<16xf32>
    %421 = vector.shape_cast %420 : vector<16xf32> to vector<16x1xf32>
    %cst_164 = arith.constant 3.200000e+01 : f32
    %422 = vector.broadcast %cst_164 : f32 to vector<16x1xf32>
    %423 = arith.divf %421, %422 : vector<16x1xf32>
    %424 = vector.broadcast %423 : vector<16x1xf32> to vector<16x32xf32>
    %425 = arith.subf %419, %424 : vector<16x32xf32>
    %426 = vector.broadcast %423 : vector<16x1xf32> to vector<16x32xf32>
    %427 = arith.subf %419, %426 : vector<16x32xf32>
    %428 = arith.mulf %425, %427 : vector<16x32xf32>
    %cst_165 = arith.constant dense<0.000000e+00> : vector<16xf32>
    %429 = vector.multi_reduction <add>, %428, %cst_165 [1] : vector<16x32xf32> to vector<16xf32>
    %430 = vector.shape_cast %429 : vector<16xf32> to vector<16x1xf32>
    %cst_166 = arith.constant 3.200000e+01 : f32
    %431 = vector.broadcast %cst_166 : f32 to vector<16x1xf32>
    %432 = arith.divf %430, %431 : vector<16x1xf32>
    %433 = vector.broadcast %423 : vector<16x1xf32> to vector<16x32xf32>
    %434 = arith.subf %419, %433 : vector<16x32xf32>
    %cst_167 = arith.constant 9.99999974E-6 : f32
    %435 = vector.broadcast %cst_167 : f32 to vector<16x1xf32>
    %436 = arith.addf %432, %435 : vector<16x1xf32>
    %437 = math.rsqrt %436 : vector<16x1xf32>
    %438 = vector.broadcast %437 : vector<16x1xf32> to vector<16x32xf32>
    %439 = arith.mulf %434, %438 : vector<16x32xf32>
    %c0_168 = arith.constant 0 : index
    %c0_169 = arith.constant 0 : index
    %440 = vector.load %arg34[%c0_168, %c0_169] : memref<1x32xf32, #tpu.memory_space<vmem>>, vector<1x32xf32>
    %441 = vector.broadcast %440 : vector<1x32xf32> to vector<16x32xf32>
    %442 = arith.mulf %439, %441 : vector<16x32xf32>
    %c0_170 = arith.constant 0 : index
    %c0_171 = arith.constant 0 : index
    %443 = vector.load %arg35[%c0_170, %c0_171] : memref<1x32xf32, #tpu.memory_space<vmem>>, vector<1x32xf32>
    %444 = vector.broadcast %443 : vector<1x32xf32> to vector<16x32xf32>
    %445 = arith.addf %442, %444 : vector<16x32xf32>
    %c0_172 = arith.constant 0 : index
    %c0_173 = arith.constant 0 : index
    %446 = vector.load %arg36[%c0_172, %c0_173] : memref<32x128xf32, #tpu.memory_space<vmem>>, vector<32x128xf32>
    %cst_174 = arith.constant dense<0.000000e+00> : vector<16x128xf32>
    %447 = tpu.matmul %445, %446, %cst_174 {dimension_numbers = #tpu.dot_dimension_numbers<[1], [0], [0], [1], [0, 0, 1, 1], [], []>} : vector<16x32xf32>, vector<32x128xf32>, vector<16x128xf32> -> vector<16x128xf32>
    %c0_175 = arith.constant 0 : index
    %c0_176 = arith.constant 0 : index
    %448 = vector.load %arg37[%c0_175, %c0_176] : memref<1x128xf32, #tpu.memory_space<vmem>>, vector<1x128xf32>
    %449 = vector.broadcast %448 : vector<1x128xf32> to vector<16x128xf32>
    %450 = arith.addf %447, %449 : vector<16x128xf32>
    %c0_177 = arith.constant 0 : index
    %c0_178 = arith.constant 0 : index
    %c0_179 = arith.constant 0 : index
    %451 = vector.load %arg38[%c0_177, %c0_178, %c0_179] : memref<1x16x128xf32, #tpu.memory_space<vmem>>, vector<1x16x128xf32>
    %452 = vector.shape_cast %451 : vector<1x16x128xf32> to vector<16x128xf32>
    %453 = vector.shape_cast %450 : vector<16x128xf32> to vector<1x16x128xf32>
    tpu.vector_store %arg38[%c0_177, %c0_178, %c0_179], %453 {strides = array<i32>} : memref<1x16x128xf32, #tpu.memory_space<vmem>>, vector<1x16x128xf32>,
    return
  }
  func.func @transform_0(%arg0: i32) -> (i32, i32, i32) {
    %c0_i32 = arith.constant 0 : i32
    %c0_i32_0 = arith.constant 0 : i32
    %c0_i32_1 = arith.constant 0 : i32
    return %arg0, %c0_i32, %c0_i32_0 : i32, i32, i32
  }
  func.func @transform_1(%arg0: i32) -> (i32, i32) {
    %c0_i32 = arith.constant 0 : i32
    %c0_i32_0 = arith.constant 0 : i32
    %c0_i32_1 = arith.constant 0 : i32
    return %c0_i32, %c0_i32_0 : i32, i32
  }
  func.func @transform_2(%arg0: i32) -> (i32, i32) {
    %c0_i32 = arith.constant 0 : i32
    %c0_i32_0 = arith.constant 0 : i32
    %c0_i32_1 = arith.constant 0 : i32
    return %c0_i32, %c0_i32_0 : i32, i32
  }
  func.func @transform_3(%arg0: i32) -> (i32, i32) {
    %c0_i32 = arith.constant 0 : i32
    %c0_i32_0 = arith.constant 0 : i32
    %c0_i32_1 = arith.constant 0 : i32
    return %c0_i32, %c0_i32_0 : i32, i32
  }
  func.func @transform_4(%arg0: i32) -> (i32, i32) {
    %c0_i32 = arith.constant 0 : i32
    %c0_i32_0 = arith.constant 0 : i32
    %c0_i32_1 = arith.constant 0 : i32
    return %c0_i32, %c0_i32_0 : i32, i32
  }
  func.func @transform_5(%arg0: i32) -> (i32, i32) {
    %c0_i32 = arith.constant 0 : i32
    %c0_i32_0 = arith.constant 0 : i32
    %c0_i32_1 = arith.constant 0 : i32
    return %c0_i32, %c0_i32_0 : i32, i32
  }
  func.func @transform_6(%arg0: i32) -> (i32, i32) {
    %c0_i32 = arith.constant 0 : i32
    %c0_i32_0 = arith.constant 0 : i32
    %c0_i32_1 = arith.constant 0 : i32
    return %c0_i32, %c0_i32_0 : i32, i32
  }
  func.func @transform_7(%arg0: i32) -> (i32, i32) {
    %c0_i32 = arith.constant 0 : i32
    %c0_i32_0 = arith.constant 0 : i32
    %c0_i32_1 = arith.constant 0 : i32
    return %c0_i32, %c0_i32_0 : i32, i32
  }
  func.func @transform_8(%arg0: i32) -> (i32, i32) {
    %c0_i32 = arith.constant 0 : i32
    %c0_i32_0 = arith.constant 0 : i32
    %c0_i32_1 = arith.constant 0 : i32
    return %c0_i32, %c0_i32_0 : i32, i32
  }
  func.func @transform_9(%arg0: i32) -> (i32, i32) {
    %c0_i32 = arith.constant 0 : i32
    %c0_i32_0 = arith.constant 0 : i32
    %c0_i32_1 = arith.constant 0 : i32
    return %c0_i32, %c0_i32_0 : i32, i32
  }
  func.func @transform_10(%arg0: i32) -> (i32, i32) {
    %c0_i32 = arith.constant 0 : i32
    %c0_i32_0 = arith.constant 0 : i32
    %c0_i32_1 = arith.constant 0 : i32
    return %c0_i32, %c0_i32_0 : i32, i32
  }
  func.func @transform_11(%arg0: i32) -> (i32, i32) {
    %c0_i32 = arith.constant 0 : i32
    %c0_i32_0 = arith.constant 0 : i32
    %c0_i32_1 = arith.constant 0 : i32
    return %c0_i32, %c0_i32_0 : i32, i32
  }
  func.func @transform_12(%arg0: i32) -> (i32, i32) {
    %c0_i32 = arith.constant 0 : i32
    %c0_i32_0 = arith.constant 0 : i32
    %c0_i32_1 = arith.constant 0 : i32
    return %c0_i32, %c0_i32_0 : i32, i32
  }
  func.func @transform_13(%arg0: i32) -> (i32, i32) {
    %c0_i32 = arith.constant 0 : i32
    %c0_i32_0 = arith.constant 0 : i32
    %c0_i32_1 = arith.constant 0 : i32
    return %c0_i32, %c0_i32_0 : i32, i32
  }
  func.func @transform_14(%arg0: i32) -> (i32, i32) {
    %c0_i32 = arith.constant 0 : i32
    %c0_i32_0 = arith.constant 0 : i32
    %c0_i32_1 = arith.constant 0 : i32
    return %c0_i32, %c0_i32_0 : i32, i32
  }
  func.func @transform_15(%arg0: i32) -> (i32, i32) {
    %c0_i32 = arith.constant 0 : i32
    %c0_i32_0 = arith.constant 0 : i32
    %c0_i32_1 = arith.constant 0 : i32
    return %c0_i32, %c0_i32_0 : i32, i32
  }
  func.func @transform_16(%arg0: i32) -> (i32, i32) {
    %c0_i32 = arith.constant 0 : i32
    %c0_i32_0 = arith.constant 0 : i32
    %c0_i32_1 = arith.constant 0 : i32
    return %c0_i32, %c0_i32_0 : i32, i32
  }
  func.func @transform_17(%arg0: i32) -> (i32, i32) {
    %c0_i32 = arith.constant 0 : i32
    %c0_i32_0 = arith.constant 0 : i32
    %c0_i32_1 = arith.constant 0 : i32
    return %c0_i32, %c0_i32_0 : i32, i32
  }
  func.func @transform_18(%arg0: i32) -> (i32, i32) {
    %c0_i32 = arith.constant 0 : i32
    %c0_i32_0 = arith.constant 0 : i32
    %c0_i32_1 = arith.constant 0 : i32
    return %c0_i32, %c0_i32_0 : i32, i32
  }
  func.func @transform_19(%arg0: i32) -> (i32, i32) {
    %c0_i32 = arith.constant 0 : i32
    %c0_i32_0 = arith.constant 0 : i32
    %c0_i32_1 = arith.constant 0 : i32
    return %c0_i32, %c0_i32_0 : i32, i32
  }
  func.func @transform_20(%arg0: i32) -> (i32, i32) {
    %c0_i32 = arith.constant 0 : i32
    %c0_i32_0 = arith.constant 0 : i32
    %c0_i32_1 = arith.constant 0 : i32
    return %c0_i32, %c0_i32_0 : i32, i32
  }
  func.func @transform_21(%arg0: i32) -> (i32, i32) {
    %c0_i32 = arith.constant 0 : i32
    %c0_i32_0 = arith.constant 0 : i32
    %c0_i32_1 = arith.constant 0 : i32
    return %c0_i32, %c0_i32_0 : i32, i32
  }
  func.func @transform_22(%arg0: i32) -> (i32, i32) {
    %c0_i32 = arith.constant 0 : i32
    %c0_i32_0 = arith.constant 0 : i32
    %c0_i32_1 = arith.constant 0 : i32
    return %c0_i32, %c0_i32_0 : i32, i32
  }
  func.func @transform_23(%arg0: i32) -> (i32, i32) {
    %c0_i32 = arith.constant 0 : i32
    %c0_i32_0 = arith.constant 0 : i32
    %c0_i32_1 = arith.constant 0 : i32
    return %c0_i32, %c0_i32_0 : i32, i32
  }
  func.func @transform_24(%arg0: i32) -> (i32, i32) {
    %c0_i32 = arith.constant 0 : i32
    %c0_i32_0 = arith.constant 0 : i32
    %c0_i32_1 = arith.constant 0 : i32
    return %c0_i32, %c0_i32_0 : i32, i32
  }
  func.func @transform_25(%arg0: i32) -> (i32, i32) {
    %c0_i32 = arith.constant 0 : i32
    %c0_i32_0 = arith.constant 0 : i32
    %c0_i32_1 = arith.constant 0 : i32
    return %c0_i32, %c0_i32_0 : i32, i32
  }
  func.func @transform_26(%arg0: i32) -> (i32, i32) {
    %c0_i32 = arith.constant 0 : i32
    %c0_i32_0 = arith.constant 0 : i32
    %c0_i32_1 = arith.constant 0 : i32
    return %c0_i32, %c0_i32_0 : i32, i32
  }
  func.func @transform_27(%arg0: i32) -> (i32, i32) {
    %c0_i32 = arith.constant 0 : i32
    %c0_i32_0 = arith.constant 0 : i32
    %c0_i32_1 = arith.constant 0 : i32
    return %c0_i32, %c0_i32_0 : i32, i32
  }
  func.func @transform_28(%arg0: i32) -> (i32, i32) {
    %c0_i32 = arith.constant 0 : i32
    %c0_i32_0 = arith.constant 0 : i32
    %c0_i32_1 = arith.constant 0 : i32
    return %c0_i32, %c0_i32_0 : i32, i32
  }
  func.func @transform_29(%arg0: i32) -> (i32, i32) {
    %c0_i32 = arith.constant 0 : i32
    %c0_i32_0 = arith.constant 0 : i32
    %c0_i32_1 = arith.constant 0 : i32
    return %c0_i32, %c0_i32_0 : i32, i32
  }
  func.func @transform_30(%arg0: i32) -> (i32, i32) {
    %c0_i32 = arith.constant 0 : i32
    %c0_i32_0 = arith.constant 0 : i32
    %c0_i32_1 = arith.constant 0 : i32
    return %c0_i32, %c0_i32_0 : i32, i32
  }
  func.func @transform_31(%arg0: i32) -> (i32, i32) {
    %c0_i32 = arith.constant 0 : i32
    %c0_i32_0 = arith.constant 0 : i32
    %c0_i32_1 = arith.constant 0 : i32
    return %c0_i32, %c0_i32_0 : i32, i32
  }
  func.func @transform_32(%arg0: i32) -> (i32, i32) {
    %c0_i32 = arith.constant 0 : i32
    %c0_i32_0 = arith.constant 0 : i32
    %c0_i32_1 = arith.constant 0 : i32
    return %c0_i32, %c0_i32_0 : i32, i32
  }
  func.func @transform_33(%arg0: i32) -> (i32, i32) {
    %c0_i32 = arith.constant 0 : i32
    %c0_i32_0 = arith.constant 0 : i32
    %c0_i32_1 = arith.constant 0 : i32
    return %c0_i32, %c0_i32_0 : i32, i32
  }
  func.func @transform_34(%arg0: i32) -> (i32, i32) {
    %c0_i32 = arith.constant 0 : i32
    %c0_i32_0 = arith.constant 0 : i32
    %c0_i32_1 = arith.constant 0 : i32
    return %c0_i32, %c0_i32_0 : i32, i32
  }
  func.func @transform_35(%arg0: i32) -> (i32, i32) {
    %c0_i32 = arith.constant 0 : i32
    %c0_i32_0 = arith.constant 0 : i32
    %c0_i32_1 = arith.constant 0 : i32
    return %c0_i32, %c0_i32_0 : i32, i32
  }
  func.func @transform_36(%arg0: i32) -> (i32, i32) {
    %c0_i32 = arith.constant 0 : i32
    %c0_i32_0 = arith.constant 0 : i32
    %c0_i32_1 = arith.constant 0 : i32
    return %c0_i32, %c0_i32_0 : i32, i32
  }
  func.func @transform_37(%arg0: i32) -> (i32, i32, i32) {
    %c0_i32 = arith.constant 0 : i32
    %c0_i32_0 = arith.constant 0 : i32
    %c0_i32_1 = arith.constant 0 : i32
    return %arg0, %c0_i32, %c0_i32_0 : i32, i32, i32
  }
}

</mosaic_0001>

<bundles_post_ra>
// kernel: siamese_autoencoder_forward.1
= control target key start
LH: loop header
LB: loop body
LE: loop exit
PB: predicated region body
PF: predicated region fallthrough
CT: control target
= control target key end

     0   :  { %s4189_s6 = smov 1   ;;  %s4190_s10 = smov 2   ;;  %s5065_s0 = inlined_call_operand.smem [shape: u32[38], index: -1, kind: input, shape index: {}] }
   0x1   :  { %s4261_s5 = sld [smem:[%s5065_s0]]   ;;  %s4191_s14 = smov 3  }
   0x2   :  { %s4266_s9 = sld [smem:[%s5065_s0 + %s4189_s6]]   ;;  %s4192_s18 = smov 4  }
   0x3   :  { %s4271_s13 = sld [smem:[%s5065_s0 + %s4190_s10]]   ;;  %s4193_s22 = smov 5  }
   0x4   :  { %s4276_s17 = sld [smem:[%s5065_s0 + %s4191_s14]]   ;;  %s4194_s26 = smov 6  }
   0x5   :  { %s4281_s21 = sld [smem:[%s5065_s0 + %s4192_s18]]   ;;  %s4195_s30 = smov 7  }
   0x6   :  { %s4286_s25 = sld [smem:[%s5065_s0 + %s4193_s22]]   ;;  %s4196_s4 = smov 8  }
   0x7   :  { %5086 = sst [smem:[#allocation36_spill]] %s4261_s5  ;;  %s4197_s10 = smov 9  }
   0x8   :  { %5087 = sst [smem:[#allocation37_spill]] %s4266_s9  ;;  %s4198_s15 = smov 10  }
   0x9   :  { %5088 = sst [smem:[#allocation38_spill]] %s4271_s13  ;;  %s4199_s20 = smov 11  }
   0xa   :  { %5089 = sst [smem:[#allocation39_spill]] %s4276_s17  ;;  %s4201_s1 = smov 13  }
   0xb   :  { %5090 = sst [smem:[#allocation40_spill]] %s4281_s21  ;;  %s4202_s7 = smov 14  }
   0xc   :  { %5091 = sst [smem:[#allocation41_spill]] %s4286_s25  ;;  %s4204_s22 = smov 16  }
   0xd   :  { %s4291_s29 = sld [smem:[%s5065_s0 + %s4194_s26]]   ;;  %s4200_s26 = smov 12  }
   0xe   :  { %s4296_s3 = sld [smem:[%s5065_s0 + %s4195_s30]]   ;;  %s4205_s28 = smov 17  }
   0xf   :  { %s4301_s8 = sld [smem:[%s5065_s0 + %s4196_s4]]  }
  0x10   :  { %s4306_s14 = sld [smem:[%s5065_s0 + %s4197_s10]]  }
  0x11   :  { %s4311_s19 = sld [smem:[%s5065_s0 + %s4198_s15]]   ;;  %s4203_s15 = smov 15  }
  0x12   :  { %s4316_s24 = sld [smem:[%s5065_s0 + %s4199_s20]]  }
  0x13   :  { %5092 = sst [smem:[#allocation42_spill]] %s4291_s29 }
  0x14   :  { %5093 = sst [smem:[#allocation43_spill]] %s4296_s3 }
  0x15   :  { %5094 = sst [smem:[#allocation44_spill]] %s4301_s8 }
  0x16   :  { %5095 = sst [smem:[#allocation45_spill]] %s4306_s14 }
  0x17   :  { %5096 = sst [smem:[#allocation46_spill]] %s4311_s19 }
  0x18   :  { %5097 = sst [smem:[#allocation47_spill]] %s4316_s24 }
  0x19   :  { %s4321_s30 = sld [smem:[%s5065_s0 + %s4200_s26]]  }
  0x1a   :  { %s4326_s6 = sld [smem:[%s5065_s0 + %s4201_s1]]  }
  0x1b   :  { %s4331_s12 = sld [smem:[%s5065_s0 + %s4202_s7]]   ;;  %s4206_s7 = smov 18  }
  0x1c   :  { %s4336_s20 = sld [smem:[%s5065_s0 + %s4203_s15]]   ;;  %s4207_s15 = smov 19  }
  0x1d   :  { %s4341_s27 = sld [smem:[%s5065_s0 + %s4204_s22]]   ;;  %s4208_s22 = smov 20  }
  0x1e   :  { %s4346_s4 = sld [smem:[%s5065_s0 + %s4205_s28]]   ;;  %s4209_s28 = smov 21  }
  0x1f   :  { %5098 = sst [smem:[#allocation48_spill]] %s4321_s30 }
  0x20   :  { %5099 = sst [smem:[#allocation49_spill]] %s4326_s6 }
  0x21   :  { %5100 = sst [smem:[#allocation50_spill]] %s4331_s12 }
  0x22   :  { %5101 = sst [smem:[#allocation51_spill]] %s4336_s20 }
  0x23   :  { %s4351_s12 = sld [smem:[%s5065_s0 + %s4206_s7]]   ;;  %s4210_s7 = smov 22  }
  0x24   :  { %5102 = sst [smem:[#allocation52_spill]] %s4346_s4 }
  0x25   :  { %s4356_s6 = sld [smem:[%s5065_s0 + %s4207_s15]]   ;;  %s4211_s15 = smov 23  }
  0x26   :  { %s4361_s30 = sld [smem:[%s5065_s0 + %s4208_s22]]   ;;  %s4212_s22 = smov 24  }
  0x27   :  { %s4366_s4 = sld [smem:[%s5065_s0 + %s4209_s28]]   ;;  %s4213_s28 = smov 25  }
  0x28   :  { %s4371_s19 = sld [smem:[%s5065_s0 + %s4210_s7]]   ;;  %s4214_s7 = smov 26  }
  0x29   :  { %s4376_s24 = sld [smem:[%s5065_s0 + %s4211_s15]]   ;;  %s4215_s15 = smov 27  }
  0x2a   :  { %s4381_s8 = sld [smem:[%s5065_s0 + %s4212_s22]]   ;;  %s4216_s22 = smov 28  }
  0x2b   :  { %s4391_s3 = sld [smem:[%s5065_s0 + %s4214_s7]]   ;;  %s4218_s7 = smov 30  }
  0x2c   :  { %s4401_s20 = sld [smem:[%s5065_s0 + %s4216_s22]]   ;;  %s4220_s22 = smov 32  }
  0x2d   :  { %5103 = sst [smem:[#allocation53_spill]] %s4366_s4 }
  0x2e   :  { %s4386_s4 = sld [smem:[%s5065_s0 + %s4213_s28]]   ;;  %s4217_s28 = smov 29  }
  0x2f   :  { %5104 = sst [smem:[#allocation54_spill]] %s4376_s24 }
  0x30   :  { %s4396_s24 = sld [smem:[%s5065_s0 + %s4215_s15]]   ;;  %s4219_s15 = smov 31  }
  0x31   :  { %5105 = sst [smem:[#allocation55_spill]] %s4391_s3 }
  0x32   :  { %s4406_s14 = sld [smem:[%s5065_s0 + %s4217_s28]]   ;;  %s4221_s28 = smov 33  }
  0x33   :  { %s4411_s29 = sld [smem:[%s5065_s0 + %s4218_s7]]   ;;  %s4222_s7 = smov 34  }
  0x34   :  { %s4416_s25 = sld [smem:[%s5065_s0 + %s4219_s15]]   ;;  %s4223_s15 = smov 35  }
  0x35   :  { %s4421_s21 = sld [smem:[%s5065_s0 + %s4220_s22]]   ;;  %s4224_s22 = smov 36  }
  0x36   :  { %s4426_s13 = sld [smem:[%s5065_s0 + %s4221_s28]]   ;;  %s4225_s28 = smov 37  }
  0x37   :  { %s4431_s17 = sld [smem:[%s5065_s0 + %s4222_s7]]  }
  0x38   :  { %s4441_s9 = sld [smem:[%s5065_s0 + %s4224_s22]]  }
  0x39   :  { %s4446_s5 = sld [smem:[%s5065_s0 + %s4225_s28]]  }
  0x3a   :  { %5106 = sst [smem:[#allocation56_spill]] %s4416_s25 }
  0x3b   :  { %s4436_s25 = sld [smem:[%s5065_s0 + %s4223_s15]]  }
  0x3f   :  { %5107 = sst [smem:[#allocation57_spill]] %s4446_s5 }
  0x40   :  { %80 = vsyncpa [#allocation3], 0 }
  0x41   :  { %81 = vsyncpa [#allocation5], 0 }
  0x42   :  { %82 = vsyncpa [#allocation8], 0 }
  0x43   :  { %83 = vsyncpa [#allocation11], 0 }
  0x44   :  { %84 = vsyncpa [#allocation14], 0 }
  0x45   :  { %85 = vsyncpa [#allocation17], 0 }
  0x46   :  { %86 = vsyncpa [#allocation20], 0 }
  0x47   :  { %87 = vsyncpa [#allocation23], 0 }
  0x48   :  { %88 = vsyncpa [#allocation26], 0  ;;  %s4448_s7 = smov 0  }
  0x49 LB: > { %s5108_s3 = sld [smem:[#allocation55_spill]]  ;;  %s979_s0 = sshll.u32 %s4351_s12, 4  ;;  %s4187_s7 = sphi %s4448_s7, %s94_s7   ;;  %s4454_s0 = int_to_ptr.hbm [resolvable:$true] %s979_s0 }
  0x4a   : > { %5109 = sst [smem:[#allocation58_spill]] %s4187_s7  ;;  %s4457_s10 = sadd.s32 4294967295, %s4187_s7  }
  0x4b   : > { %p3244_p0 = scmp.ge.s32.totalorder %s4187_s7, 1  ;;  %p907_p1 = scmp.lt.s32.totalorder %s4187_s7, 3 }
  0x4c   : > { %p3468_p2 = scmp.eq.s32.totalorder %s4457_s10, 0  ;;  %s4226_s15 = smov [#allocation4]  }
  0x4d   : > { %p4462_p3 = pnand %p3244_p0, %p907_p1  ;;  %s981_s16 = sshll.u32 %s4226_s15, 4  ;;  %s982_s16 = int_to_ptr.vmem [resolvable:$true] %s981_s16 }
  0x4e   : > { %s1003_s18 = sshll.u32 %s4361_s30, 4  ;;  %s1033_s22 = sshll.u32 %s4381_s8, 4  ;;  %s4469_s18 = int_to_ptr.hbm [resolvable:$true] %s1003_s18  ;;  %s4481_s22 = int_to_ptr.hbm [resolvable:$true] %s1033_s22 }
  0x4f   : > { %p3419_p4 = pneg %p4462_p3  ;;  %s4227_s26 = smov [#allocation7]  }
  0x50   : > { %s4478_s28 = sshll.u32 %s4227_s26, 4  ;;  %s3665_s1 = sshra.s32 %s4454_s0, 4  ;;  %s1006_s28 = int_to_ptr.vmem [resolvable:$true] %s4478_s28  ;;  %s3666_s1 = int_to_ptr.hbm [resolvable:$true] %s3665_s1 }
  0x51   : > { %p4474_p5 = pnand %p3468_p2, %p3419_p4  ;;  %s3667_s2 = scalar_lea.hbm %s3666_s1, 1 }
  0x52   : > { %p3668_p6 = scmp.ne.s32.totalorder %s3666_s1, %s3667_s2  ;;  %s3672_s7 = scalar_lea.hbm %s4351_s12, 1 }
  0x53   : > { %p4486_p7 = pneg %p4474_p5  ;;  %p3673_p10 = scmp.lt.s32.totalorder %s3666_s1, %s4351_s12 }
  0x54   : > { %p3674_p11 = scmp.lt.s32.totalorder %s3672_s7, %s3667_s2 }
  0x55   : > { %p3670_p8 = pnand %p4486_p7, %p3668_p6 }
  0x56   : > { %p3675_p12 = por %p3674_p11, %p3673_p10 }
  0x57   : > { %p3671_p9 = pneg %p3670_p8 }
  0x59   : > { %p3676_p13 = pnand %p3675_p12, %p3671_p9 }
  0x5b   : > { %3679 = shalt.err (!%p3676_p13)
}
  0x5c   : > { %3425 = dma.hbm_to_vmem [thread:$0]  (!%p4474_p5), %s4454_s0, 16, %s982_s16, [#allocation5]  }
  0x5d   : > { %s3695_s26 = sshra.s32 %s4469_s18, 4  ;;  %s3702_s1 = scalar_lea.hbm %s4361_s30, 1  ;;  %s3696_s26 = int_to_ptr.hbm [resolvable:$true] %s3695_s26 }
  0x5e   : > { %s3697_s5 = scalar_lea.hbm %s3696_s26, 1  ;;  %p3703_p6 = scmp.lt.s32.totalorder %s3696_s26, %s4361_s30 }
  0x5f   : > { %p3698_p0 = scmp.ne.s32.totalorder %s3696_s26, %s3697_s5  ;;  %p3704_p8 = scmp.lt.s32.totalorder %s3702_s1, %s3697_s5 }
  0x61   : > { %p3700_p1 = pnand %p3698_p0, %p4486_p7  ;;  %p3705_p9 = por %p3704_p8, %p3703_p6 }
  0x63   : > { %p3701_p4 = pneg %p3700_p1 }
  0x65   : > { %p3706_p10 = pnand %p3705_p9, %p3701_p4 }
  0x67   : > { %3709 = shalt.err (!%p3706_p10)
}
  0x68   : > { %3431 = dma.hbm_to_vmem [thread:$0]  (!%p4474_p5), %s4469_s18, 16, %s1006_s28, [#allocation8]  }
  0x69   : > { %s4228_s7 = smov [#allocation10]   ;;  %s1059_s16 = sshll.u32 %s5108_s3, 4  ;;  %s4506_s16 = int_to_ptr.hbm [resolvable:$true] %s1059_s16 }
  0x6a   : > { %s1035_s0 = sshll.u32 %s4228_s7, 4  ;;  %s3725_s2 = sshra.s32 %s4481_s22, 4  ;;  %s1036_s0 = int_to_ptr.vmem [resolvable:$true] %s1035_s0  ;;  %s3726_s2 = int_to_ptr.hbm [resolvable:$true] %s3725_s2 }
  0x6b   : > { %s3727_s5 = scalar_lea.hbm %s3726_s2, 1  ;;  %s3732_s26 = scalar_lea.hbm %s4381_s8, 1 }
  0x6c   : > { %p3728_p11 = scmp.ne.s32.totalorder %s3726_s2, %s3727_s5  ;;  %p3733_p0 = scmp.lt.s32.totalorder %s3726_s2, %s4381_s8 }
  0x6d   : > { %p3734_p1 = scmp.lt.s32.totalorder %s3732_s26, %s3727_s5 }
  0x6e   : > { %p3730_p12 = pnand %p3728_p11, %p4486_p7 }
  0x6f   : > { %p3735_p4 = por %p3734_p1, %p3733_p0 }
  0x70   : > { %p3731_p13 = pneg %p3730_p12 }
  0x72   : > { %p3736_p6 = pnand %p3735_p4, %p3731_p13 }
  0x74   : > { %3739 = shalt.err (!%p3736_p6)
}
  0x75   : > { %3437 = dma.hbm_to_vmem [thread:$0]  (!%p4474_p5), %s4481_s22, 16, %s1036_s0, [#allocation11]  }
  0x76   : > { %s1083_s18 = sshll.u32 %s4401_s20, 4  ;;  %s4229_s28 = smov [#allocation13]   ;;  %s4517_s18 = int_to_ptr.hbm [resolvable:$true] %s1083_s18 }
  0x77   : > { %s1061_s1 = sshll.u32 %s4229_s28, 4  ;;  %s3755_s7 = sshra.s32 %s4506_s16, 4  ;;  %s1062_s1 = int_to_ptr.vmem [resolvable:$true] %s1061_s1  ;;  %s3756_s7 = int_to_ptr.hbm [resolvable:$true] %s3755_s7 }
  0x78   : > { %s3757_s2 = scalar_lea.hbm %s3756_s7, 1  ;;  %s3762_s5 = scalar_lea.hbm %s5108_s3, 1 }
  0x79   : > { %p3758_p8 = scmp.ne.s32.totalorder %s3756_s7, %s3757_s2  ;;  %p3763_p11 = scmp.lt.s32.totalorder %s3756_s7, %s5108_s3 }
  0x7a   : > { %p3764_p12 = scmp.lt.s32.totalorder %s3762_s5, %s3757_s2 }
  0x7b   : > { %p3760_p9 = pnand %p3758_p8, %p4486_p7 }
  0x7c   : > { %p3765_p13 = por %p3764_p12, %p3763_p11 }
  0x7d   : > { %p3761_p10 = pneg %p3760_p9 }
  0x7f   : > { %p3766_p0 = pnand %p3765_p13, %p3761_p10 }
  0x81   : > { %3769 = shalt.err (!%p3766_p0)
}
  0x82   : > { %3443 = dma.hbm_to_vmem [thread:$0]  (!%p4474_p5), %s4506_s16, 16, %s1062_s1, [#allocation14]  }
  0x83   : > { %s4230_s22 = smov [#allocation16]   ;;  %s1109_s26 = sshll.u32 %s4411_s29, 4  ;;  %s4528_s26 = int_to_ptr.hbm [resolvable:$true] %s1109_s26 }
  0x84   : > { %s1085_s0 = sshll.u32 %s4230_s22, 4  ;;  %s3785_s28 = sshra.s32 %s4517_s18, 4  ;;  %s1086_s0 = int_to_ptr.vmem [resolvable:$true] %s1085_s0  ;;  %s3786_s28 = int_to_ptr.hbm [resolvable:$true] %s3785_s28 }
  0x85   : > { %s3787_s7 = scalar_lea.hbm %s3786_s28, 1  ;;  %s3792_s2 = scalar_lea.hbm %s4401_s20, 1 }
  0x86   : > { %p3788_p1 = scmp.ne.s32.totalorder %s3786_s28, %s3787_s7  ;;  %p3793_p8 = scmp.lt.s32.totalorder %s3786_s28, %s4401_s20 }
  0x87   : > { %p3794_p9 = scmp.lt.s32.totalorder %s3792_s2, %s3787_s7 }
  0x88   : > { %p3790_p4 = pnand %p3788_p1, %p4486_p7 }
  0x89   : > { %p3795_p10 = por %p3794_p9, %p3793_p8 }
  0x8a   : > { %p3791_p6 = pneg %p3790_p4 }
  0x8c   : > { %p3796_p11 = pnand %p3795_p10, %p3791_p6 }
  0x8e   : > { %3799 = shalt.err (!%p3796_p11)
}
  0x8f   : > { %3449 = dma.hbm_to_vmem [thread:$0]  (!%p4474_p5), %s4517_s18, 16, %s1086_s0, [#allocation17]  }
  0x90   : > { %s1136_s16 = sshll.u32 %s4426_s13, 4  ;;  %s4231_s1 = smov [#allocation19]   ;;  %s4539_s16 = int_to_ptr.hbm [resolvable:$true] %s1136_s16 }
  0x91   : > { %s1111_s5 = sshll.u32 %s4231_s1, 4  ;;  %s3815_s22 = sshra.s32 %s4528_s26, 4  ;;  %s1112_s5 = int_to_ptr.vmem [resolvable:$true] %s1111_s5  ;;  %s3816_s22 = int_to_ptr.hbm [resolvable:$true] %s3815_s22 }
  0x92   : > { %s3817_s28 = scalar_lea.hbm %s3816_s22, 1  ;;  %s3822_s7 = scalar_lea.hbm %s4411_s29, 1 }
  0x93   : > { %p3818_p12 = scmp.ne.s32.totalorder %s3816_s22, %s3817_s28  ;;  %p3823_p1 = scmp.lt.s32.totalorder %s3816_s22, %s4411_s29 }
  0x94   : > { %p3824_p4 = scmp.lt.s32.totalorder %s3822_s7, %s3817_s28 }
  0x95   : > { %p3820_p13 = pnand %p3818_p12, %p4486_p7 }
  0x96   : > { %p3825_p6 = por %p3824_p4, %p3823_p1 }
  0x97   : > { %p3821_p0 = pneg %p3820_p13 }
  0x99   : > { %p3826_p8 = pnand %p3825_p6, %p3821_p0 }
  0x9b   : > { %3829 = shalt.err (!%p3826_p8)
}
  0x9c   : > { %3455 = dma.hbm_to_vmem [thread:$0]  (!%p4474_p5), %s4528_s26, 16, %s1112_s5, [#allocation20]  }
  0x9d   : > { %s4232_s18 = smov [#allocation22]   ;;  %s964_s2 = sshll.u32 %s4341_s27, 4  ;;  %s4550_s2 = int_to_ptr.hbm [resolvable:$true] %s964_s2 }
  0x9e   : > { %s1138_s0 = sshll.u32 %s4232_s18, 4  ;;  %s3845_s1 = sshra.s32 %s4539_s16, 4  ;;  %s1139_s0 = int_to_ptr.vmem [resolvable:$true] %s1138_s0  ;;  %s3846_s1 = int_to_ptr.hbm [resolvable:$true] %s3845_s1 }
  0x9f   : > { %s3847_s22 = scalar_lea.hbm %s3846_s1, 1  ;;  %s3852_s28 = scalar_lea.hbm %s4426_s13, 1 }
  0xa0   : > { %p3848_p9 = scmp.ne.s32.totalorder %s3846_s1, %s3847_s22  ;;  %p3853_p12 = scmp.lt.s32.totalorder %s3846_s1, %s4426_s13 }
  0xa1   : > { %p3854_p13 = scmp.lt.s32.totalorder %s3852_s28, %s3847_s22 }
  0xa2   : > { %p3850_p10 = pnand %p3848_p9, %p4486_p7 }
  0xa3   : > { %p3855_p0 = por %p3854_p13, %p3853_p12 }
  0xa4   : > { %p3851_p11 = pneg %p3850_p10 }
  0xa6   : > { %p3856_p1 = pnand %p3855_p0, %p3851_p11 }
  0xa8   : > { %3859 = shalt.err (!%p3856_p1)
}
  0xa9   : > { %3461 = dma.hbm_to_vmem [thread:$0]  (!%p4474_p5), %s4539_s16, 16, %s1139_s0, [#allocation23]  }
  0xaa   : > { %s991_s26 = sshll.u32 %s4356_s6, 4  ;;  %s4233_s5 = smov [#allocation2]   ;;  %s4561_s26 = int_to_ptr.hbm [resolvable:$true] %s991_s26 }
  0xab   : > { %s966_s7 = sshll.u32 %s4233_s5, 4  ;;  %s3875_s18 = sshra.s32 %s4550_s2, 4  ;;  %s967_s7 = int_to_ptr.vmem [resolvable:$true] %s966_s7  ;;  %s3876_s18 = int_to_ptr.hbm [resolvable:$true] %s3875_s18 }
  0xac   : > { %s3877_s1 = scalar_lea.hbm %s3876_s18, 1  ;;  %s3882_s22 = scalar_lea.hbm %s4341_s27, 1 }
  0xad   : > { %p3878_p4 = scmp.ne.s32.totalorder %s3876_s18, %s3877_s1  ;;  %p3883_p9 = scmp.lt.s32.totalorder %s3876_s18, %s4341_s27 }
  0xae   : > { %p3884_p10 = scmp.lt.s32.totalorder %s3882_s22, %s3877_s1 }
  0xaf   : > { %p3880_p6 = pnand %p3878_p4, %p4486_p7 }
  0xb0   : > { %p3885_p11 = por %p3884_p10, %p3883_p9 }
  0xb1   : > { %p3881_p8 = pneg %p3880_p6 }
  0xb3   : > { %p3886_p12 = pnand %p3885_p11, %p3881_p8 }
  0xb5   : > { %3889 = shalt.err (!%p3886_p12)
}
  0xb6   : > { %3422 = dma.hbm_to_vmem [thread:$0]  (!%p4474_p5), %s4550_s2, 16, %s967_s7, [#allocation3]  }
  0xb7   : > { %s4234_s16 = smov [#allocation6]   ;;  %s1018_s28 = sshll.u32 %s4371_s19, 4  ;;  %s4572_s28 = int_to_ptr.hbm [resolvable:$true] %s1018_s28 }
  0xb8   : > { %s993_s0 = sshll.u32 %s4234_s16, 4  ;;  %s3905_s5 = sshra.s32 %s4561_s26, 4  ;;  %s994_s0 = int_to_ptr.vmem [resolvable:$true] %s993_s0  ;;  %s3906_s5 = int_to_ptr.hbm [resolvable:$true] %s3905_s5 }
  0xb9   : > { %s3907_s18 = scalar_lea.hbm %s3906_s5, 1  ;;  %s3912_s1 = scalar_lea.hbm %s4356_s6, 1 }
  0xba   : > { %p3908_p13 = scmp.ne.s32.totalorder %s3906_s5, %s3907_s18  ;;  %p3913_p4 = scmp.lt.s32.totalorder %s3906_s5, %s4356_s6 }
  0xbb   : > { %p3914_p6 = scmp.lt.s32.totalorder %s3912_s1, %s3907_s18 }
  0xbc   : > { %p3910_p0 = pnand %p3908_p13, %p4486_p7 }
  0xbd   : > { %p3915_p8 = por %p3914_p6, %p3913_p4 }
  0xbe   : > { %p3911_p1 = pneg %p3910_p0 }
  0xc0   : > { %p3916_p9 = pnand %p3915_p8, %p3911_p1 }
  0xc2   : > { %3919 = shalt.err (!%p3916_p9)
}
  0xc3   : > { %3428 = dma.hbm_to_vmem [thread:$0]  (!%p4474_p5), %s4561_s26, 16, %s994_s0, [#allocation5]  }
  0xc4   : > { %s1044_s2 = sshll.u32 %s4386_s4, 4  ;;  %s4235_s7 = smov [#allocation9]   ;;  %s4583_s2 = int_to_ptr.hbm [resolvable:$true] %s1044_s2 }
  0xc5   : > { %s1020_s22 = sshll.u32 %s4235_s7, 4  ;;  %s3935_s16 = sshra.s32 %s4572_s28, 4  ;;  %s1021_s22 = int_to_ptr.vmem [resolvable:$true] %s1020_s22  ;;  %s3936_s16 = int_to_ptr.hbm [resolvable:$true] %s3935_s16 }
  0xc6   : > { %s3937_s5 = scalar_lea.hbm %s3936_s16, 1  ;;  %s3942_s18 = scalar_lea.hbm %s4371_s19, 1 }
  0xc7   : > { %p3938_p10 = scmp.ne.s32.totalorder %s3936_s16, %s3937_s5  ;;  %p3943_p13 = scmp.lt.s32.totalorder %s3936_s16, %s4371_s19 }
  0xc8   : > { %p3944_p0 = scmp.lt.s32.totalorder %s3942_s18, %s3937_s5 }
  0xc9   : > { %p3940_p11 = pnand %p3938_p10, %p4486_p7 }
  0xca   : > { %p3945_p1 = por %p3944_p0, %p3943_p13 }
  0xcb   : > { %p3941_p12 = pneg %p3940_p11 }
  0xcd   : > { %p3946_p4 = pnand %p3945_p1, %p3941_p12 }
  0xcf   : > { %3949 = shalt.err (!%p3946_p4)
}
  0xd0   : > { %3434 = dma.hbm_to_vmem [thread:$0]  (!%p4474_p5), %s4572_s28, 16, %s1021_s22, [#allocation8]  }
  0xd1   : > { %s4236_s26 = smov [#allocation12]   ;;  %s3965_s1 = sshra.s32 %s4583_s2, 4  ;;  %s3966_s1 = int_to_ptr.hbm [resolvable:$true] %s3965_s1 }
  0xd2   : > { %s1046_s0 = sshll.u32 %s4236_s26, 4  ;;  %s3967_s7 = scalar_lea.hbm %s3966_s1, 32  ;;  %s1047_s0 = int_to_ptr.vmem [resolvable:$true] %s1046_s0 }
  0xd3   : > { %p3968_p6 = scmp.ne.s32.totalorder %s3966_s1, %s3967_s7  ;;  %s3972_s16 = scalar_lea.hbm %s4386_s4, 32 }
  0xd4   : > { %p3973_p10 = scmp.lt.s32.totalorder %s3966_s1, %s4386_s4  ;;  %p3974_p11 = scmp.lt.s32.totalorder %s3972_s16, %s3967_s7 }
  0xd5   : > { %p3970_p8 = pnand %p3968_p6, %p4486_p7 }
  0xd6   : > { %p3975_p12 = por %p3974_p11, %p3973_p10 }
  0xd7   : > { %p3971_p9 = pneg %p3970_p8 }
  0xd9   : > { %p3976_p13 = pnand %p3975_p12, %p3971_p9 }
  0xdb   : > { %3979 = shalt.err (!%p3976_p13)
}
  0xdc   : > { %s5079_s5 = smov 128   ;;  %s5081_s28 = smov 8  }
  0xdd   : > { %3440 = dma.hbm_to_vmem [thread:$0]  (!%p4474_p5), %s4583_s2, 512, %s1047_s0, [#allocation11], %s5079_s5, %s5079_s5, %s5081_s28  }
  0xde   : > { %s1071_s22 = sshll.u32 %s4396_s24, 4  ;;  %s4239_s18 = smov [#allocation15]   ;;  %s1072_s22 = int_to_ptr.hbm [resolvable:$true] %s1071_s22 }
  0xdf   : > { %s1073_s26 = sshll.u32 %s4239_s18, 4  ;;  %s1094_s1 = sshll.u32 %s4406_s14, 4  ;;  %s1074_s26 = int_to_ptr.vmem [resolvable:$true] %s1073_s26  ;;  %s1095_s1 = int_to_ptr.hbm [resolvable:$true] %s1094_s1 }
  0xe0   : > { %s3995_s7 = sshra.s32 %s1072_s22, 4  ;;  %s4002_s3 = scalar_lea.hbm %s4396_s24, 1  ;;  %s3996_s7 = int_to_ptr.hbm [resolvable:$true] %s3995_s7 }
  0xe1   : > { %s3997_s16 = scalar_lea.hbm %s3996_s7, 1  ;;  %p4003_p6 = scmp.lt.s32.totalorder %s3996_s7, %s4396_s24 }
  0xe2   : > { %p3998_p0 = scmp.ne.s32.totalorder %s3996_s7, %s3997_s16  ;;  %p4004_p8 = scmp.lt.s32.totalorder %s4002_s3, %s3997_s16 }
  0xe4   : > { %p4000_p1 = pnand %p3998_p0, %p4486_p7  ;;  %p4005_p9 = por %p4004_p8, %p4003_p6 }
  0xe6   : > { %p4001_p4 = pneg %p4000_p1 }
  0xe8   : > { %p4006_p10 = pnand %p4005_p9, %p4001_p4 }
  0xea   : > { %4009 = shalt.err (!%p4006_p10)
}
  0xeb   : > { %3446 = dma.hbm_to_vmem [thread:$0]  (!%p4474_p5), %s1072_s22, 16, %s1074_s26, [#allocation14]  }
  0xec   : > { %s4240_s2 = smov [#allocation18]   ;;  %s1124_s18 = sshll.u32 %s4421_s21, 4  ;;  %s4613_s18 = int_to_ptr.hbm [resolvable:$true] %s1124_s18 }
  0xed   : > { %s1096_s0 = sshll.u32 %s4240_s2, 4  ;;  %s4025_s5 = sshra.s32 %s1095_s1, 4  ;;  %s1097_s0 = int_to_ptr.vmem [resolvable:$true] %s1096_s0  ;;  %s4026_s5 = int_to_ptr.hbm [resolvable:$true] %s4025_s5 }
  0xee   : > { %s4027_s3 = scalar_lea.hbm %s4026_s5, 32  ;;  %s4032_s7 = scalar_lea.hbm %s4406_s14, 32 }
  0xef   : > { %p4028_p11 = scmp.ne.s32.totalorder %s4026_s5, %s4027_s3  ;;  %p4033_p0 = scmp.lt.s32.totalorder %s4026_s5, %s4406_s14 }
  0xf0   : > { %p4034_p1 = scmp.lt.s32.totalorder %s4032_s7, %s4027_s3 }
  0xf1   : > { %p4030_p12 = pnand %p4028_p11, %p4486_p7 }
  0xf2   : > { %p4035_p4 = por %p4034_p1, %p4033_p0 }
  0xf3   : > { %p4031_p13 = pneg %p4030_p12 }
  0xf5   : > { %p4036_p6 = pnand %p4035_p4, %p4031_p13 }
  0xf7   : > { %4039 = shalt.err (!%p4036_p6)
}
  0xf8   : > { %s5113_s22 = smov 128   ;;  %s1148_s26 = sshll.u32 %s4431_s17, 4  ;;  %s4625_s26 = int_to_ptr.hbm [resolvable:$true] %s1148_s26 }
  0xf9   : > { %3452 = dma.hbm_to_vmem [thread:$0]  (!%p4474_p5), %s1095_s1, 512, %s1097_s0, [#allocation17], %s5113_s22, %s5113_s22, %s5081_s28  }
  0xfa   : > { %s4241_s16 = smov [#allocation21]   ;;  %s4055_s5 = sshra.s32 %s4613_s18, 4  ;;  %s4056_s5 = int_to_ptr.hbm [resolvable:$true] %s4055_s5 }
  0xfb   : > { %s1126_s2 = sshll.u32 %s4241_s16, 4  ;;  %s4057_s3 = scalar_lea.hbm %s4056_s5, 1  ;;  %s1127_s2 = int_to_ptr.vmem [resolvable:$true] %s1126_s2 }
  0xfc   : > { %p4058_p8 = scmp.ne.s32.totalorder %s4056_s5, %s4057_s3  ;;  %s4062_s7 = scalar_lea.hbm %s4421_s21, 1 }
  0xfd   : > { %p4063_p11 = scmp.lt.s32.totalorder %s4056_s5, %s4421_s21  ;;  %p4064_p12 = scmp.lt.s32.totalorder %s4062_s7, %s4057_s3 }
  0xfe   : > { %p4060_p9 = pnand %p4058_p8, %p4486_p7 }
  0xff   : > { %p4065_p13 = por %p4064_p12, %p4063_p11 }
 0x100   : > { %p4061_p10 = pneg %p4060_p9 }
 0x102   : > { %p4066_p0 = pnand %p4065_p13, %p4061_p10 }
 0x104   : > { %4069 = shalt.err (!%p4066_p0)
}
 0x105   : > { %3458 = dma.hbm_to_vmem [thread:$0]  (!%p4474_p5), %s4613_s18, 16, %s1127_s2, [#allocation20]  }
 0x106   : > { %s4242_s1 = smov [#allocation24]   ;;  %s1159_s16 = sshll.u32 %s4436_s25, 4  ;;  %s1160_s16 = int_to_ptr.hbm [resolvable:$true] %s1159_s16 }
 0x107   : > { %s1150_s0 = sshll.u32 %s4242_s1, 4  ;;  %s4085_s28 = sshra.s32 %s4625_s26, 4  ;;  %s1151_s0 = int_to_ptr.vmem [resolvable:$true] %s1150_s0  ;;  %s4086_s28 = int_to_ptr.hbm [resolvable:$true] %s4085_s28 }
 0x108   : > { %s4087_s5 = scalar_lea.hbm %s4086_s28, 1  ;;  %s4092_s3 = scalar_lea.hbm %s4431_s17, 1 }
 0x109   : > { %p4088_p1 = scmp.ne.s32.totalorder %s4086_s28, %s4087_s5  ;;  %p4093_p8 = scmp.lt.s32.totalorder %s4086_s28, %s4431_s17 }
 0x10a   : > { %p4094_p9 = scmp.lt.s32.totalorder %s4092_s3, %s4087_s5 }
 0x10b   : > { %p4090_p4 = pnand %p4088_p1, %p4486_p7 }
 0x10c   : > { %p4095_p10 = por %p4094_p9, %p4093_p8 }
 0x10d   : > { %p4091_p6 = pneg %p4090_p4 }
 0x10f   : > { %p4096_p11 = pnand %p4095_p10, %p4091_p6 }
 0x111   : > { %4099 = shalt.err (!%p4096_p11)
}
 0x112   : > { %3464 = dma.hbm_to_vmem [thread:$0]  (!%p4474_p5), %s4625_s26, 16, %s1151_s0, [#allocation23]  }
 0x113   : > { %s4243_s18 = smov [#allocation25]   ;;  %s4115_s7 = sshra.s32 %s1160_s16, 4  ;;  %s4116_s7 = int_to_ptr.hbm [resolvable:$true] %s4115_s7 }
 0x114   : > { %s1161_s2 = sshll.u32 %s4243_s18, 4  ;;  %s4117_s1 = scalar_lea.hbm %s4116_s7, 32  ;;  %s1162_s2 = int_to_ptr.vmem [resolvable:$true] %s1161_s2 }
 0x115   : > { %p4118_p12 = scmp.ne.s32.totalorder %s4116_s7, %s4117_s1  ;;  %s4122_s28 = scalar_lea.hbm %s4436_s25, 32 }
 0x116   : > { %p4123_p1 = scmp.lt.s32.totalorder %s4116_s7, %s4436_s25  ;;  %p4124_p4 = scmp.lt.s32.totalorder %s4122_s28, %s4117_s1 }
 0x117   : > { %p4120_p13 = pnand %p4118_p12, %p4486_p7 }
 0x118   : > { %p4125_p6 = por %p4124_p4, %p4123_p1 }
 0x119   : > { %p4121_p0 = pneg %p4120_p13 }
 0x11b   : > { %p4126_p8 = pnand %p4125_p6, %p4121_p0 }
 0x11d   : > { %4129 = shalt.err (!%p4126_p8)
}
 0x11e   : > { %s5114_s26 = smov 8   ;;  %1188 = sbr.rel (%p4462_p3) target bundleno = 5793 (0x16a1), region = 168 }
 0x11f   : > { %3467 = dma.hbm_to_vmem [thread:$0]  (!%p4474_p5), %s1160_s16, 512, %s1162_s2, [#allocation26], %s5113_s22, %s5113_s22, %s5114_s26  }
 0x123   : > { %4150 = dma.done.wait (%p3468_p2), [#allocation3], 16  }
 0x124   : > { %4152 = vsyncadd (%p3468_p2), [#allocation3], 4294967280 }
 0x125   : > { %4154 = dma.done.wait (%p3468_p2), [#allocation5], 32  }
 0x126   : > { %4156 = vsyncadd (%p3468_p2), [#allocation5], 4294967264 }
 0x127   : > { %4158 = dma.done.wait (%p3468_p2), [#allocation8], 32  }
 0x128   : > { %4160 = vsyncadd (%p3468_p2), [#allocation8], 4294967264 }
 0x129   : > { %4162 = dma.done.wait (%p3468_p2), [#allocation11], 528  }
 0x12a   : > { %4164 = vsyncadd (%p3468_p2), [#allocation11], 4294966768 }
 0x12b   : > { %4166 = dma.done.wait (%p3468_p2), [#allocation14], 32  }
 0x12c   : > { %4168 = vsyncadd (%p3468_p2), [#allocation14], 4294967264 }
 0x12d   : > { %4170 = dma.done.wait (%p3468_p2), [#allocation17], 528  }
 0x12e   : > { %4172 = vsyncadd (%p3468_p2), [#allocation17], 4294966768 }
 0x12f   : > { %4174 = dma.done.wait (%p3468_p2), [#allocation20], 32  }
 0x130   : > { %4176 = vsyncadd (%p3468_p2), [#allocation20], 4294967264 }
 0x131   : > { %4178 = dma.done.wait (%p3468_p2), [#allocation23], 32  }
 0x132   : > { %4180 = vsyncadd (%p3468_p2), [#allocation23], 4294967264 }
 0x133   : > { %4182 = dma.done.wait (%p3468_p2), [#allocation26], 512  }
 0x134   : > { %4184 = vsyncadd (%p3468_p2), [#allocation26], 4294966784  ;;  %s5115_s11 = sld [smem:[#allocation36_spill]]  ;;  %p1356_p3 = scmp.lt.s32.totalorder %s4457_s10, 1  ;;  %v4244_v0 = vmov 0   ;;  %v1368_v13 = vlaneseq  ;;  %vm1392_vm0 = vcmask 523264  }
 0x135   : > { %s5116_s23 = sld [smem:[#allocation37_spill]]  ;;  %3572 = vset.pattern.permute.xlu0 %v4244_v0  ;;  %v4245_v16 = vmov 0.0   ;;  %vm1430_vm3 = vcmask 261120   ;;  %s4246_s3 = smov 80   ;;  %vm1463_vm4 = vcmask 130048   ;;  %vm1489_vm5 = vcmask 64512  }
 0x136   : > { %s5140_s10 = smov (!%p1356_p3, %s4457_s10), 1  ;;  %s5117_s0 = sld [smem:[#allocation39_spill]]  ;;  %v4710_v14 = vand.u32 127, %v1368_v13 }
 0x137   : > { %s5082_s15 = sshll.u32 %s5140_s10, 4  ;;  %s5118_s16 = sld [smem:[#allocation38_spill]] }
 0x138   : > { %s5119_s5 = sld [smem:[#allocation40_spill]]  ;;  %s4247_s18 = smov 64  }
 0x139   : > { %s4248_s2 = smov 96   ;;  %s4249_s7 = smov 112  }
 0x13a   : > { %s1360_s22 = scalar_lea.vmem %s5115_s11, %s5082_s15  ;;  %s4250_s1 = smov 48  }
 0x13b   : > { %v1366_v1 = vld [vmem:[%s1360_s22] sm:$0xff]  ;;  %v1389_v2 = vld [vmem:[%s5116_s23 + $0x38] sm:$0xff]  ;;  %v1388_v3 = vld [vmem:[%s5116_s23 + $0x30] sm:$0xff]  ;;  %s5120_s28 = sld [smem:[#allocation41_spill]]  ;;  %s5083_s26 = smov 16  }
 0x13c   : > { %1371 = vperm.xlu0 %3572, %v1366_v1   ;;  %1407 = vmatpush.msra.mxu0 %v1389_v2  ;;  %v1387_v4 = vld [vmem:[%s5116_s23 + $0x28] sm:$0xff]  ;;  %v1386_v5 = vld [vmem:[%s5116_s23 + $0x20] sm:$0xff]  ;;  %v1385_v7 = vld [vmem:[%s5116_s23 + $0x18] sm:$0xff]  ;;  %s5121_s11 = sld [smem:[#allocation42_spill]] }
 0x13d   : > { %v1367_v6 = vld [vmem:[%s1360_s22 + $0x8] sm:$0xff]  ;;  %v1384_v8 = vld [vmem:[%s5116_s23 + $0x10] sm:$0xff]  ;;  %v1382_v10 = vld [vmem:[%s5116_s23] sm:$0xff]  ;;  %s5122_s22 = sld [smem:[#allocation45_spill]] }
 0x13e   : > { %1408 = vmatpush.msra.mxu0 %v1388_v3  ;;  %v1383_v9 = vld [vmem:[%s5116_s23 + $0x8] sm:$0xff]  ;;  %v1425_v11 = vld [vmem:[%s5117_s0 + $0x18] sm:$0xff]  ;;  %v1424_v12 = vld [vmem:[%s5117_s0 + $0x10] sm:$0xff]  ;;  %s5125_s15 = sld [smem:[#allocation44_spill]] }
 0x13f   : > { %1449 = vmatpush.msra.mxu1 %v1425_v11  ;;  %v1423_v20 = vld [vmem:[%s5117_s0 + $0x8] sm:$0xff]  ;;  %v1422_v21 = vld [vmem:[%s5117_s0] sm:$0xff] }
 0x140   : > { %1409 = vmatpush.msra.mxu0 %v1387_v4  ;;  %v1390_v22 = vld [vmem:[%s5118_s16] sm:$0xff]  ;;  %v1391_v25 = vld [vmem:[%s5118_s16 + $0x8] sm:$0xff] }
 0x141   : > { %1450 = vmatpush.msra.mxu1 %v1424_v12  ;;  %v3573_v28 = vld [vmem:[%s5119_s5] ss:$0 sm:$0xff]  ;;  %s5123_s5 = sld [smem:[#allocation51_spill]] }
 0x142   : > { %1410 = vmatpush.msra.mxu0 %v1386_v5 }
 0x143   : > { %1451 = vmatpush.msra.mxu1 %v1423_v20 }
 0x144   : > { %1374 = vperm.xlu0 %3572, %v1367_v6   ;;  %1411 = vmatpush.msra.mxu0 %v1385_v7 }
 0x145   : > { %1452 = vmatpush.msra.mxu1 %v1422_v21 }
 0x146   : > { %1412 = vmatpush.msra.mxu0 %v1384_v8 }
 0x148   : > { %1413 = vmatpush.msra.mxu0 %v1383_v9 }
 0x14a   : > { %1414 = vmatpush.msra.mxu0 %v1382_v10 }
 0x1ae   : > { %v1372_v15 = vpop.permute.xlu0 %1371 }
 0x1af   : > { %vm1376_vm1 = vcmp.eq.s32.totalorder %v4710_v14, %v1372_v15 }
 0x1b0   : > { %v3283_v17 = vsel %vm1376_vm1, 1.0, %v4245_v16 }
 0x1b1   : > { %3285 = vmatmul.msk.f32.vlgmr.msra.gmra.mxu0 %vm1392_vm0, %v3283_v17 }
 0x1b6   : > { %v1375_v18 = vpop.permute.xlu0 %1374 }
 0x1b7   : > { %vm1377_vm2 = vcmp.eq.s32.totalorder %v4710_v14, %v1375_v18 }
 0x1b8   : > { %v3284_v19 = vsel %vm1377_vm2, 1.0, %v4245_v16 }
 0x1b9   : > { %3286 = vmatmul.msk.f32.gmra.mxu0 %vm1392_vm0, %v3284_v19 }
 0x22e   : > { %v1416_v23 = vpop.f32.mrf.mxu0 }
 0x22f   : > { %v4719_v24 = vadd.f32 %v1416_v23, %v1390_v22 }
 0x231   : > { %3287 = vmatmul.msk.f32.vlgmr.msra.gmra.mxu1 %vm1430_vm3, %v4719_v24 }
 0x236   : > { %v1419_v26 = vpop.f32.mrf.mxu0 }
 0x237   : > { %v4724_v27 = vadd.f32 %v1419_v26, %v1391_v25 }
 0x239   : > { %3288 = vmatmul.msk.f32.gmra.mxu1 %vm1430_vm3, %v4724_v27 }
 0x2ae   : > { %v1454_v29 = vpop.f32.mrf.mxu1 }
 0x2af   : > { %v4729_v30 = vadd.f32 %v3573_v28, %v1454_v29 }
 0x2b1   : > { %1529 = vrot.lane.b32.xlu0 %v4729_v30, %s4246_s3  ;;  %1501 = vrot.lane.b32.xlu2 %v4729_v30, %s4247_s18 }
 0x2b2   : > { %1461 = vrot.lane.b32.xlu1 %v4729_v30, %s4248_s2 }
 0x2b6   : > { %v1457_v31 = vpop.f32.mrf.mxu1 }
 0x2b7   : > { %v4739_v32 = vadd.f32 %v3573_v28, %v1457_v31  ;;  %v1736_v31 = vld [vmem:[%s5120_s28 + $0x10] sm:$0xff] }
 0x2b9   : > { %1527 = vrot.lane.b32.xlu0 %v4729_v30, %s4249_s7 }
 0x2c1   : > { %1665 = vrot.lane.b32.xlu0 %v4739_v32, %s4246_s3 }
 0x2c9   : > { %1599 = vrot.lane.b32.xlu0 %v4739_v32, %s4248_s2 }
 0x30b   : > { %v1502_v33 = vpop.permute.xlu2 %1501 }
 0x30c   : > { %1522 = vmatpush.msra.mxu3 %v1502_v33  ;;  %v1734_v33 = vld [vmem:[%s5120_s28] sm:$0xff] }
 0x323   : > { %v1530_v34 = vpop.permute.xlu0 %1529 }
 0x324   : > { %v1462_v35 = vpop.permute.xlu1 %1461  ;;  %3292 = vmatpush.xpose.msk.msrb.mxu3 %vm1463_vm4, %v1530_v34 }
 0x325   : > { %3289 = vmatpush.xpose.msk.msra.mxu2 %vm1463_vm4, %v1462_v35 }
 0x328   : > { %3290 = vmatmul.msk.f32.vlgmr.msra.gmra.mxu2 %vm1463_vm4, %v4729_v30 }
 0x32b   : > { %v1528_v36 = vpop.permute.xlu0 %1527 }
 0x333   : > { %v1666_v37 = vpop.permute.xlu0 %1665 }
 0x334   : > { %3298 = vmatpush.xpose.msk.msrb.mxu1 %vm1463_vm4, %v1666_v37 }
 0x33b   : > { %v1600_v50 = vpop.permute.xlu0 %1599 }
 0x3ab   : > { %v1485_v38 = vpop.f32.mrf.mxu2 }
 0x3ac   : > { %v1488_v39 = vmul.f32 0.25, %v1485_v38 }
 0x3ae   : > { %v1490_v40 = vsel %vm1489_vm5, %v1488_v39, -inf }
 0x3af   : > { %1491 = vmax.xlane.f32.xlu1 %v1490_v40 }
 0x422   : > { %v1492_v41 = vpop.xlane.xlu1 %1491 }
 0x423   : > { %v1493_v42 = vsub.f32 %v1488_v39, %v1492_v41  ;;  %v3574_v39 = vld [vmem:[%s5121_s11] ss:$0 sm:$0xff]  ;;  %s5124_s11 = sld [smem:[#allocation43_spill]] }
 0x425   : > { %v1494_v43 = vmul.f32 1.442695, %v1493_v42 }
 0x427   : > { %3595 = vpow2.f32 %v1494_v43 }
 0x42d   : > { %v3596_v44 = vpop.eup %3595 }
 0x42e   : > { %v1496_v45 = vsel %vm1489_vm5, %v3596_v44, 0.0 }
 0x42f   : > { %1497 = vadd.xlane.f32.xlu2 %v1496_v45 }
 0x447   : > { %1663 = vrot.lane.b32.xlu2 %v4739_v32, %s4249_s7 }
 0x4a2   : > { %v1498_v46 = vpop.xlane.xlu2 %1497 }
 0x4a3   : > { %3597 = vrcp.f32 %v1498_v46  ;;  %v4252_v46 = vmov 32.0  }
 0x4a9   : > { %v3598_v47 = vpop.eup %3597 }
 0x4aa   : > { %v1664_v48 = vpop.permute.xlu2 %1663  ;;  %v1500_v49 = vmul.f32 %v3598_v47, %v3596_v44 }
 0x4ab   : > { %3299 = vmatmul.msk.f32.vlgmr.msrb.gmra.mxu1 %vm1463_vm4, %v1664_v48 }
 0x4ac   : > { %3291 = vmatmul.msk.f32.vlgmr.msra.gmra.mxu3 %vm1489_vm5, %v1500_v49 }
 0x4ad   : > { %3295 = vmatpush.xpose.msk.msra.mxu3 %vm1463_vm4, %v1600_v50 }
 0x4b4   : > { %3293 = vmatmul.msk.f32.vlgmr.msrb.gmra.mxu3 %vm1463_vm4, %v1528_v36 }
 0x4bc   : > { %3296 = vmatmul.msk.f32.vlgmr.msra.gmra.mxu3 %vm1463_vm4, %v4739_v32 }
 0x528   : > { %v1688_v51 = vpop.f32.mrf.mxu1 }
 0x529   : > { %v1691_v52 = vmul.f32 0.25, %v1688_v51 }
 0x52b   : > { %v1692_v53 = vsel %vm1489_vm5, %v1691_v52, -inf }
 0x52c   : > { %1693 = vmax.xlane.f32.xlu0 %v1692_v53 }
 0x52f   : > { %v4761_v54 = vpop.f32.mrf.mxu3 }
 0x537   : > { %v1552_v55 = vpop.f32.mrf.mxu3 }
 0x538   : > { %v1555_v56 = vmul.f32 0.25, %v1552_v55 }
 0x53a   : > { %v1556_v57 = vsel %vm1489_vm5, %v1555_v56, -inf }
 0x53b   : > { %1557 = vmax.xlane.f32.xlu2 %v1556_v57 }
 0x53f   : > { %v1622_v63 = vpop.f32.mrf.mxu3 }
 0x540   : > { %v1625_v1 = vmul.f32 0.25, %v1622_v63  ;;  %v1976_v63 = vld [vmem:[%s5123_s5 + $0x10] sm:$0xff] }
 0x542   : > { %v1626_v4 = vsel %vm1489_vm5, %v1625_v1, -inf }
 0x553   : > { %1703 = vrot.lane.b32.xlu2 %v4739_v32, %s4250_s1 }
 0x59f   : > { %v1694_v58 = vpop.xlane.xlu0 %1693 }
 0x5a0   : > { %v1695_v59 = vsub.f32 %v1691_v52, %v1694_v58  ;;  %v1839_v58 = vld [vmem:[%s5122_s22 + $0x18] sm:$0xff] }
 0x5a1   : > { %1862 = vmatpush.msrb.mxu0 %v1839_v58 }
 0x5a2   : > { %v1696_v60 = vmul.f32 1.442695, %v1695_v59  ;;  %v1838_v59 = vld [vmem:[%s5122_s22 + $0x10] sm:$0xff] }
 0x5a3   : > { %1863 = vmatpush.msrb.mxu0 %v1838_v59 }
 0x5a4   : > { %3599 = vpow2.f32 %v1696_v60  ;;  %v1837_v60 = vld [vmem:[%s5122_s22 + $0x8] sm:$0xff] }
 0x5a5   : > { %1864 = vmatpush.msrb.mxu0 %v1837_v60 }
 0x5aa   : > { %v3600_v61 = vpop.eup %3599 }
 0x5ab   : > { %v1698_v62 = vsel %vm1489_vm5, %v3600_v61, 0.0 }
 0x5ac   : > { %1699 = vadd.xlane.f32.xlu1 %v1698_v62  ;;  %v1977_v62 = vld [vmem:[%s5123_s5 + $0x18] sm:$0xff] }
 0x5ae   : > { %v1558_v0 = vpop.xlane.xlu2 %1557 }
 0x5af   : > { %v1559_v2 = vsub.f32 %v1555_v56, %v1558_v0  ;;  %v1975_v0 = vld [vmem:[%s5123_s5 + $0x8] sm:$0xff] }
 0x5b1   : > { %v1560_v3 = vmul.f32 1.442695, %v1559_v2 }
 0x5b3   : > { %3601 = vpow2.f32 %v1560_v3  ;;  %v1974_v3 = vld [vmem:[%s5123_s5] sm:$0xff] }
 0x5b4   : > { %1627 = vmax.xlane.f32.xlu1 %v1626_v4 }
 0x5b6   : > { %v1704_v5 = vpop.permute.xlu2 %1703 }
 0x5b7   : > { %1724 = vmatpush.msrb.mxu3 %v1704_v5 }
 0x5b9   : > { %v3602_v6 = vpop.eup %3601  ;;  %3351 = vmatpush.msra.mxu3 %v1839_v58 }
 0x5ba   : > { %v1562_v7 = vsel %vm1489_vm5, %v3602_v6, 0.0 }
 0x5bb   : > { %3352 = vmatpush.msra.mxu3 %v1838_v59 }
 0x5bc   : > { %1563 = vadd.xlane.f32.xlu1 %v1562_v7 }
 0x5bd   : > { %3353 = vmatpush.msra.mxu3 %v1837_v60 }
 0x5d5   : > { %1567 = vrot.lane.b32.xlu1 %v4729_v30, %s4250_s1  ;;  %v1737_v30 = vld [vmem:[%s5120_s28 + $0x18] sm:$0xff] }
 0x61f   : > { %v1700_v8 = vpop.xlane.xlu1 %1699 }
 0x620   : > { %3603 = vrcp.f32 %v1700_v8 }
 0x626   : > { %v3604_v9 = vpop.eup %3603 }
 0x627   : > { %v1702_v10 = vmul.f32 %v3604_v9, %v3600_v61  ;;  %v1628_v11 = vpop.xlane.xlu1 %1627  ;;  %v1836_v61 = vld [vmem:[%s5122_s22] sm:$0xff] }
 0x628   : > { %v1629_v12 = vsub.f32 %v1625_v1, %v1628_v11  ;;  %3354 = vmatpush.msra.mxu3 %v1836_v61  ;;  %1865 = vmatpush.msrb.mxu0 %v1836_v61  ;;  %v4807_v11 = vld [vmem:[%s5124_s11] ss:$0 sm:$0xff]  ;;  %s5127_s11 = sld [smem:[#allocation46_spill]] }
 0x629   : > { %3300 = vmatmul.msk.f32.vlgmr.msrb.gmra.mxu3 %vm1489_vm5, %v1702_v10 }
 0x62a   : > { %v1630_v15 = vmul.f32 1.442695, %v1629_v12  ;;  %1994 = vmatpush.msrb.mxu3 %v1977_v62 }
 0x62c   : > { %3605 = vpow2.f32 %v1630_v15  ;;  %1995 = vmatpush.msrb.mxu3 %v1976_v63 }
 0x62e   : > { %1996 = vmatpush.msrb.mxu3 %v1975_v0 }
 0x62f   : > { %v1564_v18 = vpop.xlane.xlu1 %1563 }
 0x630   : > { %3607 = vrcp.f32 %v1564_v18  ;;  %1997 = vmatpush.msrb.mxu3 %v1974_v3 }
 0x632   : > { %v3606_v16 = vpop.eup %3605 }
 0x633   : > { %v1632_v17 = vsel %vm1489_vm5, %v3606_v16, 0.0 }
 0x634   : > { %1633 = vadd.xlane.f32.xlu0 %v1632_v17 }
 0x636   : > { %v3608_v19 = vpop.eup %3607 }
 0x637   : > { %v1566_v21 = vmul.f32 %v3608_v19, %v3602_v6 }
 0x647   : > { %v1568_v20 = vpop.permute.xlu1 %1567 }
 0x648   : > { %1637 = vrot.lane.b32.xlu0 %v4739_v32, %s4247_s18  ;;  %1588 = vmatpush.msrb.mxu2 %v1568_v20  ;;  %v1735_v32 = vld [vmem:[%s5120_s28 + $0x8] sm:$0xff]  ;;  %v3578_v20 = vld [vmem:[#allocation2] ss:$0 sm:$0xff] }
 0x649   : > { %3294 = vmatmul.msk.f32.vlgmr.msrb.gmra.mxu2 %vm1489_vm5, %v1566_v21 }
 0x6a7   : > { %v1634_v23 = vpop.xlane.xlu0 %1633 }
 0x6a8   : > { %3609 = vrcp.f32 %v1634_v23 }
 0x6a9   : > { %3611 = vrcp.f32 %v4252_v46 }
 0x6ac   : > { %v1726_v22 = vpop.f32.mrf.mxu3 }
 0x6ad   : > { %1730 = vrot.lane.b32.xlu2 %v1726_v22, %s5083_s26 }
 0x6ae   : > { %v3610_v25 = vpop.eup %3609 }
 0x6af   : > { %v1636_v26 = vmul.f32 %v3610_v25, %v3606_v16  ;;  %v3612_v47 = vpop.eup %3611  ;;  %v4810_v16 = vld [vmem:[%s5125_s15] ss:$0 sm:$0xff]  ;;  %s5126_s15 = sld [smem:[#allocation47_spill]] }
 0x6b0   : > { %v1780_v48 = vmul.f32 32.0, %v3612_v47  ;;  %vm1784_vm6 = vweird.f32 %v3612_v47 }
 0x6b2   : > { %v1781_v49 = vsub.f32 1.0, %v1780_v48 }
 0x6b4   : > { %v1782_v50 = vmul.f32 %v3612_v47, %v1781_v49 }
 0x6b5   : > { %v1882_v3 = vld [vmem:[%s5126_s15 + $0x38] sm:$0xff] }
 0x6b6   : > { %v1783_v51 = vadd.f32 %v3612_v47, %v1782_v50  ;;  %1901 = vmatpush.msra.mxu1 %v1882_v3 }
 0x6b8   : > { %v4793_v52 = vsel %vm1784_vm6, %v3612_v47, %v1783_v51 }
 0x6ba   : > { %v1638_v28 = vpop.permute.xlu0 %1637 }
 0x6bb   : > { %1658 = vmatpush.msra.mxu2 %v1638_v28 }
 0x6bc   : > { %3297 = vmatmul.msk.f32.vlgmr.msra.gmra.mxu2 %vm1489_vm5, %v1636_v26 }
 0x6bd   : > { %1760 = vmatpush.msrb.mxu2 %v1737_v30 }
 0x6bf   : > { %1761 = vmatpush.msrb.mxu2 %v1736_v31 }
 0x6c1   : > { %1762 = vmatpush.msrb.mxu2 %v1735_v32 }
 0x6c3   : > { %1763 = vmatpush.msrb.mxu2 %v1734_v33 }
 0x6cc   : > { %v1590_v29 = vpop.f32.mrf.mxu2 }
 0x6cd   : > { %1594 = vrot.lane.b32.xlu1 %v1590_v29, %s5083_s26 }
 0x707   : > { %v1731_v37 = vpop.permute.xlu2 %1730 }
 0x73f   : > { %v1595_v34 = vpop.permute.xlu1 %1594  ;;  %v1660_v36 = vpop.f32.mrf.mxu2 }
 0x740   : > { %v1597_v35 = vsel %vm1463_vm4, %v4761_v54, %v1595_v34  ;;  %v1733_v38 = vsel %vm1463_vm4, %v1660_v36, %v1731_v37  ;;  %v4849_v34 = vshrl.u32 %v1368_v13, 7 }
 0x741   : > { %3301 = vmatmul.msk.f32.vlgmr.msrb.gmra.mxu2 %vm1430_vm3, %v1597_v35 }
 0x742   : > { %vm2035_vm10 = vcmp.le.s32.totalorder %v4710_v14, %v4849_v34 }
 0x749   : > { %3302 = vmatmul.msk.f32.gmra.mxu2 %vm1430_vm3, %v1733_v38 }
 0x7c4   : > { %v1765_v40 = vpop.f32.mrf.mxu2 }
 0x7c5   : > { %v4789_v41 = vadd.f32 %v3574_v39, %v1765_v40 }
 0x7c7   : > { %v1771_v26 = vadd.f32 %v4789_v41, %v4719_v24 }
 0x7c9   : > { %v1773_v28 = vsel %vm1430_vm3, %v1771_v26, 0.0 }
 0x7cc   : > { %v1768_v42 = vpop.f32.mrf.mxu2 }
 0x7cd   : > { %v1769_v43 = vadd.f32 %v3574_v39, %v1768_v42 }
 0x7cf   : > { %v1772_v44 = vadd.f32 %v1769_v43, %v4724_v27 }
 0x7d1   : > { %v1776_v45 = vsel %vm1430_vm3, %v1772_v44, 0.0 }
 0x7d2   : > { %1777 = vadd.xlane.f32.xlu1 %v1776_v45 }
 0x845   : > { %v1778_v53 = vpop.xlane.xlu1 %1777 }
 0x846   : > { %v1787_v54 = vmul.f32 %v4793_v52, %v1778_v53 }
 0x848   : > { %v1789_v55 = vsub.f32 %v1772_v44, %v1787_v54 }
 0x84a   : > { %v1791_v56 = vmul.f32 %v1789_v55, %v1789_v55 }
 0x84c   : > { %v1795_v57 = vsel %vm1430_vm3, %v1791_v56, 0.0 }
 0x84d   : > { %1796 = vadd.xlane.f32.xlu2 %v1795_v57 }
 0x8c0   : > { %v1797_v1 = vpop.xlane.xlu2 %1796 }
 0x8c1   : > { %v1799_v2 = vmul.f32 %v1797_v1, %v4793_v52 }
 0x8c3   : > { %v1801_v4 = vadd.f32 1e-05, %v1799_v2 }
 0x8c5   : > { %3613 = vrsqrt.f32 %v1801_v4  ;;  %vm1818_vm8 = vweird.f32 %v1801_v4 }
 0x8cb   : > { %v3614_v5 = vpop.eup %3613 }
 0x8cc   : > { %v1813_v6 = vmul.f32 %v3614_v5, %v1801_v4  ;;  %vm1819_vm7 = vweird.f32 %v3614_v5  ;;  %v1881_v4 = vld [vmem:[%s5126_s15 + $0x30] sm:$0xff] }
 0x8cd   : > { %vm1820_vm9 = vmor %vm1818_vm8, %vm1819_vm7  ;;  %1902 = vmatpush.msra.mxu1 %v1881_v4 }
 0x8ce   : > { %v1814_v7 = vmul.f32 %v3614_v5, %v1813_v6  ;;  %v1879_v6 = vld [vmem:[%s5126_s15 + $0x20] sm:$0xff] }
 0x8d0   : > { %v1815_v8 = vmul.f32 0.5, %v1814_v7  ;;  %v1878_v7 = vld [vmem:[%s5126_s15 + $0x18] sm:$0xff] }
 0x8d2   : > { %v1816_v9 = vsub.f32 1.5, %v1815_v8 }
 0x8d4   : > { %v1817_v10 = vmul.f32 %v3614_v5, %v1816_v9 }
 0x8d6   : > { %v1821_v12 = vsel %vm1820_vm9, %v3614_v5, %v1817_v10  ;;  %v1880_v5 = vld [vmem:[%s5126_s15 + $0x28] sm:$0xff] }
 0x8d7   : > { %v1823_v15 = vmul.f32 %v1821_v12, %v1789_v55  ;;  %1903 = vmatpush.msra.mxu1 %v1880_v5 }
 0x8d9   : > { %v1829_v17 = vmul.f32 %v4807_v11, %v1823_v15  ;;  %1904 = vmatpush.msra.mxu1 %v1879_v6 }
 0x8db   : > { %v4814_v18 = vadd.f32 %v4810_v16, %v1829_v17  ;;  %1905 = vmatpush.msra.mxu1 %v1878_v7 }
 0x8dd   : > { %3304 = vmatmul.msk.f32.vlgmr.msra.gmra.mxu3 %vm1430_vm3, %v4814_v18 }
 0x8e5   : > { %3307 = vmatmul.msk.f32.vlgmr.msrb.gmra.mxu3 %vm1430_vm3, %v4719_v24 }
 0x8ed   : > { %3308 = vmatmul.msk.f32.gmra.mxu3 %vm1430_vm3, %v4724_v27 }
 0x960   : > { %v4822_v19 = vpop.f32.mrf.mxu3 }
 0x968   : > { %v1999_v21 = vpop.f32.mrf.mxu3 }
 0x969   : > { %v4824_v22 = vadd.f32 %v3578_v20, %v1999_v21  ;;  %v1876_v21 = vld [vmem:[%s5126_s15 + $0x8] sm:$0xff] }
 0x96b   : > { %2076 = vrot.lane.b32.xlu2 %v4824_v22, %s4246_s3  ;;  %2006 = vrot.lane.b32.xlu0 %v4824_v22, %s4248_s2 }
 0x970   : > { %v2002_v23 = vpop.f32.mrf.mxu3 }
 0x971   : > { %v4830_v25 = vadd.f32 %v3578_v20, %v2002_v23  ;;  %v1877_v20 = vld [vmem:[%s5126_s15 + $0x10] sm:$0xff]  ;;  %v1875_v23 = vld [vmem:[%s5126_s15] sm:$0xff] }
 0x972   : > { %1906 = vmatpush.msra.mxu1 %v1877_v20 }
 0x973   : > { %2212 = vrot.lane.b32.xlu2 %v4830_v25, %s4249_s7 }
 0x974   : > { %1907 = vmatpush.msra.mxu1 %v1876_v21 }
 0x976   : > { %1908 = vmatpush.msra.mxu1 %v1875_v23 }
 0x995   : > { %1774 = vadd.xlane.f32.xlu0 %v1773_v28 }
 0x9a9   : > { %2214 = vrot.lane.b32.xlu0 %v4830_v25, %s4246_s3 }
 0x9b1   : > { %2048 = vrot.lane.b32.xlu0 %v4824_v22, %s4247_s18 }
 0x9b9   : > { %2147 = vrot.lane.b32.xlu0 %v4830_v25, %s4248_s2 }
 0x9c5   : > { %v2077_v29 = vpop.permute.xlu2 %2076 }
 0x9c6   : > { %3312 = vmatpush.xpose.msk.msra.mxu3 %vm1463_vm4, %v2077_v29 }
 0x9cd   : > { %v2213_v48 = vpop.permute.xlu2 %2212 }
 0x9dd   : > { %v2007_v30 = vpop.permute.xlu0 %2006 }
 0x9de   : > { %3309 = vmatpush.xpose.msk.msra.mxu2 %vm1463_vm4, %v2007_v30 }
 0x9e1   : > { %3310 = vmatmul.msk.f32.vlgmr.msra.gmra.mxu2 %vm1463_vm4, %v4824_v22 }
 0xa08   : > { %v1775_v31 = vpop.xlane.xlu0 %1774 }
 0xa09   : > { %v1786_v39 = vmul.f32 %v4793_v52, %v1775_v31 }
 0xa0b   : > { %v1788_v40 = vsub.f32 %v1771_v26, %v1786_v39  ;;  %v3577_v26 = vld [vmem:[%s5127_s11] ss:$0 sm:$0xff]  ;;  %s5128_s11 = sld [smem:[#allocation48_spill]] }
 0xa0c   : > { %v1871_v31 = vadd.f32 %v3577_v26, %v4822_v19 }
 0xa0d   : > { %v1790_v13 = vmul.f32 %v1788_v40, %v1788_v40 }
 0xa0f   : > { %v1792_v41 = vsel %vm1430_vm3, %v1790_v13, 0.0 }
 0xa11   : > { %v3579_v34 = vld [vmem:[%s5128_s11] ss:$0 sm:$0xff]  ;;  %s5131_s11 = sld [smem:[#allocation49_spill]] }
 0xa1b   : > { %v2215_v32 = vpop.permute.xlu0 %2214 }
 0xa1c   : > { %3318 = vmatpush.xpose.msk.msrb.mxu3 %vm1463_vm4, %v2215_v32  ;;  %v1874_v32 = vmax.f32 %v1871_v31, 0.0 }
 0xa23   : > { %v2049_v33 = vpop.permute.xlu0 %2048 }
 0xa24   : > { %2069 = vmatpush.msra.mxu0 %v2049_v33 }
 0xa2b   : > { %v2148_v63 = vpop.permute.xlu0 %2147 }
 0xa64   : > { %v2029_v35 = vpop.f32.mrf.mxu2 }
 0xa65   : > { %v2032_v36 = vmul.f32 0.25, %v2029_v35 }
 0xa67   : > { %v2036_v37 = vsel %vm2035_vm10, %v2032_v36, -1e+30 }
 0xa68   : > { %v2037_v38 = vsel %vm1489_vm5, %v2036_v37, -inf }
 0xa69   : > { %2038 = vmax.xlane.f32.xlu1 %v2037_v38 }
 0xa82   : > { %2074 = vrot.lane.b32.xlu1 %v4824_v22, %s4249_s7 }
 0xaac   : > { %1793 = vadd.xlane.f32.xlu1 %v1792_v41 }
 0xadc   : > { %v2039_v42 = vpop.xlane.xlu1 %2038 }
 0xadd   : > { %v2040_v43 = vsub.f32 %v2036_v37, %v2039_v42 }
 0xadf   : > { %v2041_v44 = vmul.f32 1.442695, %v2040_v43 }
 0xae1   : > { %3615 = vpow2.f32 %v2041_v44 }
 0xae7   : > { %v3616_v45 = vpop.eup %3615 }
 0xae8   : > { %v2043_v46 = vsel %vm1489_vm5, %v3616_v45, 0.0 }
 0xae9   : > { %2044 = vadd.xlane.f32.xlu2 %v2043_v46 }
 0xaf4   : > { %v2075_v47 = vpop.permute.xlu1 %2074 }
 0xaf5   : > { %3313 = vmatmul.msk.f32.vlgmr.msra.gmra.mxu3 %vm1463_vm4, %v2075_v47 }
 0xafd   : > { %3319 = vmatmul.msk.f32.vlgmr.msrb.gmra.mxu3 %vm1463_vm4, %v2213_v48 }
 0xb1f   : > { %v1794_v49 = vpop.xlane.xlu1 %1793 }
 0xb20   : > { %v1798_v50 = vmul.f32 %v1794_v49, %v4793_v52 }
 0xb22   : > { %v1800_v51 = vadd.f32 1e-05, %v1798_v50 }
 0xb24   : > { %3617 = vrsqrt.f32 %v1800_v51  ;;  %vm1808_vm12 = vweird.f32 %v1800_v51 }
 0xb2a   : > { %v3618_v53 = vpop.eup %3617 }
 0xb2b   : > { %v1803_v54 = vmul.f32 %v3618_v53, %v1800_v51  ;;  %vm1809_vm11 = vweird.f32 %v3618_v53 }
 0xb2c   : > { %vm1810_vm13 = vmor %vm1808_vm12, %vm1809_vm11 }
 0xb2d   : > { %v1804_v55 = vmul.f32 %v3618_v53, %v1803_v54 }
 0xb2f   : > { %v1805_v56 = vmul.f32 0.5, %v1804_v55 }
 0xb31   : > { %v1806_v57 = vsub.f32 1.5, %v1805_v56 }
 0xb33   : > { %v1807_v58 = vmul.f32 %v3618_v53, %v1806_v57 }
 0xb35   : > { %v1811_v59 = vsel %vm1810_vm13, %v3618_v53, %v1807_v58 }
 0xb36   : > { %v1822_v60 = vmul.f32 %v1811_v59, %v1788_v40 }
 0xb38   : > { %v1828_v61 = vmul.f32 %v4807_v11, %v1822_v60 }
 0xb3a   : > { %v4867_v62 = vadd.f32 %v4810_v16, %v1828_v61 }
 0xb3c   : > { %3303 = vmatmul.msk.f32.vlgmr.msrb.gmra.mxu0 %vm1430_vm3, %v4867_v62 }
 0xb3d   : > { %3315 = vmatpush.xpose.msk.msrb.mxu0 %vm1463_vm4, %v2148_v63 }
 0xb5c   : > { %v2045_v0 = vpop.xlane.xlu2 %2044 }
 0xb5d   : > { %3619 = vrcp.f32 %v2045_v0 }
 0xb63   : > { %v3620_v1 = vpop.eup %3619 }
 0xb64   : > { %v2047_v2 = vmul.f32 %v3620_v1, %v3616_v45 }
 0xb66   : > { %3311 = vmatmul.msk.f32.vlgmr.msra.gmra.mxu0 %vm1489_vm5, %v2047_v2 }
 0xb6e   : > { %3316 = vmatmul.msk.f32.vlgmr.msrb.gmra.mxu0 %vm1463_vm4, %v4830_v25 }
 0xb78   : > { %v2099_v8 = vpop.f32.mrf.mxu3 }
 0xb79   : > { %v2102_v9 = vmul.f32 0.25, %v2099_v8 }
 0xb7b   : > { %v2103_v10 = vsel %vm2035_vm10, %v2102_v9, -1e+30 }
 0xb7c   : > { %v2104_v11 = vsel %vm1489_vm5, %v2103_v10, -inf }
 0xb7d   : > { %2105 = vmax.xlane.f32.xlu0 %v2104_v11 }
 0xb80   : > { %v2237_v12 = vpop.f32.mrf.mxu3 }
 0xb81   : > { %v2240_v15 = vmul.f32 0.25, %v2237_v12 }
 0xb83   : > { %v2241_v16 = vsel %vm2035_vm10, %v2240_v15, -1e+30 }
 0xb84   : > { %v2242_v17 = vsel %vm1489_vm5, %v2241_v16, -inf }
 0xb85   : > { %2243 = vmax.xlane.f32.xlu1 %v2242_v17 }
 0xbb9   : > { %v1867_v28 = vpop.f32.mrf.mxu0 }
 0xbba   : > { %v1868_v29 = vadd.f32 %v3577_v26, %v1867_v28 }
 0xbbc   : > { %v1873_v30 = vmax.f32 %v1868_v29, 0.0  ;;  %v3580_v29 = vld [vmem:[#allocation4] ss:$0 sm:$0xff] }
 0xbbe   : > { %3305 = vmatmul.msk.f32.vlgmr.msra.gmra.mxu1 %vm1392_vm0, %v1873_v30 }
 0xbc6   : > { %3306 = vmatmul.msk.f32.gmra.mxu1 %vm1392_vm0, %v1874_v32 }
 0xbe3   : > { %v4895_v33 = vpop.f32.mrf.mxu0 }
 0xbeb   : > { %v2170_v35 = vpop.f32.mrf.mxu0 }
 0xbec   : > { %v2173_v36 = vmul.f32 0.25, %v2170_v35 }
 0xbee   : > { %v2174_v37 = vsel %vm2035_vm10, %v2173_v36, -1e+30 }
 0xbef   : > { %v2175_v38 = vsel %vm1489_vm5, %v2174_v37, -inf }
 0xbf0   : > { %2176 = vmax.xlane.f32.xlu1 %v2175_v38  ;;  %v2106_v39 = vpop.xlane.xlu0 %2105 }
 0xbf1   : > { %v2107_v40 = vsub.f32 %v2103_v10, %v2106_v39 }
 0xbf3   : > { %v2108_v13 = vmul.f32 1.442695, %v2107_v40 }
 0xbf5   : > { %3621 = vpow2.f32 %v2108_v13 }
 0xbf8   : > { %v2244_v19 = vpop.xlane.xlu1 %2243 }
 0xbf9   : > { %v2245_v41 = vsub.f32 %v2241_v16, %v2244_v19 }
 0xbfb   : > { %v3622_v42 = vpop.eup %3621  ;;  %v2246_v43 = vmul.f32 1.442695, %v2245_v41 }
 0xbfc   : > { %v2110_v44 = vsel %vm1489_vm5, %v3622_v42, 0.0 }
 0xbfd   : > { %3623 = vpow2.f32 %v2246_v43  ;;  %2111 = vadd.xlane.f32.xlu2 %v2110_v44 }
 0xc03   : > { %v3624_v45 = vpop.eup %3623 }
 0xc04   : > { %v2248_v14 = vsel %vm1489_vm5, %v3624_v45, 0.0 }
 0xc05   : > { %2249 = vadd.xlane.f32.xlu2 %v2248_v14 }
 0xc09   : > { %2115 = vrot.lane.b32.xlu1 %v4824_v22, %s4250_s1 }
 0xc1d   : > { %2253 = vrot.lane.b32.xlu2 %v4830_v25, %s4250_s1  ;;  %s5129_s1 = sld [smem:[#allocation52_spill]] }
 0xc23   : > { %v2287_v8 = vld [vmem:[%s5129_s1 + $0x18] sm:$0xff]  ;;  %v2286_v9 = vld [vmem:[%s5129_s1 + $0x10] sm:$0xff]  ;;  %v2285_v10 = vld [vmem:[%s5129_s1 + $0x8] sm:$0xff] }
 0xc24   : > { %2310 = vmatpush.msra.mxu0 %v2287_v8  ;;  %v2284_v11 = vld [vmem:[%s5129_s1] sm:$0xff] }
 0xc26   : > { %2311 = vmatpush.msra.mxu0 %v2286_v9 }
 0xc28   : > { %2312 = vmatpush.msra.mxu0 %v2285_v10 }
 0xc2a   : > { %2313 = vmatpush.msra.mxu0 %v2284_v11 }
 0xc3b   : > { %v1910_v46 = vpop.f32.mrf.mxu1 }
 0xc3c   : > { %v1911_v47 = vadd.f32 %v3579_v34, %v1910_v46 }
 0xc43   : > { %v1913_v61 = vpop.f32.mrf.mxu1 }
 0xc44   : > { %v1914_v63 = vadd.f32 %v3579_v34, %v1913_v61 }
 0xc46   : > { %v1917_v0 = vadd.f32 %v1914_v63, %v4814_v18  ;;  %v1916_v18 = vadd.f32 %v1911_v47, %v4867_v62 }
 0xc48   : > { %v1921_v1 = vsel %vm1430_vm3, %v1917_v0, 0.0  ;;  %v1918_v7 = vsel %vm1430_vm3, %v1916_v18, 0.0 }
 0xc63   : > { %v2177_v48 = vpop.xlane.xlu1 %2176 }
 0xc64   : > { %v2178_v49 = vsub.f32 %v2174_v37, %v2177_v48 }
 0xc66   : > { %v2179_v50 = vmul.f32 1.442695, %v2178_v49 }
 0xc68   : > { %3625 = vpow2.f32 %v2179_v50 }
 0xc6e   : > { %v3626_v51 = vpop.eup %3625 }
 0xc6f   : > { %v2181_v53 = vsel %vm1489_vm5, %v3626_v51, 0.0 }
 0xc70   : > { %2182 = vadd.xlane.f32.xlu0 %v2181_v53  ;;  %v2112_v54 = vpop.xlane.xlu2 %2111 }
 0xc71   : > { %3627 = vrcp.f32 %v2112_v54 }
 0xc77   : > { %v3628_v55 = vpop.eup %3627 }
 0xc78   : > { %v2250_v56 = vpop.xlane.xlu2 %2249  ;;  %v2114_v22 = vmul.f32 %v3628_v55, %v3622_v42 }
 0xc79   : > { %3629 = vrcp.f32 %v2250_v56 }
 0xc7b   : > { %v2116_v57 = vpop.permute.xlu1 %2115 }
 0xc7c   : > { %2136 = vmatpush.msrb.mxu2 %v2116_v57 }
 0xc7d   : > { %3314 = vmatmul.msk.f32.vlgmr.msrb.gmra.mxu2 %vm1489_vm5, %v2114_v22 }
 0xc7f   : > { %v3630_v58 = vpop.eup %3629 }
 0xc80   : > { %v2254_v59 = vpop.permute.xlu2 %2253  ;;  %v2252_v60 = vmul.f32 %v3630_v58, %v3624_v45 }
 0xc81   : > { %2274 = vmatpush.msra.mxu2 %v2254_v59 }
 0xc84   : > { %2186 = vrot.lane.b32.xlu0 %v4830_v25, %s4247_s18  ;;  %s5130_s18 = sld [smem:[#allocation54_spill]] }
 0xc85   : > { %3320 = vmatmul.msk.f32.vlgmr.msra.gmra.mxu2 %vm1489_vm5, %v2252_v60 }
 0xc8a   : > { %v2418_v42 = vld [vmem:[%s5130_s18 + $0x10] sm:$0xff]  ;;  %v2417_v43 = vld [vmem:[%s5130_s18 + $0x8] sm:$0xff]  ;;  %v2416_v44 = vld [vmem:[%s5130_s18] sm:$0xff] }
 0xcae   : > { %1922 = vadd.xlane.f32.xlu0 %v1921_v1 }
 0xce3   : > { %v2183_v2 = vpop.xlane.xlu0 %2182 }
 0xce4   : > { %3631 = vrcp.f32 %v2183_v2 }
 0xcea   : > { %v3632_v3 = vpop.eup %3631 }
 0xceb   : > { %v2185_v4 = vmul.f32 %v3632_v3, %v3626_v51  ;;  %v3581_v51 = vld [vmem:[%s5131_s11] ss:$0 sm:$0xff]  ;;  %s5137_s11 = sshll.u32 %s5140_s10, 4 }
 0xcf6   : > { %v2187_v5 = vpop.permute.xlu0 %2186 }
 0xcf7   : > { %2207 = vmatpush.msrb.mxu1 %v2187_v5 }
 0xcf8   : > { %3317 = vmatmul.msk.f32.vlgmr.msrb.gmra.mxu1 %vm1489_vm5, %v2185_v4 }
 0xd00   : > { %v2138_v25 = vpop.f32.mrf.mxu2 }
 0xd01   : > { %2142 = vrot.lane.b32.xlu1 %v2138_v25, %s5083_s26 }
 0xd08   : > { %v2276_v6 = vpop.f32.mrf.mxu2 }
 0xd09   : > { %2280 = vrot.lane.b32.xlu2 %v2276_v6, %s5083_s26  ;;  %s5132_s26 = sld [smem:[#allocation50_spill]] }
 0xd0f   : > { %v3582_v55 = vld [vmem:[%s5132_s26] ss:$0 sm:$0xff]  ;;  %s5133_s26 = sld [smem:[#allocation53_spill]] }
 0xd21   : > { %v1923_v30 = vpop.xlane.xlu0 %1922 }
 0xd22   : > { %v1925_v32 = vmul.f32 %v1923_v30, %v4793_v52 }
 0xd24   : > { %v4933_v36 = vsub.f32 %v1917_v0, %v1925_v32 }
 0xd26   : > { %v1929_v40 = vmul.f32 %v4933_v36, %v4933_v36 }
 0xd28   : > { %v1933_v41 = vsel %vm1430_vm3, %v1929_v40, 0.0 }
 0xd2b   : > { %1919 = vadd.xlane.f32.xlu1 %v1918_v7 }
 0xd63   : > { %v2281_v17 = vpop.permute.xlu2 %2280 }
 0xd73   : > { %v2143_v12 = vpop.permute.xlu1 %2142 }
 0xd74   : > { %v2145_v15 = vsel %vm1463_vm4, %v4895_v33, %v2143_v12 }
 0xd75   : > { %3321 = vmatmul.msk.f32.vlgmr.msra.gmra.mxu0 %vm1430_vm3, %v2145_v15  ;;  %v2209_v16 = vpop.f32.mrf.mxu1 }
 0xd76   : > { %v2283_v62 = vsel %vm1463_vm4, %v2209_v16, %v2281_v17  ;;  %v3583_v17 = vld [vmem:[#allocation10] ss:$0 sm:$0xff] }
 0xd7d   : > { %3322 = vmatmul.msk.f32.gmra.mxu0 %vm1430_vm3, %v2283_v62 }
 0xd9e   : > { %v1920_v20 = vpop.xlane.xlu1 %1919 }
 0xd9f   : > { %v1924_v21 = vmul.f32 %v1920_v20, %v4793_v52 }
 0xda1   : > { %v1926_v23 = vsub.f32 %v1916_v18, %v1924_v21  ;;  %v2382_v21 = vld [vmem:[%s5133_s26 + $0x18] sm:$0xff] }
 0xda2   : > { %2405 = vmatpush.msra.mxu1 %v2382_v21 }
 0xda3   : > { %v1928_v26 = vmul.f32 %v1926_v23, %v1926_v23 }
 0xda5   : > { %v1930_v28 = vsel %vm1430_vm3, %v1928_v26, 0.0  ;;  %v2380_v26 = vld [vmem:[%s5133_s26 + $0x8] sm:$0xff] }
 0xda6   : > { %1931 = vadd.xlane.f32.xlu0 %v1930_v28  ;;  %v2379_v28 = vld [vmem:[%s5133_s26] sm:$0xff] }
 0xdf2   : > { %v2315_v31 = vpop.f32.mrf.mxu0 }
 0xdf3   : > { %v2316_v33 = vadd.f32 %v3580_v29, %v2315_v31 }
 0xdf5   : > { %v2321_v35 = vadd.f32 %v2316_v33, %v4719_v24  ;;  %v2419_v24 = vld [vmem:[%s5130_s18 + $0x18] sm:$0xff] }
 0xdf6   : > { %2442 = vmatpush.msra.mxu3 %v2419_v24  ;;  %v3584_v24 = vld [vmem:[#allocation6] ss:$0 sm:$0xff] }
 0xdf7   : > { %v2323_v37 = vsel %vm1430_vm3, %v2321_v35, 0.0 }
 0xdf8   : > { %2324 = vadd.xlane.f32.xlu2 %v2323_v37  ;;  %2443 = vmatpush.msra.mxu3 %v2418_v42 }
 0xdfa   : > { %v2318_v38 = vpop.f32.mrf.mxu0  ;;  %2444 = vmatpush.msra.mxu3 %v2417_v43 }
 0xdfb   : > { %v2319_v39 = vadd.f32 %v3580_v29, %v2318_v38 }
 0xdfc   : > { %2445 = vmatpush.msra.mxu3 %v2416_v44 }
 0xdfd   : > { %v2322_v13 = vadd.f32 %v2319_v39, %v4724_v27 }
 0xdff   : > { %v2326_v19 = vsel %vm1430_vm3, %v2322_v13, 0.0 }
 0xe00   : > { %2327 = vadd.xlane.f32.xlu1 %v2326_v19  ;;  %1934 = vadd.xlane.f32.xlu2 %v1933_v41 }
 0xe19   : > { %v1932_v45 = vpop.xlane.xlu0 %1931 }
 0xe1a   : > { %v1936_v14 = vmul.f32 %v1932_v45, %v4793_v52  ;;  %v3585_v45 = vld [vmem:[#allocation7] ss:$0 sm:$0xff] }
 0xe1c   : > { %v1938_v27 = vadd.f32 1e-05, %v1936_v14 }
 0xe1e   : > { %3633 = vrsqrt.f32 %v1938_v27  ;;  %vm1946_vm15 = vweird.f32 %v1938_v27 }
 0xe24   : > { %v3634_v34 = vpop.eup %3633 }
 0xe25   : > { %v1941_v46 = vmul.f32 %v3634_v34, %v1938_v27  ;;  %vm1947_vm14 = vweird.f32 %v3634_v34 }
 0xe26   : > { %vm1948_vm1 = vmor %vm1946_vm15, %vm1947_vm14 }
 0xe27   : > { %v1942_v47 = vmul.f32 %v3634_v34, %v1941_v46 }
 0xe29   : > { %v1943_v48 = vmul.f32 0.5, %v1942_v47 }
 0xe2b   : > { %v1944_v49 = vsub.f32 1.5, %v1943_v48 }
 0xe2d   : > { %v1945_v50 = vmul.f32 %v3634_v34, %v1944_v49 }
 0xe2f   : > { %v1949_v53 = vsel %vm1948_vm1, %v3634_v34, %v1945_v50 }
 0xe30   : > { %v1960_v54 = vmul.f32 %v1949_v53, %v1926_v23  ;;  %v2381_v23 = vld [vmem:[%s5133_s26 + $0x10] sm:$0xff] }
 0xe31   : > { %2406 = vmatpush.msra.mxu1 %v2381_v23 }
 0xe32   : > { %v1966_v56 = vmul.f32 %v3581_v51, %v1960_v54 }
 0xe33   : > { %2407 = vmatpush.msra.mxu1 %v2380_v26 }
 0xe34   : > { %v1972_v22 = vadd.f32 %v3582_v55, %v1966_v56  ;;  %v3586_v56 = vld [vmem:[#allocation9] ss:$0 sm:$0xff] }
 0xe35   : > { %2408 = vmatpush.msra.mxu1 %v2379_v28 }
 0xe36   : > { %3325 = vmatmul.msk.f32.vlgmr.msra.gmra.mxu3 %vm1430_vm3, %v1972_v22 }
 0xe6b   : > { %v2325_v57 = vpop.xlane.xlu2 %2324 }
 0xe6c   : > { %v2329_v58 = vmul.f32 %v2325_v57, %v4793_v52 }
 0xe6e   : > { %v4950_v59 = vsub.f32 %v2321_v35, %v2329_v58 }
 0xe70   : > { %v2333_v60 = vmul.f32 %v4950_v59, %v4950_v59 }
 0xe72   : > { %v2335_v61 = vsel %vm1430_vm3, %v2333_v60, 0.0 }
 0xe73   : > { %2336 = vadd.xlane.f32.xlu1 %v2335_v61  ;;  %v2328_v63 = vpop.xlane.xlu1 %2327  ;;  %v1935_v0 = vpop.xlane.xlu2 %1934 }
 0xe74   : > { %v2330_v1 = vmul.f32 %v2328_v63, %v4793_v52  ;;  %v1937_v2 = vmul.f32 %v1935_v0, %v4793_v52 }
 0xe76   : > { %v4957_v3 = vsub.f32 %v2322_v13, %v2330_v1  ;;  %v1939_v4 = vadd.f32 1e-05, %v1937_v2 }
 0xe78   : > { %3635 = vrsqrt.f32 %v1939_v4  ;;  %v2334_v5 = vmul.f32 %v4957_v3, %v4957_v3  ;;  %vm1956_vm6 = vweird.f32 %v1939_v4 }
 0xe7a   : > { %v2338_v25 = vsel %vm1430_vm3, %v2334_v5, 0.0 }
 0xe7b   : > { %2339 = vadd.xlane.f32.xlu0 %v2338_v25 }
 0xe7e   : > { %v3636_v6 = vpop.eup %3635 }
 0xe7f   : > { %v1951_v18 = vmul.f32 %v3636_v6, %v1939_v4  ;;  %vm1957_vm2 = vweird.f32 %v3636_v6 }
 0xe80   : > { %vm1958_vm7 = vmor %vm1956_vm6, %vm1957_vm2 }
 0xe81   : > { %v1952_v7 = vmul.f32 %v3636_v6, %v1951_v18 }
 0xe83   : > { %v1953_v8 = vmul.f32 0.5, %v1952_v7 }
 0xe85   : > { %v1954_v9 = vsub.f32 1.5, %v1953_v8 }
 0xe87   : > { %v1955_v10 = vmul.f32 %v3636_v6, %v1954_v9 }
 0xe89   : > { %v1959_v11 = vsel %vm1958_vm7, %v3636_v6, %v1955_v10 }
 0xe8a   : > { %v1961_v12 = vmul.f32 %v1959_v11, %v4933_v36 }
 0xe8c   : > { %v1967_v15 = vmul.f32 %v3581_v51, %v1961_v12 }
 0xe8e   : > { %v1973_v16 = vadd.f32 %v3582_v55, %v1967_v15 }
 0xe90   : > { %3326 = vmatmul.msk.f32.gmra.mxu3 %vm1430_vm3, %v1973_v16 }
 0xeb9   : > { %v2447_v62 = vpop.f32.mrf.mxu3 }
 0xeba   : > { %v4964_v20 = vadd.f32 %v3583_v17, %v2447_v62 }
 0xebc   : > { %2519 = vrot.lane.b32.xlu2 %v4964_v20, %s4249_s7  ;;  %3327 = vmatpush.xpose.msk.msrb.mxu2 %vm1463_vm4, %v4964_v20 }
 0xee6   : > { %v2337_v29 = vpop.xlane.xlu1 %2336 }
 0xee7   : > { %v2341_v30 = vmul.f32 %v2337_v29, %v4793_v52 }
 0xee9   : > { %v2343_v31 = vadd.f32 1e-05, %v2341_v30 }
 0xeeb   : > { %3637 = vrsqrt.f32 %v2343_v31  ;;  %vm2351_vm9 = vweird.f32 %v2343_v31 }
 0xeee   : > { %v2340_v32 = vpop.xlane.xlu0 %2339 }
 0xeef   : > { %v2342_v33 = vmul.f32 %v2340_v32, %v4793_v52 }
 0xef1   : > { %v3638_v35 = vpop.eup %3637  ;;  %v2344_v36 = vadd.f32 1e-05, %v2342_v33 }
 0xef2   : > { %v2346_v37 = vmul.f32 %v3638_v35, %v2343_v31  ;;  %vm2352_vm8 = vweird.f32 %v3638_v35 }
 0xef3   : > { %3639 = vrsqrt.f32 %v2344_v36  ;;  %vm2353_vm10 = vmor %vm2351_vm9, %vm2352_vm8  ;;  %vm2361_vm12 = vweird.f32 %v2344_v36 }
 0xef4   : > { %v2347_v38 = vmul.f32 %v3638_v35, %v2346_v37 }
 0xef6   : > { %v2348_v39 = vmul.f32 0.5, %v2347_v38 }
 0xef8   : > { %v2349_v40 = vsub.f32 1.5, %v2348_v39 }
 0xef9   : > { %v3640_v13 = vpop.eup %3639 }
 0xefa   : > { %v2350_v19 = vmul.f32 %v3638_v35, %v2349_v40  ;;  %v2356_v41 = vmul.f32 %v3640_v13, %v2344_v36  ;;  %vm2362_vm11 = vweird.f32 %v3640_v13 }
 0xefb   : > { %vm2363_vm13 = vmor %vm2361_vm12, %vm2362_vm11 }
 0xefc   : > { %v2354_v42 = vsel %vm2353_vm10, %v3638_v35, %v2350_v19  ;;  %v2357_v43 = vmul.f32 %v3640_v13, %v2356_v41 }
 0xefd   : > { %v2365_v44 = vmul.f32 %v2354_v42, %v4950_v59 }
 0xefe   : > { %v2358_v14 = vmul.f32 0.5, %v2357_v43 }
 0xeff   : > { %v2371_v27 = vmul.f32 %v3584_v24, %v2365_v44 }
 0xf00   : > { %v2359_v34 = vsub.f32 1.5, %v2358_v14 }
 0xf01   : > { %v4977_v46 = vadd.f32 %v3585_v45, %v2371_v27 }
 0xf02   : > { %v2360_v47 = vmul.f32 %v3640_v13, %v2359_v34 }
 0xf03   : > { %3323 = vmatmul.msk.f32.vlgmr.msra.gmra.mxu1 %vm1430_vm3, %v4977_v46 }
 0xf04   : > { %v2364_v48 = vsel %vm2363_vm13, %v3640_v13, %v2360_v47 }
 0xf05   : > { %v2366_v49 = vmul.f32 %v2364_v48, %v4957_v3 }
 0xf07   : > { %v2372_v50 = vmul.f32 %v3584_v24, %v2366_v49 }
 0xf09   : > { %v4982_v51 = vadd.f32 %v3585_v45, %v2372_v50  ;;  %v2726_v50 = vld [vmem:[#allocation12 + $0x18] sm:$0xff] }
 0xf0b   : > { %3324 = vmatmul.msk.f32.gmra.mxu1 %vm1430_vm3, %v4982_v51 }
 0xf13   : > { %v2450_v53 = vpop.f32.mrf.mxu3 }
 0xf14   : > { %v4986_v54 = vadd.f32 %v3583_v17, %v2450_v53  ;;  %v2725_v53 = vld [vmem:[#allocation12 + $0x10] sm:$0xff] }
 0xf16   : > { %2654 = vrot.lane.b32.xlu0 %v4986_v54, %s4249_s7  ;;  %3333 = vmatpush.xpose.msk.msrb.mxu3 %vm1463_vm4, %v4986_v54  ;;  %v2520_v55 = vpop.permute.xlu2 %2519 }
 0xf17   : > { %3330 = vmatpush.xpose.msk.msrb.mxu0 %vm1463_vm4, %v2520_v55 }
 0xf1a   : > { %2749 = vmatpush.msra.mxu3 %v2726_v50 }
 0xf1c   : > { %2750 = vmatpush.msra.mxu3 %v2725_v53 }
 0xf80   : > { %v2410_v22 = vpop.f32.mrf.mxu1 }
 0xf81   : > { %v2411_v57 = vadd.f32 %v3586_v56, %v2410_v22 }
 0xf83   : > { %2517 = vrot.lane.b32.xlu1 %v2411_v57, %s4249_s7  ;;  %3328 = vmatmul.msk.f32.vlgmr.msrb.gmra.mxu2 %vm1463_vm4, %v2411_v57 }
 0xf88   : > { %v2413_v58 = vpop.f32.mrf.mxu1  ;;  %v2655_v59 = vpop.permute.xlu0 %2654 }
 0xf89   : > { %v2414_v60 = vadd.f32 %v3586_v56, %v2413_v58  ;;  %3336 = vmatpush.xpose.msk.msra.mxu0 %vm1463_vm4, %v2655_v59  ;;  %v2723_v56 = vld [vmem:[#allocation12] sm:$0xff] }
 0xf8b   : > { %2652 = vrot.lane.b32.xlu2 %v2414_v60, %s4249_s7  ;;  %3334 = vmatmul.msk.f32.vlgmr.msrb.gmra.mxu3 %vm1463_vm4, %v2414_v60  ;;  %s5136_s7 = sld [smem:[#allocation57_spill]] }
 0xfe5   : > { %v2653_v63 = vpop.permute.xlu2 %2652 }
 0xff5   : > { %v2518_v61 = vpop.permute.xlu1 %2517 }
 0xff6   : > { %3331 = vmatmul.msk.f32.vlgmr.msrb.gmra.mxu0 %vm1463_vm4, %v2518_v61 }
 0xffe   : > { %3337 = vmatmul.msk.f32.vlgmr.msra.gmra.mxu0 %vm1463_vm4, %v2653_v63  ;;  %v3587_v63 = vld [vmem:[#allocation13] ss:$0 sm:$0xff] }
0x1006   : > { %v2476_v0 = vpop.f32.mrf.mxu2 }
0x1007   : > { %v2479_v1 = vmul.f32 0.25, %v2476_v0 }
0x1009   : > { %v2480_v2 = vsel %vm1489_vm5, %v2479_v1, -inf }
0x100a   : > { %2481 = vmax.xlane.f32.xlu2 %v2480_v2 }
0x100e   : > { %v2611_v25 = vpop.f32.mrf.mxu3 }
0x100f   : > { %v2614_v6 = vmul.f32 0.25, %v2611_v25 }
0x1011   : > { %v2615_v10 = vsel %vm1489_vm5, %v2614_v6, -inf }
0x1073   : > { %v2542_v3 = vpop.f32.mrf.mxu0 }
0x1074   : > { %v2545_v4 = vmul.f32 0.25, %v2542_v3 }
0x1076   : > { %v2546_v5 = vsel %vm1489_vm5, %v2545_v4, -inf }
0x1077   : > { %2547 = vmax.xlane.f32.xlu0 %v2546_v5 }
0x107b   : > { %v2677_v18 = vpop.f32.mrf.mxu0 }
0x107c   : > { %v2680_v7 = vmul.f32 0.25, %v2677_v18 }
0x107d   : > { %v2482_v8 = vpop.xlane.xlu2 %2481 }
0x107e   : > { %v2483_v9 = vsub.f32 %v2479_v1, %v2482_v8  ;;  %v2681_v11 = vsel %vm1489_vm5, %v2680_v7, -inf }
0x107f   : > { %2616 = vmax.xlane.f32.xlu0 %v2615_v10  ;;  %2682 = vmax.xlane.f32.xlu1 %v2681_v11 }
0x1080   : > { %v2484_v12 = vmul.f32 1.442695, %v2483_v9 }
0x1082   : > { %3641 = vpow2.f32 %v2484_v12 }
0x1088   : > { %v3642_v15 = vpop.eup %3641 }
0x1089   : > { %v2486_v16 = vsel %vm1489_vm5, %v3642_v15, 0.0 }
0x108a   : > { %2487 = vadd.xlane.f32.xlu1 %v2486_v16 }
0x1093   : > { %2557 = vrot.lane.b32.xlu0 %v4964_v20, %s4246_s3 }
0x109b   : > { %2491 = vrot.lane.b32.xlu0 %v4964_v20, %s4248_s2 }
0x10ea   : > { %v2548_v17 = vpop.xlane.xlu0 %2547 }
0x10eb   : > { %v2549_v62 = vsub.f32 %v2545_v4, %v2548_v17  ;;  %v2820_v17 = vld [vmem:[#allocation18 + $0x10] sm:$0xff] }
0x10ed   : > { %v2550_v21 = vmul.f32 1.442695, %v2549_v62  ;;  %v2819_v62 = vld [vmem:[#allocation18 + $0x8] sm:$0xff] }
0x10ef   : > { %3643 = vpow2.f32 %v2550_v21  ;;  %v2818_v21 = vld [vmem:[#allocation18] sm:$0xff] }
0x10f2   : > { %v2617_v23 = vpop.xlane.xlu0 %2616  ;;  %v2683_v26 = vpop.xlane.xlu1 %2682 }
0x10f3   : > { %v2618_v28 = vsub.f32 %v2614_v6, %v2617_v23  ;;  %v2684_v31 = vsub.f32 %v2680_v7, %v2683_v26 }
0x10f5   : > { %v3644_v29 = vpop.eup %3643  ;;  %v2619_v30 = vmul.f32 1.442695, %v2618_v28  ;;  %v2685_v33 = vmul.f32 1.442695, %v2684_v31 }
0x10f6   : > { %v2552_v32 = vsel %vm1489_vm5, %v3644_v29, 0.0 }
0x10f7   : > { %2553 = vadd.xlane.f32.xlu2 %v2552_v32  ;;  %3645 = vpow2.f32 %v2619_v30 }
0x10f8   : > { %3647 = vpow2.f32 %v2685_v33 }
0x10fd   : > { %v3646_v35 = vpop.eup %3645  ;;  %v2488_v20 = vpop.xlane.xlu1 %2487 }
0x10fe   : > { %v2621_v36 = vsel %vm1489_vm5, %v3646_v35, 0.0  ;;  %v3648_v37 = vpop.eup %3647  ;;  %3649 = vrcp.f32 %v2488_v20 }
0x10ff   : > { %2622 = vadd.xlane.f32.xlu1 %v2621_v36  ;;  %v2687_v39 = vsel %vm1489_vm5, %v3648_v37, 0.0  ;;  %v3588_v36 = vld [vmem:[#allocation15] ss:$0 sm:$0xff] }
0x1104   : > { %v3650_v40 = vpop.eup %3649 }
0x1105   : > { %v2558_v38 = vpop.permute.xlu0 %2557  ;;  %v2490_v13 = vmul.f32 %v3650_v40, %v3642_v15 }
0x1106   : > { %2578 = vmatpush.msrb.mxu1 %v2558_v38  ;;  %v3589_v38 = vld [vmem:[#allocation16] ss:$0 sm:$0xff] }
0x1107   : > { %2688 = vadd.xlane.f32.xlu1 %v2687_v39 }
0x110d   : > { %v2492_v19 = vpop.permute.xlu0 %2491 }
0x110e   : > { %2512 = vmatpush.msra.mxu2 %v2492_v19 }
0x110f   : > { %2692 = vrot.lane.b32.xlu2 %v4986_v54, %s4246_s3  ;;  %3329 = vmatmul.msk.f32.vlgmr.msra.gmra.mxu2 %vm1489_vm5, %v2490_v13  ;;  %s5134_s3 = smov 16  }
0x1120   : > { %2626 = vrot.lane.b32.xlu1 %v4986_v54, %s4248_s2  ;;  %v2724_v54 = vld [vmem:[#allocation12 + $0x8] sm:$0xff]  ;;  %s5135_s2 = sld [smem:[#allocation56_spill]] }
0x1121   : > { %2751 = vmatpush.msra.mxu3 %v2724_v54 }
0x1123   : > { %2752 = vmatpush.msra.mxu3 %v2723_v56 }
0x1126   : > { %v2864_v13 = vld [vmem:[%s5135_s2 + $0x38] sm:$0xff]  ;;  %v2863_v19 = vld [vmem:[%s5135_s2 + $0x30] sm:$0xff] }
0x1127   : > { %2883 = vmatpush.msrb.mxu0 %v2864_v13  ;;  %v2859_v56 = vld [vmem:[%s5135_s2 + $0x10] sm:$0xff]  ;;  %v3593_v13 = vld [vmem:[#allocation24] ss:$0 sm:$0xff] }
0x1129   : > { %2884 = vmatpush.msrb.mxu0 %v2863_v19 }
0x116a   : > { %v2554_v41 = vpop.xlane.xlu2 %2553 }
0x116b   : > { %3651 = vrcp.f32 %v2554_v41  ;;  %v2862_v41 = vld [vmem:[%s5135_s2 + $0x28] sm:$0xff] }
0x116c   : > { %2885 = vmatpush.msrb.mxu0 %v2862_v41 }
0x1171   : > { %v3652_v24 = vpop.eup %3651 }
0x1172   : > { %v2556_v42 = vmul.f32 %v3652_v24, %v3644_v29  ;;  %v2693_v43 = vpop.permute.xlu2 %2692  ;;  %v2623_v44 = vpop.xlane.xlu1 %2622 }
0x1173   : > { %2713 = vmatpush.msra.mxu1 %v2693_v43  ;;  %v2861_v43 = vld [vmem:[%s5135_s2 + $0x20] sm:$0xff] }
0x1174   : > { %3332 = vmatmul.msk.f32.vlgmr.msrb.gmra.mxu1 %vm1489_vm5, %v2556_v42  ;;  %2886 = vmatpush.msrb.mxu0 %v2861_v43 }
0x117a   : > { %v2689_v45 = vpop.xlane.xlu1 %2688 }
0x117b   : > { %3653 = vrcp.f32 %v2689_v45  ;;  %v2860_v45 = vld [vmem:[%s5135_s2 + $0x18] sm:$0xff] }
0x117c   : > { %3655 = vrcp.f32 %v2623_v44  ;;  %2887 = vmatpush.msrb.mxu0 %v2860_v45 }
0x117e   : > { %2888 = vmatpush.msrb.mxu0 %v2859_v56 }
0x1181   : > { %v3654_v14 = vpop.eup %3653 }
0x1182   : > { %v2691_v27 = vmul.f32 %v3654_v14, %v3648_v37  ;;  %v3656_v34 = vpop.eup %3655 }
0x1183   : > { %v2625_v47 = vmul.f32 %v3656_v34, %v3646_v35 }
0x1184   : > { %3338 = vmatmul.msk.f32.vlgmr.msra.gmra.mxu1 %vm1489_vm5, %v2691_v27 }
0x1192   : > { %v2627_v48 = vpop.permute.xlu1 %2626  ;;  %v2514_v22 = vpop.f32.mrf.mxu2 }
0x1193   : > { %2647 = vmatpush.msrb.mxu2 %v2627_v48 }
0x1194   : > { %3335 = vmatmul.msk.f32.vlgmr.msrb.gmra.mxu2 %vm1489_vm5, %v2625_v47 }
0x11f1   : > { %v2580_v49 = vpop.f32.mrf.mxu1 }
0x11f2   : > { %2584 = vrot.lane.b32.xlu2 %v2580_v49, %s5134_s3 }
0x1201   : > { %v2715_v55 = vpop.f32.mrf.mxu1 }
0x1202   : > { %2719 = vrot.lane.b32.xlu0 %v2715_v55, %s5134_s3  ;;  %s1365_s3 = scalar_lea.vmem %s5136_s7, %s5137_s11 }
0x1217   : > { %v2649_v59 = vpop.f32.mrf.mxu2 }
0x124c   : > { %v2585_v57 = vpop.permute.xlu2 %2584 }
0x124d   : > { %v2587_v58 = vsel %vm1463_vm4, %v2514_v22, %v2585_v57  ;;  %v2858_v22 = vld [vmem:[%s5135_s2 + $0x8] sm:$0xff]  ;;  %v2857_v57 = vld [vmem:[%s5135_s2] sm:$0xff] }
0x124e   : > { %3339 = vmatmul.msk.f32.vlgmr.msra.gmra.mxu3 %vm1430_vm3, %v2587_v58  ;;  %2889 = vmatpush.msrb.mxu0 %v2858_v22  ;;  %v3590_v58 = vld [vmem:[#allocation19] ss:$0 sm:$0xff] }
0x1250   : > { %2890 = vmatpush.msrb.mxu0 %v2857_v57 }
0x1274   : > { %v2720_v60 = vpop.permute.xlu0 %2719 }
0x1275   : > { %v2722_v61 = vsel %vm1463_vm4, %v2649_v59, %v2720_v60 }
0x1276   : > { %3340 = vmatmul.msk.f32.gmra.mxu3 %vm1430_vm3, %v2722_v61 }
0x12d1   : > { %v2754_v0 = vpop.f32.mrf.mxu3 }
0x12d2   : > { %v2755_v1 = vadd.f32 %v3587_v63, %v2754_v0 }
0x12d4   : > { %v2760_v2 = vadd.f32 %v2755_v1, %v4977_v46 }
0x12d6   : > { %v2762_v3 = vsel %vm1430_vm3, %v2760_v2, 0.0 }
0x12d7   : > { %2763 = vadd.xlane.f32.xlu2 %v2762_v3 }
0x12f9   : > { %v2757_v4 = vpop.f32.mrf.mxu3 }
0x12fa   : > { %v2758_v5 = vadd.f32 %v3587_v63, %v2757_v4 }
0x12fc   : > { %v2761_v25 = vadd.f32 %v2758_v5, %v4982_v51  ;;  %v2821_v51 = vld [vmem:[#allocation18 + $0x18] sm:$0xff] }
0x12fd   : > { %2844 = vmatpush.msra.mxu2 %v2821_v51 }
0x12fe   : > { %v2765_v6 = vsel %vm1430_vm3, %v2761_v25, 0.0 }
0x12ff   : > { %2766 = vadd.xlane.f32.xlu0 %v2765_v6  ;;  %2845 = vmatpush.msra.mxu2 %v2820_v17 }
0x1301   : > { %2846 = vmatpush.msra.mxu2 %v2819_v62 }
0x1303   : > { %2847 = vmatpush.msra.mxu2 %v2818_v21  ;;  %v2959_v21 = vld [vmem:[#allocation25 + $0x18] sm:$0xff] }
0x1304   : > { %2982 = vmatpush.msrb.mxu1 %v2959_v21 }
0x134a   : > { %v2764_v18 = vpop.xlane.xlu2 %2763 }
0x134b   : > { %v2768_v7 = vmul.f32 %v2764_v18, %v4793_v52 }
0x134d   : > { %v2770_v8 = vsub.f32 %v2760_v2, %v2768_v7  ;;  %v3591_v2 = vld [vmem:[#allocation21] ss:$0 sm:$0xff] }
0x134f   : > { %v2772_v9 = vmul.f32 %v2770_v8, %v2770_v8 }
0x1351   : > { %v2774_v10 = vsel %vm1430_vm3, %v2772_v9, 0.0 }
0x1352   : > { %2775 = vadd.xlane.f32.xlu1 %v2774_v10 }
0x1372   : > { %v2767_v11 = vpop.xlane.xlu0 %2766 }
0x1373   : > { %v2769_v46 = vmul.f32 %v2767_v11, %v4793_v52 }
0x1375   : > { %v2771_v12 = vsub.f32 %v2761_v25, %v2769_v46 }
0x1377   : > { %v2773_v15 = vmul.f32 %v2771_v12, %v2771_v12 }
0x1379   : > { %v2777_v16 = vsel %vm1430_vm3, %v2773_v15, 0.0 }
0x137a   : > { %2778 = vadd.xlane.f32.xlu2 %v2777_v16 }
0x13c5   : > { %v2776_v23 = vpop.xlane.xlu1 %2775 }
0x13c6   : > { %v2780_v26 = vmul.f32 %v2776_v23, %v4793_v52  ;;  %v2958_v23 = vld [vmem:[#allocation25 + $0x10] sm:$0xff] }
0x13c7   : > { %2983 = vmatpush.msrb.mxu1 %v2958_v23 }
0x13c8   : > { %v2782_v28 = vadd.f32 1e-05, %v2780_v26  ;;  %v2957_v26 = vld [vmem:[#allocation25 + $0x8] sm:$0xff] }
0x13c9   : > { %2984 = vmatpush.msrb.mxu1 %v2957_v26 }
0x13ca   : > { %3657 = vrsqrt.f32 %v2782_v28  ;;  %vm2790_vm5 = vweird.f32 %v2782_v28 }
0x13d0   : > { %v3658_v29 = vpop.eup %3657 }
0x13d1   : > { %v2785_v30 = vmul.f32 %v3658_v29, %v2782_v28  ;;  %vm2791_vm4 = vweird.f32 %v3658_v29  ;;  %v2956_v28 = vld [vmem:[#allocation25] sm:$0xff] }
0x13d2   : > { %vm2792_vm14 = vmor %vm2790_vm5, %vm2791_vm4  ;;  %2985 = vmatpush.msrb.mxu1 %v2956_v28 }
0x13d3   : > { %v2786_v31 = vmul.f32 %v3658_v29, %v2785_v30 }
0x13d5   : > { %v2787_v32 = vmul.f32 0.5, %v2786_v31 }
0x13d7   : > { %v2788_v33 = vsub.f32 1.5, %v2787_v32 }
0x13d9   : > { %v2789_v35 = vmul.f32 %v3658_v29, %v2788_v33 }
0x13db   : > { %v2793_v20 = vsel %vm2792_vm14, %v3658_v29, %v2789_v35 }
0x13dc   : > { %v2804_v37 = vmul.f32 %v2793_v20, %v2770_v8 }
0x13de   : > { %v2810_v39 = vmul.f32 %v3588_v36, %v2804_v37 }
0x13e0   : > { %v2816_v40 = vadd.f32 %v3589_v38, %v2810_v39 }
0x13e2   : > { %3341 = vmatmul.msk.f32.vlgmr.msra.gmra.mxu2 %vm1430_vm3, %v2816_v40 }
0x13ed   : > { %v2779_v24 = vpop.xlane.xlu2 %2778 }
0x13ee   : > { %v2781_v42 = vmul.f32 %v2779_v24, %v4793_v52 }
0x13f0   : > { %v2783_v44 = vadd.f32 1e-05, %v2781_v42 }
0x13f2   : > { %3659 = vrsqrt.f32 %v2783_v44  ;;  %vm2800_vm1 = vweird.f32 %v2783_v44 }
0x13f8   : > { %v3660_v14 = vpop.eup %3659 }
0x13f9   : > { %v2795_v27 = vmul.f32 %v3660_v14, %v2783_v44  ;;  %vm2801_vm15 = vweird.f32 %v3660_v14 }
0x13fa   : > { %vm2802_vm2 = vmor %vm2800_vm1, %vm2801_vm15 }
0x13fb   : > { %v2796_v34 = vmul.f32 %v3660_v14, %v2795_v27 }
0x13fd   : > { %v2797_v47 = vmul.f32 0.5, %v2796_v34 }
0x13ff   : > { %v2798_v48 = vsub.f32 1.5, %v2797_v47 }
0x1401   : > { %v2799_v49 = vmul.f32 %v3660_v14, %v2798_v48 }
0x1403   : > { %v2803_v50 = vsel %vm2802_vm2, %v3660_v14, %v2799_v49 }
0x1404   : > { %v2805_v53 = vmul.f32 %v2803_v50, %v2771_v12 }
0x1406   : > { %v2811_v54 = vmul.f32 %v3588_v36, %v2805_v53 }
0x1408   : > { %v2817_v55 = vadd.f32 %v3589_v38, %v2811_v54  ;;  %v3592_v38 = vld [vmem:[#allocation22] ss:$0 sm:$0xff] }
0x140a   : > { %3342 = vmatmul.msk.f32.gmra.mxu2 %vm1430_vm3, %v2817_v55 }
0x1465   : > { %v2849_v59 = vpop.f32.mrf.mxu2 }
0x1466   : > { %v2850_v60 = vadd.f32 %v3590_v58, %v2849_v59 }
0x1468   : > { %v2855_v61 = vmax.f32 %v2850_v60, 0.0 }
0x146a   : > { %3343 = vmatmul.msk.f32.vlgmr.msrb.gmra.mxu0 %vm1392_vm0, %v2855_v61 }
0x148d   : > { %v2852_v63 = vpop.f32.mrf.mxu2 }
0x148e   : > { %v2853_v0 = vadd.f32 %v3590_v58, %v2852_v63 }
0x1490   : > { %v2856_v1 = vmax.f32 %v2853_v0, 0.0 }
0x1492   : > { %3344 = vmatmul.msk.f32.gmra.mxu0 %vm1392_vm0, %v2856_v1 }
0x14e7   : > { %v2892_v3 = vpop.f32.mrf.mxu0 }
0x14e8   : > { %v2893_v4 = vadd.f32 %v3591_v2, %v2892_v3 }
0x14ea   : > { %v2898_v5 = vadd.f32 %v2893_v4, %v2816_v40 }
0x14ec   : > { %v2900_v25 = vsel %vm1430_vm3, %v2898_v5, 0.0 }
0x14ed   : > { %2901 = vadd.xlane.f32.xlu0 %v2900_v25 }
0x150f   : > { %v2895_v6 = vpop.f32.mrf.mxu0 }
0x1510   : > { %v2896_v18 = vadd.f32 %v3591_v2, %v2895_v6 }
0x1512   : > { %v2899_v7 = vadd.f32 %v2896_v18, %v2817_v55 }
0x1514   : > { %v2903_v8 = vsel %vm1430_vm3, %v2899_v7, 0.0 }
0x1515   : > { %2904 = vadd.xlane.f32.xlu2 %v2903_v8 }
0x1560   : > { %v2902_v9 = vpop.xlane.xlu0 %2901 }
0x1561   : > { %v2906_v10 = vmul.f32 %v2902_v9, %v4793_v52 }
0x1563   : > { %v2908_v11 = vsub.f32 %v2898_v5, %v2906_v10 }
0x1565   : > { %v2910_v46 = vmul.f32 %v2908_v11, %v2908_v11 }
0x1567   : > { %v2912_v12 = vsel %vm1430_vm3, %v2910_v46, 0.0 }
0x1568   : > { %2913 = vadd.xlane.f32.xlu0 %v2912_v12 }
0x1588   : > { %v2905_v15 = vpop.xlane.xlu2 %2904 }
0x1589   : > { %v2907_v16 = vmul.f32 %v2905_v15, %v4793_v52 }
0x158b   : > { %v2909_v51 = vsub.f32 %v2899_v7, %v2907_v16 }
0x158d   : > { %v2911_v17 = vmul.f32 %v2909_v51, %v2909_v51 }
0x158f   : > { %v2915_v62 = vsel %vm1430_vm3, %v2911_v17, 0.0 }
0x1590   : > { %2916 = vadd.xlane.f32.xlu1 %v2915_v62 }
0x15db   : > { %v2914_v29 = vpop.xlane.xlu0 %2913 }
0x15dc   : > { %v2918_v30 = vmul.f32 %v2914_v29, %v4793_v52 }
0x15de   : > { %v2920_v31 = vadd.f32 1e-05, %v2918_v30 }
0x15e0   : > { %3661 = vrsqrt.f32 %v2920_v31  ;;  %vm2928_vm6 = vweird.f32 %v2920_v31 }
0x15e6   : > { %v3662_v32 = vpop.eup %3661 }
0x15e7   : > { %v2923_v33 = vmul.f32 %v3662_v32, %v2920_v31  ;;  %vm2929_vm0 = vweird.f32 %v3662_v32 }
0x15e8   : > { %vm2930_vm7 = vmor %vm2928_vm6, %vm2929_vm0 }
0x15e9   : > { %v2924_v35 = vmul.f32 %v3662_v32, %v2923_v33 }
0x15eb   : > { %v2925_v36 = vmul.f32 0.5, %v2924_v35 }
0x15ed   : > { %v2926_v20 = vsub.f32 1.5, %v2925_v36 }
0x15ef   : > { %v2927_v37 = vmul.f32 %v3662_v32, %v2926_v20 }
0x15f1   : > { %v2931_v39 = vsel %vm2930_vm7, %v3662_v32, %v2927_v37 }
0x15f2   : > { %v2942_v40 = vmul.f32 %v2931_v39, %v2908_v11 }
0x15f4   : > { %v2948_v19 = vmul.f32 %v3592_v38, %v2942_v40 }
0x15f6   : > { %v2954_v41 = vadd.f32 %v3593_v13, %v2948_v19 }
0x15f8   : > { %3345 = vmatmul.msk.f32.vlgmr.msrb.gmra.mxu1 %vm1430_vm3, %v2954_v41 }
0x1603   : > { %v2917_v24 = vpop.xlane.xlu1 %2916 }
0x1604   : > { %v2919_v42 = vmul.f32 %v2917_v24, %v4793_v52  ;;  %v3594_v52 = vld [vmem:[%s4441_s9] ss:$0 sm:$0xff] }
0x1606   : > { %v2921_v43 = vadd.f32 1e-05, %v2919_v42 }
0x1608   : > { %3663 = vrsqrt.f32 %v2921_v43  ;;  %vm2938_vm9 = vweird.f32 %v2921_v43 }
0x160e   : > { %v3664_v44 = vpop.eup %3663 }
0x160f   : > { %v2933_v45 = vmul.f32 %v3664_v44, %v2921_v43  ;;  %vm2939_vm8 = vweird.f32 %v3664_v44 }
0x1610   : > { %vm2940_vm10 = vmor %vm2938_vm9, %vm2939_vm8 }
0x1611   : > { %v2934_v14 = vmul.f32 %v3664_v44, %v2933_v45 }
0x1613   : > { %v2935_v27 = vmul.f32 0.5, %v2934_v14 }
0x1615   : > { %v2936_v34 = vsub.f32 1.5, %v2935_v27 }
0x1617   : > { %v2937_v47 = vmul.f32 %v3664_v44, %v2936_v34 }
0x1619   : > { %v2941_v48 = vsel %vm2940_vm10, %v3664_v44, %v2937_v47 }
0x161a   : > { %v2943_v49 = vmul.f32 %v2941_v48, %v2909_v51 }
0x161c   : > { %v2949_v50 = vmul.f32 %v3592_v38, %v2943_v49 }
0x161e   : > { %v2955_v53 = vadd.f32 %v3593_v13, %v2949_v50 }
0x1620   : > { %3346 = vmatmul.msk.f32.gmra.mxu1 %vm1430_vm3, %v2955_v53 }
0x1675   : > { %v2987_v54 = vpop.f32.mrf.mxu1 }
0x1676   : > { %v2988_v55 = vadd.f32 %v3594_v52, %v2987_v54 }
0x1678   : > { %2993 = vst [vmem:[%s1365_s3] sm:$0xff] %v2988_v55 }
0x169d   : > { %v2990_v56 = vpop.f32.mrf.mxu1 }
0x169e   : > { %v2991_v22 = vadd.f32 %v3594_v52, %v2990_v56 }
0x16a0   : > { %2994 = vst [vmem:[%s1365_s3 + $0x8] sm:$0xff] %v2991_v22 }
0x16a1 PF: > { %s5138_s0 = sld [smem:[#allocation58_spill]] }
0x16a7   : > { %s94_s7 = sadd.s32 1, %s5138_s0  }
0x16a8   : > { %p91_p2 = scmp.ge.s32.totalorder %s94_s7, 4  }
0x16aa   :  { %93 = sbr.rel (!%p91_p2) target bundleno = 73 (0x49), region = 300 }
0x16af   :  { %3016 = vsyncpa [#allocation3], 1 }
0x16b0   :  { %3018 = vsyncpa [#allocation3 + $0x1], 1 }
0x16b1   :  { %3019 = vsyncpa [#allocation5], 1 }
0x16b2   :  { %3020 = vsyncpa [#allocation8], 1 }
0x16b3   :  { %3021 = vsyncpa [#allocation11], 1 }
0x16b4   :  { %3022 = vsyncpa [#allocation14], 1 }
0x16b5   :  { %3023 = vsyncpa [#allocation17], 1 }
0x16b6   :  { %3024 = vsyncpa [#allocation20], 1 }
0x16b7   :  { %3025 = vsyncpa [#allocation23], 1 }
0x16b8   :  { %3026 = vsyncpa [#allocation26], 1 }

</bundles_post_ra>
